<compile_context>
chip_gen: v6e
topology: v6e:2x2x1
jax: 0.10.0
libtpu: 0.0.40
codegen_flags: <defaults>
</compile_context>

<pallas_src>
import functools

import jax
import jax.numpy as jnp
import numpy as np
from jax.experimental import pallas as pl
from jax.experimental.pallas import tpu as pltpu


def _partial_ar_lstm_kernel(seq_ref, whh_ref, w1_ref, rows4h_ref, fcsm_ref,
                            b2_ref, out_ref, *, hidden_dim, batch_size,
                            seq_len, target_size):
    H = hidden_dim
    B = batch_size

    whh = whh_ref[...]                 # (H, 4H)    == W_hh^T
    w1 = w1_ref[...]                   # (H, H//2)  == fc[0].weight^T
    rows = rows4h_ref[...]             # (2, 4H)
    wih_row = rows[0:1, :]             # (1, 4H)    == W_ih^T (input dim is 1)
    bias = rows[1:2, :]                # (1, 4H)    == b_ih + b_hh
    fcsm = fcsm_ref[...]               # (2, H//2)
    b1 = fcsm[0:1, :]                  # (1, H//2)  == fc[0].bias
    w2 = fcsm[1:2, :]                  # (1, H//2)  == fc[2].weight (row)
    b2 = b2_ref[0]                     # scalar     == fc[2].bias (SMEM)

    def sigmoid(x):
        # Exact identity, single EUP op (tanh) + 2 VPU ops.
        return 0.5 * jnp.tanh(0.5 * x) + 0.5

    def gates_to_hc(gates, c):
        # H is a multiple of 128 -> every gate slice starts on a lane boundary.
        i_g = sigmoid(gates[:, 0 * H:1 * H])
        f_g = sigmoid(gates[:, 1 * H:2 * H])
        g_g = jnp.tanh(gates[:, 2 * H:3 * H])
        o_g = sigmoid(gates[:, 3 * H:4 * H])
        c_new = f_g * c + i_g * g_g
        h_new = o_g * jnp.tanh(c_new)
        return h_new, c_new

    def fc_hidden(h):
        return jnp.maximum(
            jnp.dot(h, w1, preferred_element_type=jnp.float32) + b1, 0.0)

    h = jnp.zeros((B, H), jnp.float32)
    c = jnp.zeros((B, H), jnp.float32)

    # ---- encode phase (fully unrolled) --------------------------------------
    # x_t * wih_row + bias does not depend on h/c, so the scheduler can hoist
    # it off the serial chain; only the add + matmul + nonlinearities are on it.
    for t in range(seq_len):
        x_t = seq_ref[:, t:t + 1]                                  # (B, 1)
        gates = (x_t * wih_row + bias
                 + jnp.dot(h, whh, preferred_element_type=jnp.float32))
        h, c = gates_to_hc(gates, c)

    # ---- autoregressive phase (fully unrolled, rank-1 fc -> gate path) ------
    preds = []
    z = fc_hidden(h)                                               # (B, H//2)
    pred = jnp.sum(z * w2, axis=-1, keepdims=True) + b2            # (B, 1)
    preds.append(pred)
    for _ in range(1, target_size):
        # h @ W_hh^T (MXU) is independent of the pred path (VPU/XLU); only the
        # final add + nonlinearities join them.
        gates = (pred * wih_row + bias
                 + jnp.dot(h, whh, preferred_element_type=jnp.float32))
        h, c = gates_to_hc(gates, c)
        z = fc_hidden(h)
        pred = jnp.sum(z * w2, axis=-1, keepdims=True) + b2
        preds.append(pred)

    # Time-major (T, B) stack, single dense store.
    out_ref[...] = jnp.stack(preds, axis=0).reshape(target_size, B)


@functools.partial(jax.jit, static_argnames=("hidden_dim", "target_size"))
def partial_autoregressive_lstm(sequence, params, *, hidden_dim, target_size):
    B, S, _ = sequence.shape
    H = hidden_dim
    assert H % 128 == 0, \
        "hidden_dim must be a multiple of 128 (gate-slice / lane alignment)"

    # Only layout plumbing below (squeeze / transpose / packing of tiny params);
    # everything data-dependent happens inside the kernel.  In a real model the
    # transposed / packed weights would be prepared once at load time.
    seq_bt = sequence[:, :, 0].astype(jnp.float32)                   # (B, S)
    whh_t = params["w_hh"].T.astype(jnp.float32)                     # (H, 4H)
    w1_t = params["fc_w1"].T.astype(jnp.float32)                     # (H, H//2)
    wih_row = params["w_ih"].T.astype(jnp.float32)                   # (1, 4H)
    bias = (params["b_ih"] + params["b_hh"]).astype(jnp.float32)[None, :]
    rows4h = jnp.concatenate([wih_row, bias], axis=0)                # (2, 4H)
    fcsm = jnp.concatenate(
        [params["fc_b1"][None, :], params["fc_w2"]], axis=0
    ).astype(jnp.float32)                                            # (2, H//2)
    b2 = params["fc_b2"].astype(jnp.float32)                         # (1,)

    kernel = functools.partial(
        _partial_ar_lstm_kernel,
        hidden_dim=H, batch_size=B, seq_len=S, target_size=target_size)

    vmem = pl.BlockSpec(memory_space=pltpu.MemorySpace.VMEM)
    smem = pl.BlockSpec(memory_space=pltpu.MemorySpace.SMEM)

    stacked = pl.pallas_call(
        kernel,
        out_shape=jax.ShapeDtypeStruct((target_size, B), jnp.float32),
        in_specs=[vmem, vmem, vmem, vmem, vmem, smem],
        out_specs=vmem,
    )(seq_bt, whh_t, w1_t, rows4h, fcsm, b2)

    # PyTorch: outputs.view(B, T, 1) is a raw reshape of the time-major stack
    # (NOT a transpose; interleaves time/batch for B > 1).  Reproduce exactly.
    return jnp.reshape(stacked, (B, target_size, 1))


def init_params(key, hidden_dim):
    H = hidden_dim
    ks = jax.random.split(key, 8)
    s_lstm = 1.0 / np.sqrt(H)
    s_fc1 = 1.0 / np.sqrt(H)
    s_fc2 = 1.0 / np.sqrt(H // 2)

    def u(k, shape, scale):
        return jax.random.uniform(k, shape, jnp.float32, -scale, scale)

    return dict(
        w_ih=u(ks[0], (4 * H, 1), s_lstm),      # LSTMCell.weight_ih
        w_hh=u(ks[1], (4 * H, H), s_lstm),      # LSTMCell.weight_hh
        b_ih=u(ks[2], (4 * H,), s_lstm),
        b_hh=u(ks[3], (4 * H,), s_lstm),
        fc_w1=u(ks[4], (H // 2, H), s_fc1),     # fc[0] Linear(H, H//2)
        fc_b1=u(ks[5], (H // 2,), s_fc1),
        fc_w2=u(ks[6], (1, H // 2), s_fc2),     # fc[2] Linear(H//2, 1)
        fc_b2=u(ks[7], (1,), s_fc2),
    )


def reference_forward(sequence, params, *, hidden_dim, target_size):
    """Pure-JAX mirror of the PyTorch forward (for correctness checking)."""
    B, S, _ = sequence.shape
    H = hidden_dim
    wih, whh = params["w_ih"], params["w_hh"]
    b = params["b_ih"] + params["b_hh"]

    def cell(x, h, c):
        gates = x @ wih.T + h @ whh.T + b
        i = jax.nn.sigmoid(gates[:, :H])
        f = jax.nn.sigmoid(gates[:, H:2 * H])
        g = jnp.tanh(gates[:, 2 * H:3 * H])
        o = jax.nn.sigmoid(gates[:, 3 * H:])
        c = f * c + i * g
        return o * jnp.tanh(c), c

    def fc(h):
        z = jnp.maximum(h @ params["fc_w1"].T + params["fc_b1"], 0.0)
        return z @ params["fc_w2"].T + params["fc_b2"]

    h = jnp.zeros((B, H), jnp.float32)
    c = jnp.zeros((B, H), jnp.float32)
    for i in range(S):
        h, c = cell(sequence[:, i], h, c)
    out = fc(h)
    outs = [out]
    for _ in range(1, target_size):
        h, c = cell(out, h, c)
        out = fc(h)
        outs.append(out)
    stacked = jnp.stack(outs)                    # (T, B, 1)
    return jnp.reshape(stacked, (B, target_size, 1))


if __name__ == "__main__":
    hidden_dim = 128
    batch = 4
    seq_len = 8
    target_size = 6

    key = jax.random.PRNGKey(0)
    kp, kx = jax.random.split(key)
    params = init_params(kp, hidden_dim)
    sequence = jax.random.normal(kx, (batch, seq_len, 1), jnp.float32)

    out = partial_autoregressive_lstm(
        sequence, params, hidden_dim=hidden_dim, target_size=target_size)
    out = jax.block_until_ready(out)

    ref = reference_forward(
        sequence, params, hidden_dim=hidden_dim, target_size=target_size)
    assert out.shape == (batch, target_size, 1)
    np.testing.assert_allclose(np.asarray(out), np.asarray(ref),
                               rtol=2e-4, atol=2e-4)
    print("KERNEL_OK")
</pallas_src>

<mosaic_0001>
module attributes {stable_mosaic.version = 11 : i64} {
  func.func @_partial_ar_lstm_kernel(%arg0: memref<4x8xf32, #tpu.memory_space<vmem>>, %arg1: memref<128x512xf32, #tpu.memory_space<vmem>>, %arg2: memref<128x64xf32, #tpu.memory_space<vmem>>, %arg3: memref<2x512xf32, #tpu.memory_space<vmem>>, %arg4: memref<2x64xf32, #tpu.memory_space<vmem>>, %arg5: memref<1xf32, #tpu.memory_space<smem>>, %arg6: memref<6x4xf32, #tpu.memory_space<vmem>>) attributes {dimension_semantics = [], scalar_prefetch = 0 : i64, scratch_operands = 0 : i64, tpu.core_type = #tpu.core_type<tc>} {
    %c0 = arith.constant 0 : index
    %c0_0 = arith.constant 0 : index
    %0 = vector.load %arg1[%c0, %c0_0] : memref<128x512xf32, #tpu.memory_space<vmem>>, vector<128x512xf32>
    %c0_1 = arith.constant 0 : index
    %c0_2 = arith.constant 0 : index
    %1 = vector.load %arg2[%c0_1, %c0_2] : memref<128x64xf32, #tpu.memory_space<vmem>>, vector<128x64xf32>
    %c0_3 = arith.constant 0 : index
    %c0_4 = arith.constant 0 : index
    %2 = vector.load %arg3[%c0_3, %c0_4] : memref<2x512xf32, #tpu.memory_space<vmem>>, vector<2x512xf32>
    %3 = vector.extract_strided_slice %2 {offsets = [0, 0], sizes = [1, 512], strides = [1, 1]} : vector<2x512xf32> to vector<1x512xf32>
    %4 = vector.extract_strided_slice %2 {offsets = [1, 0], sizes = [1, 512], strides = [1, 1]} : vector<2x512xf32> to vector<1x512xf32>
    %c0_5 = arith.constant 0 : index
    %c0_6 = arith.constant 0 : index
    %5 = vector.load %arg4[%c0_5, %c0_6] : memref<2x64xf32, #tpu.memory_space<vmem>>, vector<2x64xf32>
    %6 = vector.extract_strided_slice %5 {offsets = [0, 0], sizes = [1, 64], strides = [1, 1]} : vector<2x64xf32> to vector<1x64xf32>
    %7 = vector.extract_strided_slice %5 {offsets = [1, 0], sizes = [1, 64], strides = [1, 1]} : vector<2x64xf32> to vector<1x64xf32>
    %c0_7 = arith.constant 0 : index
    %8 = memref.load %arg5[%c0_7] : memref<1xf32, #tpu.memory_space<smem>>
    %cst = arith.constant 0.000000e+00 : f32
    %9 = vector.broadcast %cst : f32 to vector<4x128xf32>
    %cst_8 = arith.constant 0.000000e+00 : f32
    %10 = vector.broadcast %cst_8 : f32 to vector<4x128xf32>
    %c0_9 = arith.constant 0 : index
    %c0_10 = arith.constant 0 : index
    %11 = vector.load %arg0[%c0_9, %c0_10] : memref<4x8xf32, #tpu.memory_space<vmem>>, vector<4x1xf32>
    %12 = vector.broadcast %11 : vector<4x1xf32> to vector<4x512xf32>
    %13 = vector.broadcast %3 : vector<1x512xf32> to vector<4x512xf32>
    %14 = arith.mulf %12, %13 : vector<4x512xf32>
    %15 = vector.broadcast %4 : vector<1x512xf32> to vector<4x512xf32>
    %16 = arith.addf %14, %15 : vector<4x512xf32>
    %cst_11 = arith.constant dense<0.000000e+00> : vector<4x512xf32>
    %17 = tpu.matmul %9, %0, %cst_11 {dimension_numbers = #tpu.dot_dimension_numbers<[1], [0], [0], [1], [0, 0, 1, 1], [], []>} : vector<4x128xf32>, vector<128x512xf32>, vector<4x512xf32> -> vector<4x512xf32>
    %18 = arith.addf %16, %17 : vector<4x512xf32>
    %19 = vector.extract_strided_slice %18 {offsets = [0, 0], sizes = [4, 128], strides = [1, 1]} : vector<4x512xf32> to vector<4x128xf32>
    %cst_12 = arith.constant 5.000000e-01 : f32
    %20 = vector.broadcast %cst_12 : f32 to vector<4x128xf32>
    %21 = arith.mulf %20, %19 : vector<4x128xf32>
    %22 = math.tanh %21 : vector<4x128xf32>
    %cst_13 = arith.constant 5.000000e-01 : f32
    %23 = vector.broadcast %cst_13 : f32 to vector<4x128xf32>
    %24 = arith.mulf %23, %22 : vector<4x128xf32>
    %cst_14 = arith.constant 5.000000e-01 : f32
    %25 = vector.broadcast %cst_14 : f32 to vector<4x128xf32>
    %26 = arith.addf %24, %25 : vector<4x128xf32>
    %27 = vector.extract_strided_slice %18 {offsets = [0, 128], sizes = [4, 128], strides = [1, 1]} : vector<4x512xf32> to vector<4x128xf32>
    %cst_15 = arith.constant 5.000000e-01 : f32
    %28 = vector.broadcast %cst_15 : f32 to vector<4x128xf32>
    %29 = arith.mulf %28, %27 : vector<4x128xf32>
    %30 = math.tanh %29 : vector<4x128xf32>
    %cst_16 = arith.constant 5.000000e-01 : f32
    %31 = vector.broadcast %cst_16 : f32 to vector<4x128xf32>
    %32 = arith.mulf %31, %30 : vector<4x128xf32>
    %cst_17 = arith.constant 5.000000e-01 : f32
    %33 = vector.broadcast %cst_17 : f32 to vector<4x128xf32>
    %34 = arith.addf %32, %33 : vector<4x128xf32>
    %35 = vector.extract_strided_slice %18 {offsets = [0, 256], sizes = [4, 128], strides = [1, 1]} : vector<4x512xf32> to vector<4x128xf32>
    %36 = math.tanh %35 : vector<4x128xf32>
    %37 = vector.extract_strided_slice %18 {offsets = [0, 384], sizes = [4, 128], strides = [1, 1]} : vector<4x512xf32> to vector<4x128xf32>
    %cst_18 = arith.constant 5.000000e-01 : f32
    %38 = vector.broadcast %cst_18 : f32 to vector<4x128xf32>
    %39 = arith.mulf %38, %37 : vector<4x128xf32>
    %40 = math.tanh %39 : vector<4x128xf32>
    %cst_19 = arith.constant 5.000000e-01 : f32
    %41 = vector.broadcast %cst_19 : f32 to vector<4x128xf32>
    %42 = arith.mulf %41, %40 : vector<4x128xf32>
    %cst_20 = arith.constant 5.000000e-01 : f32
    %43 = vector.broadcast %cst_20 : f32 to vector<4x128xf32>
    %44 = arith.addf %42, %43 : vector<4x128xf32>
    %45 = arith.mulf %34, %10 : vector<4x128xf32>
    %46 = arith.mulf %26, %36 : vector<4x128xf32>
    %47 = arith.addf %45, %46 : vector<4x128xf32>
    %48 = math.tanh %47 : vector<4x128xf32>
    %49 = arith.mulf %44, %48 : vector<4x128xf32>
    %c0_21 = arith.constant 0 : index
    %c1 = arith.constant 1 : index
    %50 = vector.load %arg0[%c0_21, %c1] : memref<4x8xf32, #tpu.memory_space<vmem>>, vector<4x1xf32>
    %51 = vector.broadcast %50 : vector<4x1xf32> to vector<4x512xf32>
    %52 = vector.broadcast %3 : vector<1x512xf32> to vector<4x512xf32>
    %53 = arith.mulf %51, %52 : vector<4x512xf32>
    %54 = vector.broadcast %4 : vector<1x512xf32> to vector<4x512xf32>
    %55 = arith.addf %53, %54 : vector<4x512xf32>
    %cst_22 = arith.constant dense<0.000000e+00> : vector<4x512xf32>
    %56 = tpu.matmul %49, %0, %cst_22 {dimension_numbers = #tpu.dot_dimension_numbers<[1], [0], [0], [1], [0, 0, 1, 1], [], []>} : vector<4x128xf32>, vector<128x512xf32>, vector<4x512xf32> -> vector<4x512xf32>
    %57 = arith.addf %55, %56 : vector<4x512xf32>
    %58 = vector.extract_strided_slice %57 {offsets = [0, 0], sizes = [4, 128], strides = [1, 1]} : vector<4x512xf32> to vector<4x128xf32>
    %cst_23 = arith.constant 5.000000e-01 : f32
    %59 = vector.broadcast %cst_23 : f32 to vector<4x128xf32>
    %60 = arith.mulf %59, %58 : vector<4x128xf32>
    %61 = math.tanh %60 : vector<4x128xf32>
    %cst_24 = arith.constant 5.000000e-01 : f32
    %62 = vector.broadcast %cst_24 : f32 to vector<4x128xf32>
    %63 = arith.mulf %62, %61 : vector<4x128xf32>
    %cst_25 = arith.constant 5.000000e-01 : f32
    %64 = vector.broadcast %cst_25 : f32 to vector<4x128xf32>
    %65 = arith.addf %63, %64 : vector<4x128xf32>
    %66 = vector.extract_strided_slice %57 {offsets = [0, 128], sizes = [4, 128], strides = [1, 1]} : vector<4x512xf32> to vector<4x128xf32>
    %cst_26 = arith.constant 5.000000e-01 : f32
    %67 = vector.broadcast %cst_26 : f32 to vector<4x128xf32>
    %68 = arith.mulf %67, %66 : vector<4x128xf32>
    %69 = math.tanh %68 : vector<4x128xf32>
    %cst_27 = arith.constant 5.000000e-01 : f32
    %70 = vector.broadcast %cst_27 : f32 to vector<4x128xf32>
    %71 = arith.mulf %70, %69 : vector<4x128xf32>
    %cst_28 = arith.constant 5.000000e-01 : f32
    %72 = vector.broadcast %cst_28 : f32 to vector<4x128xf32>
    %73 = arith.addf %71, %72 : vector<4x128xf32>
    %74 = vector.extract_strided_slice %57 {offsets = [0, 256], sizes = [4, 128], strides = [1, 1]} : vector<4x512xf32> to vector<4x128xf32>
    %75 = math.tanh %74 : vector<4x128xf32>
    %76 = vector.extract_strided_slice %57 {offsets = [0, 384], sizes = [4, 128], strides = [1, 1]} : vector<4x512xf32> to vector<4x128xf32>
    %cst_29 = arith.constant 5.000000e-01 : f32
    %77 = vector.broadcast %cst_29 : f32 to vector<4x128xf32>
    %78 = arith.mulf %77, %76 : vector<4x128xf32>
    %79 = math.tanh %78 : vector<4x128xf32>
    %cst_30 = arith.constant 5.000000e-01 : f32
    %80 = vector.broadcast %cst_30 : f32 to vector<4x128xf32>
    %81 = arith.mulf %80, %79 : vector<4x128xf32>
    %cst_31 = arith.constant 5.000000e-01 : f32
    %82 = vector.broadcast %cst_31 : f32 to vector<4x128xf32>
    %83 = arith.addf %81, %82 : vector<4x128xf32>
    %84 = arith.mulf %73, %47 : vector<4x128xf32>
    %85 = arith.mulf %65, %75 : vector<4x128xf32>
    %86 = arith.addf %84, %85 : vector<4x128xf32>
    %87 = math.tanh %86 : vector<4x128xf32>
    %88 = arith.mulf %83, %87 : vector<4x128xf32>
    %c0_32 = arith.constant 0 : index
    %c2 = arith.constant 2 : index
    %89 = vector.load %arg0[%c0_32, %c2] : memref<4x8xf32, #tpu.memory_space<vmem>>, vector<4x1xf32>
    %90 = vector.broadcast %89 : vector<4x1xf32> to vector<4x512xf32>
    %91 = vector.broadcast %3 : vector<1x512xf32> to vector<4x512xf32>
    %92 = arith.mulf %90, %91 : vector<4x512xf32>
    %93 = vector.broadcast %4 : vector<1x512xf32> to vector<4x512xf32>
    %94 = arith.addf %92, %93 : vector<4x512xf32>
    %cst_33 = arith.constant dense<0.000000e+00> : vector<4x512xf32>
    %95 = tpu.matmul %88, %0, %cst_33 {dimension_numbers = #tpu.dot_dimension_numbers<[1], [0], [0], [1], [0, 0, 1, 1], [], []>} : vector<4x128xf32>, vector<128x512xf32>, vector<4x512xf32> -> vector<4x512xf32>
    %96 = arith.addf %94, %95 : vector<4x512xf32>
    %97 = vector.extract_strided_slice %96 {offsets = [0, 0], sizes = [4, 128], strides = [1, 1]} : vector<4x512xf32> to vector<4x128xf32>
    %cst_34 = arith.constant 5.000000e-01 : f32
    %98 = vector.broadcast %cst_34 : f32 to vector<4x128xf32>
    %99 = arith.mulf %98, %97 : vector<4x128xf32>
    %100 = math.tanh %99 : vector<4x128xf32>
    %cst_35 = arith.constant 5.000000e-01 : f32
    %101 = vector.broadcast %cst_35 : f32 to vector<4x128xf32>
    %102 = arith.mulf %101, %100 : vector<4x128xf32>
    %cst_36 = arith.constant 5.000000e-01 : f32
    %103 = vector.broadcast %cst_36 : f32 to vector<4x128xf32>
    %104 = arith.addf %102, %103 : vector<4x128xf32>
    %105 = vector.extract_strided_slice %96 {offsets = [0, 128], sizes = [4, 128], strides = [1, 1]} : vector<4x512xf32> to vector<4x128xf32>
    %cst_37 = arith.constant 5.000000e-01 : f32
    %106 = vector.broadcast %cst_37 : f32 to vector<4x128xf32>
    %107 = arith.mulf %106, %105 : vector<4x128xf32>
    %108 = math.tanh %107 : vector<4x128xf32>
    %cst_38 = arith.constant 5.000000e-01 : f32
    %109 = vector.broadcast %cst_38 : f32 to vector<4x128xf32>
    %110 = arith.mulf %109, %108 : vector<4x128xf32>
    %cst_39 = arith.constant 5.000000e-01 : f32
    %111 = vector.broadcast %cst_39 : f32 to vector<4x128xf32>
    %112 = arith.addf %110, %111 : vector<4x128xf32>
    %113 = vector.extract_strided_slice %96 {offsets = [0, 256], sizes = [4, 128], strides = [1, 1]} : vector<4x512xf32> to vector<4x128xf32>
    %114 = math.tanh %113 : vector<4x128xf32>
    %115 = vector.extract_strided_slice %96 {offsets = [0, 384], sizes = [4, 128], strides = [1, 1]} : vector<4x512xf32> to vector<4x128xf32>
    %cst_40 = arith.constant 5.000000e-01 : f32
    %116 = vector.broadcast %cst_40 : f32 to vector<4x128xf32>
    %117 = arith.mulf %116, %115 : vector<4x128xf32>
    %118 = math.tanh %117 : vector<4x128xf32>
    %cst_41 = arith.constant 5.000000e-01 : f32
    %119 = vector.broadcast %cst_41 : f32 to vector<4x128xf32>
    %120 = arith.mulf %119, %118 : vector<4x128xf32>
    %cst_42 = arith.constant 5.000000e-01 : f32
    %121 = vector.broadcast %cst_42 : f32 to vector<4x128xf32>
    %122 = arith.addf %120, %121 : vector<4x128xf32>
    %123 = arith.mulf %112, %86 : vector<4x128xf32>
    %124 = arith.mulf %104, %114 : vector<4x128xf32>
    %125 = arith.addf %123, %124 : vector<4x128xf32>
    %126 = math.tanh %125 : vector<4x128xf32>
    %127 = arith.mulf %122, %126 : vector<4x128xf32>
    %c0_43 = arith.constant 0 : index
    %c3 = arith.constant 3 : index
    %128 = vector.load %arg0[%c0_43, %c3] : memref<4x8xf32, #tpu.memory_space<vmem>>, vector<4x1xf32>
    %129 = vector.broadcast %128 : vector<4x1xf32> to vector<4x512xf32>
    %130 = vector.broadcast %3 : vector<1x512xf32> to vector<4x512xf32>
    %131 = arith.mulf %129, %130 : vector<4x512xf32>
    %132 = vector.broadcast %4 : vector<1x512xf32> to vector<4x512xf32>
    %133 = arith.addf %131, %132 : vector<4x512xf32>
    %cst_44 = arith.constant dense<0.000000e+00> : vector<4x512xf32>
    %134 = tpu.matmul %127, %0, %cst_44 {dimension_numbers = #tpu.dot_dimension_numbers<[1], [0], [0], [1], [0, 0, 1, 1], [], []>} : vector<4x128xf32>, vector<128x512xf32>, vector<4x512xf32> -> vector<4x512xf32>
    %135 = arith.addf %133, %134 : vector<4x512xf32>
    %136 = vector.extract_strided_slice %135 {offsets = [0, 0], sizes = [4, 128], strides = [1, 1]} : vector<4x512xf32> to vector<4x128xf32>
    %cst_45 = arith.constant 5.000000e-01 : f32
    %137 = vector.broadcast %cst_45 : f32 to vector<4x128xf32>
    %138 = arith.mulf %137, %136 : vector<4x128xf32>
    %139 = math.tanh %138 : vector<4x128xf32>
    %cst_46 = arith.constant 5.000000e-01 : f32
    %140 = vector.broadcast %cst_46 : f32 to vector<4x128xf32>
    %141 = arith.mulf %140, %139 : vector<4x128xf32>
    %cst_47 = arith.constant 5.000000e-01 : f32
    %142 = vector.broadcast %cst_47 : f32 to vector<4x128xf32>
    %143 = arith.addf %141, %142 : vector<4x128xf32>
    %144 = vector.extract_strided_slice %135 {offsets = [0, 128], sizes = [4, 128], strides = [1, 1]} : vector<4x512xf32> to vector<4x128xf32>
    %cst_48 = arith.constant 5.000000e-01 : f32
    %145 = vector.broadcast %cst_48 : f32 to vector<4x128xf32>
    %146 = arith.mulf %145, %144 : vector<4x128xf32>
    %147 = math.tanh %146 : vector<4x128xf32>
    %cst_49 = arith.constant 5.000000e-01 : f32
    %148 = vector.broadcast %cst_49 : f32 to vector<4x128xf32>
    %149 = arith.mulf %148, %147 : vector<4x128xf32>
    %cst_50 = arith.constant 5.000000e-01 : f32
    %150 = vector.broadcast %cst_50 : f32 to vector<4x128xf32>
    %151 = arith.addf %149, %150 : vector<4x128xf32>
    %152 = vector.extract_strided_slice %135 {offsets = [0, 256], sizes = [4, 128], strides = [1, 1]} : vector<4x512xf32> to vector<4x128xf32>
    %153 = math.tanh %152 : vector<4x128xf32>
    %154 = vector.extract_strided_slice %135 {offsets = [0, 384], sizes = [4, 128], strides = [1, 1]} : vector<4x512xf32> to vector<4x128xf32>
    %cst_51 = arith.constant 5.000000e-01 : f32
    %155 = vector.broadcast %cst_51 : f32 to vector<4x128xf32>
    %156 = arith.mulf %155, %154 : vector<4x128xf32>
    %157 = math.tanh %156 : vector<4x128xf32>
    %cst_52 = arith.constant 5.000000e-01 : f32
    %158 = vector.broadcast %cst_52 : f32 to vector<4x128xf32>
    %159 = arith.mulf %158, %157 : vector<4x128xf32>
    %cst_53 = arith.constant 5.000000e-01 : f32
    %160 = vector.broadcast %cst_53 : f32 to vector<4x128xf32>
    %161 = arith.addf %159, %160 : vector<4x128xf32>
    %162 = arith.mulf %151, %125 : vector<4x128xf32>
    %163 = arith.mulf %143, %153 : vector<4x128xf32>
    %164 = arith.addf %162, %163 : vector<4x128xf32>
    %165 = math.tanh %164 : vector<4x128xf32>
    %166 = arith.mulf %161, %165 : vector<4x128xf32>
    %c0_54 = arith.constant 0 : index
    %c4 = arith.constant 4 : index
    %167 = vector.load %arg0[%c0_54, %c4] : memref<4x8xf32, #tpu.memory_space<vmem>>, vector<4x1xf32>
    %168 = vector.broadcast %167 : vector<4x1xf32> to vector<4x512xf32>
    %169 = vector.broadcast %3 : vector<1x512xf32> to vector<4x512xf32>
    %170 = arith.mulf %168, %169 : vector<4x512xf32>
    %171 = vector.broadcast %4 : vector<1x512xf32> to vector<4x512xf32>
    %172 = arith.addf %170, %171 : vector<4x512xf32>
    %cst_55 = arith.constant dense<0.000000e+00> : vector<4x512xf32>
    %173 = tpu.matmul %166, %0, %cst_55 {dimension_numbers = #tpu.dot_dimension_numbers<[1], [0], [0], [1], [0, 0, 1, 1], [], []>} : vector<4x128xf32>, vector<128x512xf32>, vector<4x512xf32> -> vector<4x512xf32>
    %174 = arith.addf %172, %173 : vector<4x512xf32>
    %175 = vector.extract_strided_slice %174 {offsets = [0, 0], sizes = [4, 128], strides = [1, 1]} : vector<4x512xf32> to vector<4x128xf32>
    %cst_56 = arith.constant 5.000000e-01 : f32
    %176 = vector.broadcast %cst_56 : f32 to vector<4x128xf32>
    %177 = arith.mulf %176, %175 : vector<4x128xf32>
    %178 = math.tanh %177 : vector<4x128xf32>
    %cst_57 = arith.constant 5.000000e-01 : f32
    %179 = vector.broadcast %cst_57 : f32 to vector<4x128xf32>
    %180 = arith.mulf %179, %178 : vector<4x128xf32>
    %cst_58 = arith.constant 5.000000e-01 : f32
    %181 = vector.broadcast %cst_58 : f32 to vector<4x128xf32>
    %182 = arith.addf %180, %181 : vector<4x128xf32>
    %183 = vector.extract_strided_slice %174 {offsets = [0, 128], sizes = [4, 128], strides = [1, 1]} : vector<4x512xf32> to vector<4x128xf32>
    %cst_59 = arith.constant 5.000000e-01 : f32
    %184 = vector.broadcast %cst_59 : f32 to vector<4x128xf32>
    %185 = arith.mulf %184, %183 : vector<4x128xf32>
    %186 = math.tanh %185 : vector<4x128xf32>
    %cst_60 = arith.constant 5.000000e-01 : f32
    %187 = vector.broadcast %cst_60 : f32 to vector<4x128xf32>
    %188 = arith.mulf %187, %186 : vector<4x128xf32>
    %cst_61 = arith.constant 5.000000e-01 : f32
    %189 = vector.broadcast %cst_61 : f32 to vector<4x128xf32>
    %190 = arith.addf %188, %189 : vector<4x128xf32>
    %191 = vector.extract_strided_slice %174 {offsets = [0, 256], sizes = [4, 128], strides = [1, 1]} : vector<4x512xf32> to vector<4x128xf32>
    %192 = math.tanh %191 : vector<4x128xf32>
    %193 = vector.extract_strided_slice %174 {offsets = [0, 384], sizes = [4, 128], strides = [1, 1]} : vector<4x512xf32> to vector<4x128xf32>
    %cst_62 = arith.constant 5.000000e-01 : f32
    %194 = vector.broadcast %cst_62 : f32 to vector<4x128xf32>
    %195 = arith.mulf %194, %193 : vector<4x128xf32>
    %196 = math.tanh %195 : vector<4x128xf32>
    %cst_63 = arith.constant 5.000000e-01 : f32
    %197 = vector.broadcast %cst_63 : f32 to vector<4x128xf32>
    %198 = arith.mulf %197, %196 : vector<4x128xf32>
    %cst_64 = arith.constant 5.000000e-01 : f32
    %199 = vector.broadcast %cst_64 : f32 to vector<4x128xf32>
    %200 = arith.addf %198, %199 : vector<4x128xf32>
    %201 = arith.mulf %190, %164 : vector<4x128xf32>
    %202 = arith.mulf %182, %192 : vector<4x128xf32>
    %203 = arith.addf %201, %202 : vector<4x128xf32>
    %204 = math.tanh %203 : vector<4x128xf32>
    %205 = arith.mulf %200, %204 : vector<4x128xf32>
    %c0_65 = arith.constant 0 : index
    %c5 = arith.constant 5 : index
    %206 = vector.load %arg0[%c0_65, %c5] : memref<4x8xf32, #tpu.memory_space<vmem>>, vector<4x1xf32>
    %207 = vector.broadcast %206 : vector<4x1xf32> to vector<4x512xf32>
    %208 = vector.broadcast %3 : vector<1x512xf32> to vector<4x512xf32>
    %209 = arith.mulf %207, %208 : vector<4x512xf32>
    %210 = vector.broadcast %4 : vector<1x512xf32> to vector<4x512xf32>
    %211 = arith.addf %209, %210 : vector<4x512xf32>
    %cst_66 = arith.constant dense<0.000000e+00> : vector<4x512xf32>
    %212 = tpu.matmul %205, %0, %cst_66 {dimension_numbers = #tpu.dot_dimension_numbers<[1], [0], [0], [1], [0, 0, 1, 1], [], []>} : vector<4x128xf32>, vector<128x512xf32>, vector<4x512xf32> -> vector<4x512xf32>
    %213 = arith.addf %211, %212 : vector<4x512xf32>
    %214 = vector.extract_strided_slice %213 {offsets = [0, 0], sizes = [4, 128], strides = [1, 1]} : vector<4x512xf32> to vector<4x128xf32>
    %cst_67 = arith.constant 5.000000e-01 : f32
    %215 = vector.broadcast %cst_67 : f32 to vector<4x128xf32>
    %216 = arith.mulf %215, %214 : vector<4x128xf32>
    %217 = math.tanh %216 : vector<4x128xf32>
    %cst_68 = arith.constant 5.000000e-01 : f32
    %218 = vector.broadcast %cst_68 : f32 to vector<4x128xf32>
    %219 = arith.mulf %218, %217 : vector<4x128xf32>
    %cst_69 = arith.constant 5.000000e-01 : f32
    %220 = vector.broadcast %cst_69 : f32 to vector<4x128xf32>
    %221 = arith.addf %219, %220 : vector<4x128xf32>
    %222 = vector.extract_strided_slice %213 {offsets = [0, 128], sizes = [4, 128], strides = [1, 1]} : vector<4x512xf32> to vector<4x128xf32>
    %cst_70 = arith.constant 5.000000e-01 : f32
    %223 = vector.broadcast %cst_70 : f32 to vector<4x128xf32>
    %224 = arith.mulf %223, %222 : vector<4x128xf32>
    %225 = math.tanh %224 : vector<4x128xf32>
    %cst_71 = arith.constant 5.000000e-01 : f32
    %226 = vector.broadcast %cst_71 : f32 to vector<4x128xf32>
    %227 = arith.mulf %226, %225 : vector<4x128xf32>
    %cst_72 = arith.constant 5.000000e-01 : f32
    %228 = vector.broadcast %cst_72 : f32 to vector<4x128xf32>
    %229 = arith.addf %227, %228 : vector<4x128xf32>
    %230 = vector.extract_strided_slice %213 {offsets = [0, 256], sizes = [4, 128], strides = [1, 1]} : vector<4x512xf32> to vector<4x128xf32>
    %231 = math.tanh %230 : vector<4x128xf32>
    %232 = vector.extract_strided_slice %213 {offsets = [0, 384], sizes = [4, 128], strides = [1, 1]} : vector<4x512xf32> to vector<4x128xf32>
    %cst_73 = arith.constant 5.000000e-01 : f32
    %233 = vector.broadcast %cst_73 : f32 to vector<4x128xf32>
    %234 = arith.mulf %233, %232 : vector<4x128xf32>
    %235 = math.tanh %234 : vector<4x128xf32>
    %cst_74 = arith.constant 5.000000e-01 : f32
    %236 = vector.broadcast %cst_74 : f32 to vector<4x128xf32>
    %237 = arith.mulf %236, %235 : vector<4x128xf32>
    %cst_75 = arith.constant 5.000000e-01 : f32
    %238 = vector.broadcast %cst_75 : f32 to vector<4x128xf32>
    %239 = arith.addf %237, %238 : vector<4x128xf32>
    %240 = arith.mulf %229, %203 : vector<4x128xf32>
    %241 = arith.mulf %221, %231 : vector<4x128xf32>
    %242 = arith.addf %240, %241 : vector<4x128xf32>
    %243 = math.tanh %242 : vector<4x128xf32>
    %244 = arith.mulf %239, %243 : vector<4x128xf32>
    %c0_76 = arith.constant 0 : index
    %c6 = arith.constant 6 : index
    %245 = vector.load %arg0[%c0_76, %c6] : memref<4x8xf32, #tpu.memory_space<vmem>>, vector<4x1xf32>
    %246 = vector.broadcast %245 : vector<4x1xf32> to vector<4x512xf32>
    %247 = vector.broadcast %3 : vector<1x512xf32> to vector<4x512xf32>
    %248 = arith.mulf %246, %247 : vector<4x512xf32>
    %249 = vector.broadcast %4 : vector<1x512xf32> to vector<4x512xf32>
    %250 = arith.addf %248, %249 : vector<4x512xf32>
    %cst_77 = arith.constant dense<0.000000e+00> : vector<4x512xf32>
    %251 = tpu.matmul %244, %0, %cst_77 {dimension_numbers = #tpu.dot_dimension_numbers<[1], [0], [0], [1], [0, 0, 1, 1], [], []>} : vector<4x128xf32>, vector<128x512xf32>, vector<4x512xf32> -> vector<4x512xf32>
    %252 = arith.addf %250, %251 : vector<4x512xf32>
    %253 = vector.extract_strided_slice %252 {offsets = [0, 0], sizes = [4, 128], strides = [1, 1]} : vector<4x512xf32> to vector<4x128xf32>
    %cst_78 = arith.constant 5.000000e-01 : f32
    %254 = vector.broadcast %cst_78 : f32 to vector<4x128xf32>
    %255 = arith.mulf %254, %253 : vector<4x128xf32>
    %256 = math.tanh %255 : vector<4x128xf32>
    %cst_79 = arith.constant 5.000000e-01 : f32
    %257 = vector.broadcast %cst_79 : f32 to vector<4x128xf32>
    %258 = arith.mulf %257, %256 : vector<4x128xf32>
    %cst_80 = arith.constant 5.000000e-01 : f32
    %259 = vector.broadcast %cst_80 : f32 to vector<4x128xf32>
    %260 = arith.addf %258, %259 : vector<4x128xf32>
    %261 = vector.extract_strided_slice %252 {offsets = [0, 128], sizes = [4, 128], strides = [1, 1]} : vector<4x512xf32> to vector<4x128xf32>
    %cst_81 = arith.constant 5.000000e-01 : f32
    %262 = vector.broadcast %cst_81 : f32 to vector<4x128xf32>
    %263 = arith.mulf %262, %261 : vector<4x128xf32>
    %264 = math.tanh %263 : vector<4x128xf32>
    %cst_82 = arith.constant 5.000000e-01 : f32
    %265 = vector.broadcast %cst_82 : f32 to vector<4x128xf32>
    %266 = arith.mulf %265, %264 : vector<4x128xf32>
    %cst_83 = arith.constant 5.000000e-01 : f32
    %267 = vector.broadcast %cst_83 : f32 to vector<4x128xf32>
    %268 = arith.addf %266, %267 : vector<4x128xf32>
    %269 = vector.extract_strided_slice %252 {offsets = [0, 256], sizes = [4, 128], strides = [1, 1]} : vector<4x512xf32> to vector<4x128xf32>
    %270 = math.tanh %269 : vector<4x128xf32>
    %271 = vector.extract_strided_slice %252 {offsets = [0, 384], sizes = [4, 128], strides = [1, 1]} : vector<4x512xf32> to vector<4x128xf32>
    %cst_84 = arith.constant 5.000000e-01 : f32
    %272 = vector.broadcast %cst_84 : f32 to vector<4x128xf32>
    %273 = arith.mulf %272, %271 : vector<4x128xf32>
    %274 = math.tanh %273 : vector<4x128xf32>
    %cst_85 = arith.constant 5.000000e-01 : f32
    %275 = vector.broadcast %cst_85 : f32 to vector<4x128xf32>
    %276 = arith.mulf %275, %274 : vector<4x128xf32>
    %cst_86 = arith.constant 5.000000e-01 : f32
    %277 = vector.broadcast %cst_86 : f32 to vector<4x128xf32>
    %278 = arith.addf %276, %277 : vector<4x128xf32>
    %279 = arith.mulf %268, %242 : vector<4x128xf32>
    %280 = arith.mulf %260, %270 : vector<4x128xf32>
    %281 = arith.addf %279, %280 : vector<4x128xf32>
    %282 = math.tanh %281 : vector<4x128xf32>
    %283 = arith.mulf %278, %282 : vector<4x128xf32>
    %c0_87 = arith.constant 0 : index
    %c7 = arith.constant 7 : index
    %284 = vector.load %arg0[%c0_87, %c7] : memref<4x8xf32, #tpu.memory_space<vmem>>, vector<4x1xf32>
    %285 = vector.broadcast %284 : vector<4x1xf32> to vector<4x512xf32>
    %286 = vector.broadcast %3 : vector<1x512xf32> to vector<4x512xf32>
    %287 = arith.mulf %285, %286 : vector<4x512xf32>
    %288 = vector.broadcast %4 : vector<1x512xf32> to vector<4x512xf32>
    %289 = arith.addf %287, %288 : vector<4x512xf32>
    %cst_88 = arith.constant dense<0.000000e+00> : vector<4x512xf32>
    %290 = tpu.matmul %283, %0, %cst_88 {dimension_numbers = #tpu.dot_dimension_numbers<[1], [0], [0], [1], [0, 0, 1, 1], [], []>} : vector<4x128xf32>, vector<128x512xf32>, vector<4x512xf32> -> vector<4x512xf32>
    %291 = arith.addf %289, %290 : vector<4x512xf32>
    %292 = vector.extract_strided_slice %291 {offsets = [0, 0], sizes = [4, 128], strides = [1, 1]} : vector<4x512xf32> to vector<4x128xf32>
    %cst_89 = arith.constant 5.000000e-01 : f32
    %293 = vector.broadcast %cst_89 : f32 to vector<4x128xf32>
    %294 = arith.mulf %293, %292 : vector<4x128xf32>
    %295 = math.tanh %294 : vector<4x128xf32>
    %cst_90 = arith.constant 5.000000e-01 : f32
    %296 = vector.broadcast %cst_90 : f32 to vector<4x128xf32>
    %297 = arith.mulf %296, %295 : vector<4x128xf32>
    %cst_91 = arith.constant 5.000000e-01 : f32
    %298 = vector.broadcast %cst_91 : f32 to vector<4x128xf32>
    %299 = arith.addf %297, %298 : vector<4x128xf32>
    %300 = vector.extract_strided_slice %291 {offsets = [0, 128], sizes = [4, 128], strides = [1, 1]} : vector<4x512xf32> to vector<4x128xf32>
    %cst_92 = arith.constant 5.000000e-01 : f32
    %301 = vector.broadcast %cst_92 : f32 to vector<4x128xf32>
    %302 = arith.mulf %301, %300 : vector<4x128xf32>
    %303 = math.tanh %302 : vector<4x128xf32>
    %cst_93 = arith.constant 5.000000e-01 : f32
    %304 = vector.broadcast %cst_93 : f32 to vector<4x128xf32>
    %305 = arith.mulf %304, %303 : vector<4x128xf32>
    %cst_94 = arith.constant 5.000000e-01 : f32
    %306 = vector.broadcast %cst_94 : f32 to vector<4x128xf32>
    %307 = arith.addf %305, %306 : vector<4x128xf32>
    %308 = vector.extract_strided_slice %291 {offsets = [0, 256], sizes = [4, 128], strides = [1, 1]} : vector<4x512xf32> to vector<4x128xf32>
    %309 = math.tanh %308 : vector<4x128xf32>
    %310 = vector.extract_strided_slice %291 {offsets = [0, 384], sizes = [4, 128], strides = [1, 1]} : vector<4x512xf32> to vector<4x128xf32>
    %cst_95 = arith.constant 5.000000e-01 : f32
    %311 = vector.broadcast %cst_95 : f32 to vector<4x128xf32>
    %312 = arith.mulf %311, %310 : vector<4x128xf32>
    %313 = math.tanh %312 : vector<4x128xf32>
    %cst_96 = arith.constant 5.000000e-01 : f32
    %314 = vector.broadcast %cst_96 : f32 to vector<4x128xf32>
    %315 = arith.mulf %314, %313 : vector<4x128xf32>
    %cst_97 = arith.constant 5.000000e-01 : f32
    %316 = vector.broadcast %cst_97 : f32 to vector<4x128xf32>
    %317 = arith.addf %315, %316 : vector<4x128xf32>
    %318 = arith.mulf %307, %281 : vector<4x128xf32>
    %319 = arith.mulf %299, %309 : vector<4x128xf32>
    %320 = arith.addf %318, %319 : vector<4x128xf32>
    %321 = math.tanh %320 : vector<4x128xf32>
    %322 = arith.mulf %317, %321 : vector<4x128xf32>
    %cst_98 = arith.constant dense<0.000000e+00> : vector<4x64xf32>
    %323 = tpu.matmul %322, %1, %cst_98 {dimension_numbers = #tpu.dot_dimension_numbers<[1], [0], [0], [1], [0, 0, 1, 1], [], []>} : vector<4x128xf32>, vector<128x64xf32>, vector<4x64xf32> -> vector<4x64xf32>
    %324 = vector.broadcast %6 : vector<1x64xf32> to vector<4x64xf32>
    %325 = arith.addf %323, %324 : vector<4x64xf32>
    %cst_99 = arith.constant 0.000000e+00 : f32
    %326 = vector.broadcast %cst_99 : f32 to vector<4x64xf32>
    %327 = arith.maximumf %325, %326 : vector<4x64xf32>
    %328 = vector.broadcast %7 : vector<1x64xf32> to vector<4x64xf32>
    %329 = arith.mulf %327, %328 : vector<4x64xf32>
    %cst_100 = arith.constant dense<0.000000e+00> : vector<4xf32>
    %330 = vector.multi_reduction <add>, %329, %cst_100 [1] : vector<4x64xf32> to vector<4xf32>
    %331 = vector.shape_cast %330 : vector<4xf32> to vector<4x1xf32>
    %332 = vector.broadcast %8 : f32 to vector<4x1xf32>
    %333 = arith.addf %331, %332 : vector<4x1xf32>
    %334 = vector.broadcast %333 : vector<4x1xf32> to vector<4x512xf32>
    %335 = vector.broadcast %3 : vector<1x512xf32> to vector<4x512xf32>
    %336 = arith.mulf %334, %335 : vector<4x512xf32>
    %337 = vector.broadcast %4 : vector<1x512xf32> to vector<4x512xf32>
    %338 = arith.addf %336, %337 : vector<4x512xf32>
    %cst_101 = arith.constant dense<0.000000e+00> : vector<4x512xf32>
    %339 = tpu.matmul %322, %0, %cst_101 {dimension_numbers = #tpu.dot_dimension_numbers<[1], [0], [0], [1], [0, 0, 1, 1], [], []>} : vector<4x128xf32>, vector<128x512xf32>, vector<4x512xf32> -> vector<4x512xf32>
    %340 = arith.addf %338, %339 : vector<4x512xf32>
    %341 = vector.extract_strided_slice %340 {offsets = [0, 0], sizes = [4, 128], strides = [1, 1]} : vector<4x512xf32> to vector<4x128xf32>
    %cst_102 = arith.constant 5.000000e-01 : f32
    %342 = vector.broadcast %cst_102 : f32 to vector<4x128xf32>
    %343 = arith.mulf %342, %341 : vector<4x128xf32>
    %344 = math.tanh %343 : vector<4x128xf32>
    %cst_103 = arith.constant 5.000000e-01 : f32
    %345 = vector.broadcast %cst_103 : f32 to vector<4x128xf32>
    %346 = arith.mulf %345, %344 : vector<4x128xf32>
    %cst_104 = arith.constant 5.000000e-01 : f32
    %347 = vector.broadcast %cst_104 : f32 to vector<4x128xf32>
    %348 = arith.addf %346, %347 : vector<4x128xf32>
    %349 = vector.extract_strided_slice %340 {offsets = [0, 128], sizes = [4, 128], strides = [1, 1]} : vector<4x512xf32> to vector<4x128xf32>
    %cst_105 = arith.constant 5.000000e-01 : f32
    %350 = vector.broadcast %cst_105 : f32 to vector<4x128xf32>
    %351 = arith.mulf %350, %349 : vector<4x128xf32>
    %352 = math.tanh %351 : vector<4x128xf32>
    %cst_106 = arith.constant 5.000000e-01 : f32
    %353 = vector.broadcast %cst_106 : f32 to vector<4x128xf32>
    %354 = arith.mulf %353, %352 : vector<4x128xf32>
    %cst_107 = arith.constant 5.000000e-01 : f32
    %355 = vector.broadcast %cst_107 : f32 to vector<4x128xf32>
    %356 = arith.addf %354, %355 : vector<4x128xf32>
    %357 = vector.extract_strided_slice %340 {offsets = [0, 256], sizes = [4, 128], strides = [1, 1]} : vector<4x512xf32> to vector<4x128xf32>
    %358 = math.tanh %357 : vector<4x128xf32>
    %359 = vector.extract_strided_slice %340 {offsets = [0, 384], sizes = [4, 128], strides = [1, 1]} : vector<4x512xf32> to vector<4x128xf32>
    %cst_108 = arith.constant 5.000000e-01 : f32
    %360 = vector.broadcast %cst_108 : f32 to vector<4x128xf32>
    %361 = arith.mulf %360, %359 : vector<4x128xf32>
    %362 = math.tanh %361 : vector<4x128xf32>
    %cst_109 = arith.constant 5.000000e-01 : f32
    %363 = vector.broadcast %cst_109 : f32 to vector<4x128xf32>
    %364 = arith.mulf %363, %362 : vector<4x128xf32>
    %cst_110 = arith.constant 5.000000e-01 : f32
    %365 = vector.broadcast %cst_110 : f32 to vector<4x128xf32>
    %366 = arith.addf %364, %365 : vector<4x128xf32>
    %367 = arith.mulf %356, %320 : vector<4x128xf32>
    %368 = arith.mulf %348, %358 : vector<4x128xf32>
    %369 = arith.addf %367, %368 : vector<4x128xf32>
    %370 = math.tanh %369 : vector<4x128xf32>
    %371 = arith.mulf %366, %370 : vector<4x128xf32>
    %cst_111 = arith.constant dense<0.000000e+00> : vector<4x64xf32>
    %372 = tpu.matmul %371, %1, %cst_111 {dimension_numbers = #tpu.dot_dimension_numbers<[1], [0], [0], [1], [0, 0, 1, 1], [], []>} : vector<4x128xf32>, vector<128x64xf32>, vector<4x64xf32> -> vector<4x64xf32>
    %373 = vector.broadcast %6 : vector<1x64xf32> to vector<4x64xf32>
    %374 = arith.addf %372, %373 : vector<4x64xf32>
    %cst_112 = arith.constant 0.000000e+00 : f32
    %375 = vector.broadcast %cst_112 : f32 to vector<4x64xf32>
    %376 = arith.maximumf %374, %375 : vector<4x64xf32>
    %377 = vector.broadcast %7 : vector<1x64xf32> to vector<4x64xf32>
    %378 = arith.mulf %376, %377 : vector<4x64xf32>
    %cst_113 = arith.constant dense<0.000000e+00> : vector<4xf32>
    %379 = vector.multi_reduction <add>, %378, %cst_113 [1] : vector<4x64xf32> to vector<4xf32>
    %380 = vector.shape_cast %379 : vector<4xf32> to vector<4x1xf32>
    %381 = vector.broadcast %8 : f32 to vector<4x1xf32>
    %382 = arith.addf %380, %381 : vector<4x1xf32>
    %383 = vector.broadcast %382 : vector<4x1xf32> to vector<4x512xf32>
    %384 = vector.broadcast %3 : vector<1x512xf32> to vector<4x512xf32>
    %385 = arith.mulf %383, %384 : vector<4x512xf32>
    %386 = vector.broadcast %4 : vector<1x512xf32> to vector<4x512xf32>
    %387 = arith.addf %385, %386 : vector<4x512xf32>
    %cst_114 = arith.constant dense<0.000000e+00> : vector<4x512xf32>
    %388 = tpu.matmul %371, %0, %cst_114 {dimension_numbers = #tpu.dot_dimension_numbers<[1], [0], [0], [1], [0, 0, 1, 1], [], []>} : vector<4x128xf32>, vector<128x512xf32>, vector<4x512xf32> -> vector<4x512xf32>
    %389 = arith.addf %387, %388 : vector<4x512xf32>
    %390 = vector.extract_strided_slice %389 {offsets = [0, 0], sizes = [4, 128], strides = [1, 1]} : vector<4x512xf32> to vector<4x128xf32>
    %cst_115 = arith.constant 5.000000e-01 : f32
    %391 = vector.broadcast %cst_115 : f32 to vector<4x128xf32>
    %392 = arith.mulf %391, %390 : vector<4x128xf32>
    %393 = math.tanh %392 : vector<4x128xf32>
    %cst_116 = arith.constant 5.000000e-01 : f32
    %394 = vector.broadcast %cst_116 : f32 to vector<4x128xf32>
    %395 = arith.mulf %394, %393 : vector<4x128xf32>
    %cst_117 = arith.constant 5.000000e-01 : f32
    %396 = vector.broadcast %cst_117 : f32 to vector<4x128xf32>
    %397 = arith.addf %395, %396 : vector<4x128xf32>
    %398 = vector.extract_strided_slice %389 {offsets = [0, 128], sizes = [4, 128], strides = [1, 1]} : vector<4x512xf32> to vector<4x128xf32>
    %cst_118 = arith.constant 5.000000e-01 : f32
    %399 = vector.broadcast %cst_118 : f32 to vector<4x128xf32>
    %400 = arith.mulf %399, %398 : vector<4x128xf32>
    %401 = math.tanh %400 : vector<4x128xf32>
    %cst_119 = arith.constant 5.000000e-01 : f32
    %402 = vector.broadcast %cst_119 : f32 to vector<4x128xf32>
    %403 = arith.mulf %402, %401 : vector<4x128xf32>
    %cst_120 = arith.constant 5.000000e-01 : f32
    %404 = vector.broadcast %cst_120 : f32 to vector<4x128xf32>
    %405 = arith.addf %403, %404 : vector<4x128xf32>
    %406 = vector.extract_strided_slice %389 {offsets = [0, 256], sizes = [4, 128], strides = [1, 1]} : vector<4x512xf32> to vector<4x128xf32>
    %407 = math.tanh %406 : vector<4x128xf32>
    %408 = vector.extract_strided_slice %389 {offsets = [0, 384], sizes = [4, 128], strides = [1, 1]} : vector<4x512xf32> to vector<4x128xf32>
    %cst_121 = arith.constant 5.000000e-01 : f32
    %409 = vector.broadcast %cst_121 : f32 to vector<4x128xf32>
    %410 = arith.mulf %409, %408 : vector<4x128xf32>
    %411 = math.tanh %410 : vector<4x128xf32>
    %cst_122 = arith.constant 5.000000e-01 : f32
    %412 = vector.broadcast %cst_122 : f32 to vector<4x128xf32>
    %413 = arith.mulf %412, %411 : vector<4x128xf32>
    %cst_123 = arith.constant 5.000000e-01 : f32
    %414 = vector.broadcast %cst_123 : f32 to vector<4x128xf32>
    %415 = arith.addf %413, %414 : vector<4x128xf32>
    %416 = arith.mulf %405, %369 : vector<4x128xf32>
    %417 = arith.mulf %397, %407 : vector<4x128xf32>
    %418 = arith.addf %416, %417 : vector<4x128xf32>
    %419 = math.tanh %418 : vector<4x128xf32>
    %420 = arith.mulf %415, %419 : vector<4x128xf32>
    %cst_124 = arith.constant dense<0.000000e+00> : vector<4x64xf32>
    %421 = tpu.matmul %420, %1, %cst_124 {dimension_numbers = #tpu.dot_dimension_numbers<[1], [0], [0], [1], [0, 0, 1, 1], [], []>} : vector<4x128xf32>, vector<128x64xf32>, vector<4x64xf32> -> vector<4x64xf32>
    %422 = vector.broadcast %6 : vector<1x64xf32> to vector<4x64xf32>
    %423 = arith.addf %421, %422 : vector<4x64xf32>
    %cst_125 = arith.constant 0.000000e+00 : f32
    %424 = vector.broadcast %cst_125 : f32 to vector<4x64xf32>
    %425 = arith.maximumf %423, %424 : vector<4x64xf32>
    %426 = vector.broadcast %7 : vector<1x64xf32> to vector<4x64xf32>
    %427 = arith.mulf %425, %426 : vector<4x64xf32>
    %cst_126 = arith.constant dense<0.000000e+00> : vector<4xf32>
    %428 = vector.multi_reduction <add>, %427, %cst_126 [1] : vector<4x64xf32> to vector<4xf32>
    %429 = vector.shape_cast %428 : vector<4xf32> to vector<4x1xf32>
    %430 = vector.broadcast %8 : f32 to vector<4x1xf32>
    %431 = arith.addf %429, %430 : vector<4x1xf32>
    %432 = vector.broadcast %431 : vector<4x1xf32> to vector<4x512xf32>
    %433 = vector.broadcast %3 : vector<1x512xf32> to vector<4x512xf32>
    %434 = arith.mulf %432, %433 : vector<4x512xf32>
    %435 = vector.broadcast %4 : vector<1x512xf32> to vector<4x512xf32>
    %436 = arith.addf %434, %435 : vector<4x512xf32>
    %cst_127 = arith.constant dense<0.000000e+00> : vector<4x512xf32>
    %437 = tpu.matmul %420, %0, %cst_127 {dimension_numbers = #tpu.dot_dimension_numbers<[1], [0], [0], [1], [0, 0, 1, 1], [], []>} : vector<4x128xf32>, vector<128x512xf32>, vector<4x512xf32> -> vector<4x512xf32>
    %438 = arith.addf %436, %437 : vector<4x512xf32>
    %439 = vector.extract_strided_slice %438 {offsets = [0, 0], sizes = [4, 128], strides = [1, 1]} : vector<4x512xf32> to vector<4x128xf32>
    %cst_128 = arith.constant 5.000000e-01 : f32
    %440 = vector.broadcast %cst_128 : f32 to vector<4x128xf32>
    %441 = arith.mulf %440, %439 : vector<4x128xf32>
    %442 = math.tanh %441 : vector<4x128xf32>
    %cst_129 = arith.constant 5.000000e-01 : f32
    %443 = vector.broadcast %cst_129 : f32 to vector<4x128xf32>
    %444 = arith.mulf %443, %442 : vector<4x128xf32>
    %cst_130 = arith.constant 5.000000e-01 : f32
    %445 = vector.broadcast %cst_130 : f32 to vector<4x128xf32>
    %446 = arith.addf %444, %445 : vector<4x128xf32>
    %447 = vector.extract_strided_slice %438 {offsets = [0, 128], sizes = [4, 128], strides = [1, 1]} : vector<4x512xf32> to vector<4x128xf32>
    %cst_131 = arith.constant 5.000000e-01 : f32
    %448 = vector.broadcast %cst_131 : f32 to vector<4x128xf32>
    %449 = arith.mulf %448, %447 : vector<4x128xf32>
    %450 = math.tanh %449 : vector<4x128xf32>
    %cst_132 = arith.constant 5.000000e-01 : f32
    %451 = vector.broadcast %cst_132 : f32 to vector<4x128xf32>
    %452 = arith.mulf %451, %450 : vector<4x128xf32>
    %cst_133 = arith.constant 5.000000e-01 : f32
    %453 = vector.broadcast %cst_133 : f32 to vector<4x128xf32>
    %454 = arith.addf %452, %453 : vector<4x128xf32>
    %455 = vector.extract_strided_slice %438 {offsets = [0, 256], sizes = [4, 128], strides = [1, 1]} : vector<4x512xf32> to vector<4x128xf32>
    %456 = math.tanh %455 : vector<4x128xf32>
    %457 = vector.extract_strided_slice %438 {offsets = [0, 384], sizes = [4, 128], strides = [1, 1]} : vector<4x512xf32> to vector<4x128xf32>
    %cst_134 = arith.constant 5.000000e-01 : f32
    %458 = vector.broadcast %cst_134 : f32 to vector<4x128xf32>
    %459 = arith.mulf %458, %457 : vector<4x128xf32>
    %460 = math.tanh %459 : vector<4x128xf32>
    %cst_135 = arith.constant 5.000000e-01 : f32
    %461 = vector.broadcast %cst_135 : f32 to vector<4x128xf32>
    %462 = arith.mulf %461, %460 : vector<4x128xf32>
    %cst_136 = arith.constant 5.000000e-01 : f32
    %463 = vector.broadcast %cst_136 : f32 to vector<4x128xf32>
    %464 = arith.addf %462, %463 : vector<4x128xf32>
    %465 = arith.mulf %454, %418 : vector<4x128xf32>
    %466 = arith.mulf %446, %456 : vector<4x128xf32>
    %467 = arith.addf %465, %466 : vector<4x128xf32>
    %468 = math.tanh %467 : vector<4x128xf32>
    %469 = arith.mulf %464, %468 : vector<4x128xf32>
    %cst_137 = arith.constant dense<0.000000e+00> : vector<4x64xf32>
    %470 = tpu.matmul %469, %1, %cst_137 {dimension_numbers = #tpu.dot_dimension_numbers<[1], [0], [0], [1], [0, 0, 1, 1], [], []>} : vector<4x128xf32>, vector<128x64xf32>, vector<4x64xf32> -> vector<4x64xf32>
    %471 = vector.broadcast %6 : vector<1x64xf32> to vector<4x64xf32>
    %472 = arith.addf %470, %471 : vector<4x64xf32>
    %cst_138 = arith.constant 0.000000e+00 : f32
    %473 = vector.broadcast %cst_138 : f32 to vector<4x64xf32>
    %474 = arith.maximumf %472, %473 : vector<4x64xf32>
    %475 = vector.broadcast %7 : vector<1x64xf32> to vector<4x64xf32>
    %476 = arith.mulf %474, %475 : vector<4x64xf32>
    %cst_139 = arith.constant dense<0.000000e+00> : vector<4xf32>
    %477 = vector.multi_reduction <add>, %476, %cst_139 [1] : vector<4x64xf32> to vector<4xf32>
    %478 = vector.shape_cast %477 : vector<4xf32> to vector<4x1xf32>
    %479 = vector.broadcast %8 : f32 to vector<4x1xf32>
    %480 = arith.addf %478, %479 : vector<4x1xf32>
    %481 = vector.broadcast %480 : vector<4x1xf32> to vector<4x512xf32>
    %482 = vector.broadcast %3 : vector<1x512xf32> to vector<4x512xf32>
    %483 = arith.mulf %481, %482 : vector<4x512xf32>
    %484 = vector.broadcast %4 : vector<1x512xf32> to vector<4x512xf32>
    %485 = arith.addf %483, %484 : vector<4x512xf32>
    %cst_140 = arith.constant dense<0.000000e+00> : vector<4x512xf32>
    %486 = tpu.matmul %469, %0, %cst_140 {dimension_numbers = #tpu.dot_dimension_numbers<[1], [0], [0], [1], [0, 0, 1, 1], [], []>} : vector<4x128xf32>, vector<128x512xf32>, vector<4x512xf32> -> vector<4x512xf32>
    %487 = arith.addf %485, %486 : vector<4x512xf32>
    %488 = vector.extract_strided_slice %487 {offsets = [0, 0], sizes = [4, 128], strides = [1, 1]} : vector<4x512xf32> to vector<4x128xf32>
    %cst_141 = arith.constant 5.000000e-01 : f32
    %489 = vector.broadcast %cst_141 : f32 to vector<4x128xf32>
    %490 = arith.mulf %489, %488 : vector<4x128xf32>
    %491 = math.tanh %490 : vector<4x128xf32>
    %cst_142 = arith.constant 5.000000e-01 : f32
    %492 = vector.broadcast %cst_142 : f32 to vector<4x128xf32>
    %493 = arith.mulf %492, %491 : vector<4x128xf32>
    %cst_143 = arith.constant 5.000000e-01 : f32
    %494 = vector.broadcast %cst_143 : f32 to vector<4x128xf32>
    %495 = arith.addf %493, %494 : vector<4x128xf32>
    %496 = vector.extract_strided_slice %487 {offsets = [0, 128], sizes = [4, 128], strides = [1, 1]} : vector<4x512xf32> to vector<4x128xf32>
    %cst_144 = arith.constant 5.000000e-01 : f32
    %497 = vector.broadcast %cst_144 : f32 to vector<4x128xf32>
    %498 = arith.mulf %497, %496 : vector<4x128xf32>
    %499 = math.tanh %498 : vector<4x128xf32>
    %cst_145 = arith.constant 5.000000e-01 : f32
    %500 = vector.broadcast %cst_145 : f32 to vector<4x128xf32>
    %501 = arith.mulf %500, %499 : vector<4x128xf32>
    %cst_146 = arith.constant 5.000000e-01 : f32
    %502 = vector.broadcast %cst_146 : f32 to vector<4x128xf32>
    %503 = arith.addf %501, %502 : vector<4x128xf32>
    %504 = vector.extract_strided_slice %487 {offsets = [0, 256], sizes = [4, 128], strides = [1, 1]} : vector<4x512xf32> to vector<4x128xf32>
    %505 = math.tanh %504 : vector<4x128xf32>
    %506 = vector.extract_strided_slice %487 {offsets = [0, 384], sizes = [4, 128], strides = [1, 1]} : vector<4x512xf32> to vector<4x128xf32>
    %cst_147 = arith.constant 5.000000e-01 : f32
    %507 = vector.broadcast %cst_147 : f32 to vector<4x128xf32>
    %508 = arith.mulf %507, %506 : vector<4x128xf32>
    %509 = math.tanh %508 : vector<4x128xf32>
    %cst_148 = arith.constant 5.000000e-01 : f32
    %510 = vector.broadcast %cst_148 : f32 to vector<4x128xf32>
    %511 = arith.mulf %510, %509 : vector<4x128xf32>
    %cst_149 = arith.constant 5.000000e-01 : f32
    %512 = vector.broadcast %cst_149 : f32 to vector<4x128xf32>
    %513 = arith.addf %511, %512 : vector<4x128xf32>
    %514 = arith.mulf %503, %467 : vector<4x128xf32>
    %515 = arith.mulf %495, %505 : vector<4x128xf32>
    %516 = arith.addf %514, %515 : vector<4x128xf32>
    %517 = math.tanh %516 : vector<4x128xf32>
    %518 = arith.mulf %513, %517 : vector<4x128xf32>
    %cst_150 = arith.constant dense<0.000000e+00> : vector<4x64xf32>
    %519 = tpu.matmul %518, %1, %cst_150 {dimension_numbers = #tpu.dot_dimension_numbers<[1], [0], [0], [1], [0, 0, 1, 1], [], []>} : vector<4x128xf32>, vector<128x64xf32>, vector<4x64xf32> -> vector<4x64xf32>
    %520 = vector.broadcast %6 : vector<1x64xf32> to vector<4x64xf32>
    %521 = arith.addf %519, %520 : vector<4x64xf32>
    %cst_151 = arith.constant 0.000000e+00 : f32
    %522 = vector.broadcast %cst_151 : f32 to vector<4x64xf32>
    %523 = arith.maximumf %521, %522 : vector<4x64xf32>
    %524 = vector.broadcast %7 : vector<1x64xf32> to vector<4x64xf32>
    %525 = arith.mulf %523, %524 : vector<4x64xf32>
    %cst_152 = arith.constant dense<0.000000e+00> : vector<4xf32>
    %526 = vector.multi_reduction <add>, %525, %cst_152 [1] : vector<4x64xf32> to vector<4xf32>
    %527 = vector.shape_cast %526 : vector<4xf32> to vector<4x1xf32>
    %528 = vector.broadcast %8 : f32 to vector<4x1xf32>
    %529 = arith.addf %527, %528 : vector<4x1xf32>
    %530 = vector.broadcast %529 : vector<4x1xf32> to vector<4x512xf32>
    %531 = vector.broadcast %3 : vector<1x512xf32> to vector<4x512xf32>
    %532 = arith.mulf %530, %531 : vector<4x512xf32>
    %533 = vector.broadcast %4 : vector<1x512xf32> to vector<4x512xf32>
    %534 = arith.addf %532, %533 : vector<4x512xf32>
    %cst_153 = arith.constant dense<0.000000e+00> : vector<4x512xf32>
    %535 = tpu.matmul %518, %0, %cst_153 {dimension_numbers = #tpu.dot_dimension_numbers<[1], [0], [0], [1], [0, 0, 1, 1], [], []>} : vector<4x128xf32>, vector<128x512xf32>, vector<4x512xf32> -> vector<4x512xf32>
    %536 = arith.addf %534, %535 : vector<4x512xf32>
    %537 = vector.extract_strided_slice %536 {offsets = [0, 0], sizes = [4, 128], strides = [1, 1]} : vector<4x512xf32> to vector<4x128xf32>
    %cst_154 = arith.constant 5.000000e-01 : f32
    %538 = vector.broadcast %cst_154 : f32 to vector<4x128xf32>
    %539 = arith.mulf %538, %537 : vector<4x128xf32>
    %540 = math.tanh %539 : vector<4x128xf32>
    %cst_155 = arith.constant 5.000000e-01 : f32
    %541 = vector.broadcast %cst_155 : f32 to vector<4x128xf32>
    %542 = arith.mulf %541, %540 : vector<4x128xf32>
    %cst_156 = arith.constant 5.000000e-01 : f32
    %543 = vector.broadcast %cst_156 : f32 to vector<4x128xf32>
    %544 = arith.addf %542, %543 : vector<4x128xf32>
    %545 = vector.extract_strided_slice %536 {offsets = [0, 128], sizes = [4, 128], strides = [1, 1]} : vector<4x512xf32> to vector<4x128xf32>
    %cst_157 = arith.constant 5.000000e-01 : f32
    %546 = vector.broadcast %cst_157 : f32 to vector<4x128xf32>
    %547 = arith.mulf %546, %545 : vector<4x128xf32>
    %548 = math.tanh %547 : vector<4x128xf32>
    %cst_158 = arith.constant 5.000000e-01 : f32
    %549 = vector.broadcast %cst_158 : f32 to vector<4x128xf32>
    %550 = arith.mulf %549, %548 : vector<4x128xf32>
    %cst_159 = arith.constant 5.000000e-01 : f32
    %551 = vector.broadcast %cst_159 : f32 to vector<4x128xf32>
    %552 = arith.addf %550, %551 : vector<4x128xf32>
    %553 = vector.extract_strided_slice %536 {offsets = [0, 256], sizes = [4, 128], strides = [1, 1]} : vector<4x512xf32> to vector<4x128xf32>
    %554 = math.tanh %553 : vector<4x128xf32>
    %555 = vector.extract_strided_slice %536 {offsets = [0, 384], sizes = [4, 128], strides = [1, 1]} : vector<4x512xf32> to vector<4x128xf32>
    %cst_160 = arith.constant 5.000000e-01 : f32
    %556 = vector.broadcast %cst_160 : f32 to vector<4x128xf32>
    %557 = arith.mulf %556, %555 : vector<4x128xf32>
    %558 = math.tanh %557 : vector<4x128xf32>
    %cst_161 = arith.constant 5.000000e-01 : f32
    %559 = vector.broadcast %cst_161 : f32 to vector<4x128xf32>
    %560 = arith.mulf %559, %558 : vector<4x128xf32>
    %cst_162 = arith.constant 5.000000e-01 : f32
    %561 = vector.broadcast %cst_162 : f32 to vector<4x128xf32>
    %562 = arith.addf %560, %561 : vector<4x128xf32>
    %563 = arith.mulf %552, %516 : vector<4x128xf32>
    %564 = arith.mulf %544, %554 : vector<4x128xf32>
    %565 = arith.addf %563, %564 : vector<4x128xf32>
    %566 = math.tanh %565 : vector<4x128xf32>
    %567 = arith.mulf %562, %566 : vector<4x128xf32>
    %cst_163 = arith.constant dense<0.000000e+00> : vector<4x64xf32>
    %568 = tpu.matmul %567, %1, %cst_163 {dimension_numbers = #tpu.dot_dimension_numbers<[1], [0], [0], [1], [0, 0, 1, 1], [], []>} : vector<4x128xf32>, vector<128x64xf32>, vector<4x64xf32> -> vector<4x64xf32>
    %569 = vector.broadcast %6 : vector<1x64xf32> to vector<4x64xf32>
    %570 = arith.addf %568, %569 : vector<4x64xf32>
    %cst_164 = arith.constant 0.000000e+00 : f32
    %571 = vector.broadcast %cst_164 : f32 to vector<4x64xf32>
    %572 = arith.maximumf %570, %571 : vector<4x64xf32>
    %573 = vector.broadcast %7 : vector<1x64xf32> to vector<4x64xf32>
    %574 = arith.mulf %572, %573 : vector<4x64xf32>
    %cst_165 = arith.constant dense<0.000000e+00> : vector<4xf32>
    %575 = vector.multi_reduction <add>, %574, %cst_165 [1] : vector<4x64xf32> to vector<4xf32>
    %576 = vector.shape_cast %575 : vector<4xf32> to vector<4x1xf32>
    %577 = vector.broadcast %8 : f32 to vector<4x1xf32>
    %578 = arith.addf %576, %577 : vector<4x1xf32>
    %579 = vector.shape_cast %333 : vector<4x1xf32> to vector<1x4x1xf32>
    %580 = vector.shape_cast %382 : vector<4x1xf32> to vector<1x4x1xf32>
    %581 = vector.shape_cast %431 : vector<4x1xf32> to vector<1x4x1xf32>
    %582 = vector.shape_cast %480 : vector<4x1xf32> to vector<1x4x1xf32>
    %583 = vector.shape_cast %529 : vector<4x1xf32> to vector<1x4x1xf32>
    %584 = vector.shape_cast %578 : vector<4x1xf32> to vector<1x4x1xf32>
    %585 = tpu.concatenate %579, %580, %581, %582, %583, %584 in 0 : vector<1x4x1xf32>, vector<1x4x1xf32>, vector<1x4x1xf32>, vector<1x4x1xf32>, vector<1x4x1xf32>, vector<1x4x1xf32> -> vector<6x4x1xf32>
    %586 = vector.shape_cast %585 : vector<6x4x1xf32> to vector<6x4xf32>
    %c0_166 = arith.constant 0 : index
    %c0_167 = arith.constant 0 : index
    %587 = vector.load %arg6[%c0_166, %c0_167] : memref<6x4xf32, #tpu.memory_space<vmem>>, vector<6x4xf32>
    tpu.vector_store %arg6[%c0_166, %c0_167], %586 {strides = array<i32>} : memref<6x4xf32, #tpu.memory_space<vmem>>, vector<6x4xf32>,
    return
  }
}

</mosaic_0001>

<bundles_post_ra>
// kernel: partial_autoregressive_lstm.1
= control target key start
LH: loop header
LB: loop body
LE: loop exit
PB: predicated region body
PF: predicated region fallthrough
CT: control target
= control target key end

     0   :  { %v6139_v3 = vmov 0.0   ;;  %vm3599_vm0 = vmmov 0   ;;  %vm1670_vm1 = vcmask 519168   ;;  %vm2966_vm2 = vcmask 1041409   ;;  %s6132_s1 = inlined_call_operand.vmem [shape: f32[128,512], index: 1, kind: input, shape index: {}]   ;;  %s6133_s0 = inlined_call_operand.vmem [shape: f32[4,8], index: 0, kind: input, shape index: {}]   ;;  %s6134_s3 = inlined_call_operand.vmem [shape: f32[2,512], index: 3, kind: input, shape index: {}]   ;;  %s6135_s2 = inlined_call_operand.vmem [shape: f32[128,64], index: 2, kind: input, shape index: {}]   ;;  %s6136_s4 = inlined_call_operand.vmem [shape: f32[2,64], index: 4, kind: input, shape index: {}]   ;;  %s6137_s5 = inlined_call_operand.<no memory space> [shape: f32[1], index: 5, kind: input, shape index: {}]   ;;  %s6138_s6 = inlined_call_operand.vmem [shape: f32[6,4], index: 6, kind: output, shape index: {}]  }
   0x1   :  { %v3638_v0 = vld [vmem:[%s6132_s1 + $0x1e8] sm:$0xff]  ;;  %v3643_v1 = vld [vmem:[%s6132_s1 + $0x1f8] sm:$0xff]  ;;  %v3648_v2 = vld [vmem:[%s6132_s1 + $0x1e0] sm:$0xff]  ;;  %258 = vmatprep.mubr.f32.mxu0 %v6139_v3  ;;  %329 = vmatprep.mubr.f32.mxu1 %v6139_v3  ;;  %vm2968_vm3 = vcmask 1042434   ;;  %vm2970_vm4 = vcmask 1043459   ;;  %vm2972_vm5 = vcmask 1044484  }
   0x2   :  { %6382 = vst [vmem:[#allocation3_spill] sm:$0xff] %v3638_v0  ;;  %6383 = vst [vmem:[#allocation4_spill] sm:$0xff] %v3643_v1  ;;  %194 = vmatprep.subr.mxu0 %v3638_v0  ;;  %265 = vmatprep.subr.mxu1 %v3643_v1  ;;  %v3657_v4 = vld [vmem:[%s6132_s1 + $0x1f0] sm:$0xff]  ;;  %v3662_v5 = vld [vmem:[%s6132_s1 + $0x1c8] sm:$0xff]  ;;  %vm2974_vm6 = vcmask 1045509   ;;  %vm2977_vm7 = vcmask 29696  }
   0x3   :  { %v3667_v6 = vld [vmem:[%s6132_s1 + $0x1d8] sm:$0xff]  ;;  %195 = vmatpush1.msra.mxu0 %v3648_v2  ;;  %266 = vmatpush1.msra.mxu1 %v3657_v4  ;;  %v3674_v7 = vld [vmem:[%s6132_s1 + $0x1c0] sm:$0xff]  ;;  %v3679_v8 = vld [vmem:[%s6132_s1 + $0x1d0] sm:$0xff] }
   0x4   :  { %v3684_v9 = vld [vmem:[%s6132_s1 + $0x1a8] sm:$0xff]  ;;  %196 = vmatprep.subr.mxu0 %v3662_v5  ;;  %267 = vmatprep.subr.mxu1 %v3667_v6  ;;  %v3691_v10 = vld [vmem:[%s6132_s1 + $0x1b8] sm:$0xff]  ;;  %v3696_v11 = vld [vmem:[%s6132_s1 + $0x1a0] sm:$0xff] }
   0x5   :  { %v3701_v12 = vld [vmem:[%s6132_s1 + $0x1b0] sm:$0xff]  ;;  %197 = vmatpush1.msra.mxu0 %v3674_v7  ;;  %268 = vmatpush1.msra.mxu1 %v3679_v8  ;;  %v3708_v13 = vld [vmem:[%s6132_s1 + $0x188] sm:$0xff]  ;;  %v3713_v14 = vld [vmem:[%s6132_s1 + $0x198] sm:$0xff] }
   0x6   :  { %198 = vmatprep.subr.mxu0 %v3684_v9  ;;  %269 = vmatprep.subr.mxu1 %v3691_v10  ;;  %v3720_v15 = vld [vmem:[%s6132_s1 + $0x180] sm:$0xff]  ;;  %v3725_v16 = vld [vmem:[%s6132_s1 + $0x190] sm:$0xff]  ;;  %v3732_v17 = vld [vmem:[%s6132_s1 + $0x168] sm:$0xff] }
   0x7   :  { %199 = vmatpush1.msra.mxu0 %v3696_v11  ;;  %270 = vmatpush1.msra.mxu1 %v3701_v12  ;;  %v3737_v18 = vld [vmem:[%s6132_s1 + $0x178] sm:$0xff]  ;;  %v3744_v19 = vld [vmem:[%s6132_s1 + $0x160] sm:$0xff]  ;;  %v3749_v20 = vld [vmem:[%s6132_s1 + $0x170] sm:$0xff] }
   0x8   :  { %200 = vmatprep.subr.mxu0 %v3708_v13  ;;  %271 = vmatprep.subr.mxu1 %v3713_v14  ;;  %v3756_v21 = vld [vmem:[%s6132_s1 + $0x148] sm:$0xff]  ;;  %v3761_v22 = vld [vmem:[%s6132_s1 + $0x158] sm:$0xff]  ;;  %v3768_v23 = vld [vmem:[%s6132_s1 + $0x140] sm:$0xff] }
   0x9   :  { %201 = vmatpush1.msra.mxu0 %v3720_v15  ;;  %272 = vmatpush1.msra.mxu1 %v3725_v16  ;;  %v3773_v24 = vld [vmem:[%s6132_s1 + $0x150] sm:$0xff]  ;;  %v3780_v25 = vld [vmem:[%s6132_s1 + $0x128] sm:$0xff]  ;;  %v3785_v26 = vld [vmem:[%s6132_s1 + $0x138] sm:$0xff] }
   0xa   :  { %202 = vmatprep.subr.mxu0 %v3732_v17  ;;  %273 = vmatprep.subr.mxu1 %v3737_v18  ;;  %v3792_v27 = vld [vmem:[%s6132_s1 + $0x120] sm:$0xff]  ;;  %v3797_v28 = vld [vmem:[%s6132_s1 + $0x130] sm:$0xff]  ;;  %v3804_v29 = vld [vmem:[%s6132_s1 + $0x108] sm:$0xff] }
   0xb   :  { %203 = vmatpush1.msra.mxu0 %v3744_v19  ;;  %274 = vmatpush1.msra.mxu1 %v3749_v20  ;;  %v3809_v30 = vld [vmem:[%s6132_s1 + $0x118] sm:$0xff]  ;;  %v3816_v31 = vld [vmem:[%s6132_s1 + $0x100] sm:$0xff]  ;;  %v3821_v32 = vld [vmem:[%s6132_s1 + $0x110] sm:$0xff] }
   0xc   :  { %204 = vmatprep.subr.mxu0 %v3756_v21  ;;  %275 = vmatprep.subr.mxu1 %v3761_v22  ;;  %v3828_v33 = vld [vmem:[%s6132_s1 + $0xe8] sm:$0xff]  ;;  %v3833_v34 = vld [vmem:[%s6132_s1 + $0xf8] sm:$0xff]  ;;  %v3840_v35 = vld [vmem:[%s6132_s1 + $0xe0] sm:$0xff] }
   0xd   :  { %205 = vmatpush1.msra.mxu0 %v3768_v23  ;;  %276 = vmatpush1.msra.mxu1 %v3773_v24  ;;  %v3845_v36 = vld [vmem:[%s6132_s1 + $0xf0] sm:$0xff]  ;;  %v3852_v37 = vld [vmem:[%s6132_s1 + $0xc8] sm:$0xff]  ;;  %v3857_v38 = vld [vmem:[%s6132_s1 + $0xd8] sm:$0xff] }
   0xe   :  { %206 = vmatprep.subr.mxu0 %v3780_v25  ;;  %277 = vmatprep.subr.mxu1 %v3785_v26  ;;  %v3864_v39 = vld [vmem:[%s6132_s1 + $0xc0] sm:$0xff]  ;;  %v3869_v40 = vld [vmem:[%s6132_s1 + $0xd0] sm:$0xff]  ;;  %v3876_v41 = vld [vmem:[%s6132_s1 + $0xa8] sm:$0xff] }
   0xf   :  { %207 = vmatpush1.msra.mxu0 %v3792_v27  ;;  %278 = vmatpush1.msra.mxu1 %v3797_v28  ;;  %v3881_v42 = vld [vmem:[%s6132_s1 + $0xb8] sm:$0xff]  ;;  %v3888_v43 = vld [vmem:[%s6132_s1 + $0xa0] sm:$0xff]  ;;  %v3893_v44 = vld [vmem:[%s6132_s1 + $0xb0] sm:$0xff] }
  0x10   :  { %208 = vmatprep.subr.mxu0 %v3804_v29  ;;  %279 = vmatprep.subr.mxu1 %v3809_v30  ;;  %6384 = vst [vmem:[#allocation5_spill] sm:$0xff] %v3888_v43  ;;  %6385 = vst [vmem:[#allocation6_spill] sm:$0xff] %v3893_v44  ;;  %v3900_v45 = vld [vmem:[%s6132_s1 + $0x88] sm:$0xff]  ;;  %v3905_v46 = vld [vmem:[%s6132_s1 + $0x98] sm:$0xff] }
  0x11   :  { %209 = vmatpush1.msra.mxu0 %v3816_v31  ;;  %280 = vmatpush1.msra.mxu1 %v3821_v32  ;;  %6386 = vst [vmem:[#allocation7_spill] sm:$0xff] %v3900_v45  ;;  %6387 = vst [vmem:[#allocation8_spill] sm:$0xff] %v3905_v46  ;;  %v3912_v47 = vld [vmem:[%s6132_s1 + $0x80] sm:$0xff]  ;;  %v3917_v48 = vld [vmem:[%s6132_s1 + $0x90] sm:$0xff] }
  0x12   :  { %210 = vmatprep.subr.mxu0 %v3828_v33  ;;  %281 = vmatprep.subr.mxu1 %v3833_v34  ;;  %6388 = vst [vmem:[#allocation9_spill] sm:$0xff] %v3912_v47  ;;  %6389 = vst [vmem:[#allocation10_spill] sm:$0xff] %v3917_v48  ;;  %v3924_v49 = vld [vmem:[%s6132_s1 + $0x68] sm:$0xff]  ;;  %v3929_v50 = vld [vmem:[%s6132_s1 + $0x78] sm:$0xff] }
  0x13   :  { %211 = vmatpush1.msra.mxu0 %v3840_v35  ;;  %282 = vmatpush1.msra.mxu1 %v3845_v36  ;;  %6390 = vst [vmem:[#allocation11_spill] sm:$0xff] %v3924_v49  ;;  %6391 = vst [vmem:[#allocation12_spill] sm:$0xff] %v3929_v50  ;;  %v3936_v51 = vld [vmem:[%s6132_s1 + $0x60] sm:$0xff]  ;;  %v3941_v52 = vld [vmem:[%s6132_s1 + $0x70] sm:$0xff] }
  0x14   :  { %212 = vmatprep.subr.mxu0 %v3852_v37  ;;  %283 = vmatprep.subr.mxu1 %v3857_v38  ;;  %6392 = vst [vmem:[#allocation13_spill] sm:$0xff] %v3936_v51  ;;  %6393 = vst [vmem:[#allocation14_spill] sm:$0xff] %v3941_v52  ;;  %v3948_v53 = vld [vmem:[%s6132_s1 + $0x48] sm:$0xff]  ;;  %v3953_v54 = vld [vmem:[%s6132_s1 + $0x58] sm:$0xff] }
  0x15   :  { %213 = vmatpush1.msra.mxu0 %v3864_v39  ;;  %284 = vmatpush1.msra.mxu1 %v3869_v40  ;;  %6394 = vst [vmem:[#allocation15_spill] sm:$0xff] %v3948_v53  ;;  %6395 = vst [vmem:[#allocation16_spill] sm:$0xff] %v3953_v54  ;;  %v3960_v55 = vld [vmem:[%s6132_s1 + $0x40] sm:$0xff]  ;;  %v3965_v56 = vld [vmem:[%s6132_s1 + $0x50] sm:$0xff] }
  0x16   :  { %214 = vmatprep.subr.mxu0 %v3876_v41  ;;  %285 = vmatprep.subr.mxu1 %v3881_v42  ;;  %6396 = vst [vmem:[#allocation17_spill] sm:$0xff] %v3960_v55  ;;  %6397 = vst [vmem:[#allocation18_spill] sm:$0xff] %v3965_v56  ;;  %v3972_v57 = vld [vmem:[%s6132_s1 + $0x28] sm:$0xff]  ;;  %v3977_v58 = vld [vmem:[%s6132_s1 + $0x38] sm:$0xff] }
  0x17   :  { %215 = vmatpush1.msra.mxu0 %v3888_v43  ;;  %286 = vmatpush1.msra.mxu1 %v3893_v44  ;;  %6398 = vst [vmem:[#allocation19_spill] sm:$0xff] %v3972_v57  ;;  %6399 = vst [vmem:[#allocation20_spill] sm:$0xff] %v3977_v58  ;;  %v3984_v59 = vld [vmem:[%s6132_s1 + $0x20] sm:$0xff]  ;;  %v3989_v60 = vld [vmem:[%s6132_s1 + $0x30] sm:$0xff] }
  0x18   :  { %216 = vmatprep.subr.mxu0 %v3900_v45  ;;  %287 = vmatprep.subr.mxu1 %v3905_v46  ;;  %6400 = vst [vmem:[#allocation21_spill] sm:$0xff] %v3984_v59  ;;  %6401 = vst [vmem:[#allocation22_spill] sm:$0xff] %v3989_v60  ;;  %v3996_v61 = vld [vmem:[%s6132_s1 + $0x8] sm:$0xff]  ;;  %v4001_v62 = vld [vmem:[%s6132_s1 + $0x18] sm:$0xff] }
  0x19   :  { %217 = vmatpush1.msra.mxu0 %v3912_v47  ;;  %288 = vmatpush1.msra.mxu1 %v3917_v48  ;;  %6402 = vst [vmem:[#allocation23_spill] sm:$0xff] %v3996_v61  ;;  %6403 = vst [vmem:[#allocation24_spill] sm:$0xff] %v4001_v62  ;;  %v4008_v63 = vld [vmem:[%s6132_s1] sm:$0xff]  ;;  %v4013_v3 = vld [vmem:[%s6132_s1 + $0x10] sm:$0xff] }
  0x1a   :  { %218 = vmatprep.subr.mxu0 %v3924_v49  ;;  %289 = vmatprep.subr.mxu1 %v3929_v50  ;;  %6404 = vst [vmem:[#allocation25_spill] sm:$0xff] %v4008_v63  ;;  %6405 = vst [vmem:[#allocation26_spill] sm:$0xff] %v4013_v3 }
  0x1b   :  { %219 = vmatpush1.msra.mxu0 %v3936_v51  ;;  %290 = vmatpush1.msra.mxu1 %v3941_v52 }
  0x1c   :  { %220 = vmatprep.subr.mxu0 %v3948_v53  ;;  %291 = vmatprep.subr.mxu1 %v3953_v54 }
  0x1d   :  { %221 = vmatpush1.msra.mxu0 %v3960_v55  ;;  %292 = vmatpush1.msra.mxu1 %v3965_v56 }
  0x1e   :  { %222 = vmatprep.subr.mxu0 %v3972_v57  ;;  %293 = vmatprep.subr.mxu1 %v3977_v58  ;;  %v4024_v58 = vld [vmem:[%s6133_s0] sm:$0xf]  ;;  %v6407_v57 = vmov 0.0  }
  0x1f   :  { %223 = vmatpush1.msra.mxu0 %v3984_v59  ;;  %294 = vmatpush1.msra.mxu1 %v3989_v60  ;;  %6406 = vst [vmem:[#allocation27_spill] sm:$0xff] %v4024_v58  ;;  %v6147_v59 = vmov 0  }
  0x20   :  { %224 = vmatprep.subr.mxu0 %v3996_v61  ;;  %295 = vmatprep.subr.mxu1 %v4001_v62 }
  0x21   :  { %225 = vmatpush1.msra.mxu0 %v4008_v63  ;;  %296 = vmatpush1.msra.mxu1 %v4013_v3 }
  0x22   :  { %259 = vmatmul.mubr.f32.vlgmr.msra.gmra.mxu0 %v6407_v57  ;;  %330 = vmatmul.mubr.f32.vlgmr.msra.gmra.mxu1 %v6407_v57 }
  0x23   :  { %3305 = vset.pattern.permute.xlu0 %v6147_v59  ;;  %370 = vmatprep.subr.mxu0 %v3638_v0  ;;  %v6408_v59 = vld [vmem:[#allocation19_spill] sm:$0xff] }
  0x24   :  { %110 = vperm.xlu0 %3305, %v4024_v58   ;;  %441 = vmatprep.subr.mxu1 %v3643_v1 }
  0x25   :  { %371 = vmatpush1.msra.mxu0 %v3648_v2  ;;  %442 = vmatpush1.msra.mxu1 %v3657_v4 }
  0x26   :  { %372 = vmatprep.subr.mxu0 %v3662_v5  ;;  %443 = vmatprep.subr.mxu1 %v3667_v6 }
  0x27   :  { %373 = vmatpush1.msra.mxu0 %v3674_v7  ;;  %444 = vmatpush1.msra.mxu1 %v3679_v8 }
  0x28   :  { %374 = vmatprep.subr.mxu0 %v3684_v9  ;;  %445 = vmatprep.subr.mxu1 %v3691_v10 }
  0x29   :  { %375 = vmatpush1.msra.mxu0 %v3696_v11  ;;  %446 = vmatpush1.msra.mxu1 %v3701_v12 }
  0x2a   :  { %376 = vmatprep.subr.mxu0 %v3708_v13  ;;  %447 = vmatprep.subr.mxu1 %v3713_v14 }
  0x2b   :  { %377 = vmatpush1.msra.mxu0 %v3720_v15  ;;  %448 = vmatpush1.msra.mxu1 %v3725_v16 }
  0x2c   :  { %378 = vmatprep.subr.mxu0 %v3732_v17  ;;  %449 = vmatprep.subr.mxu1 %v3737_v18 }
  0x2d   :  { %379 = vmatpush1.msra.mxu0 %v3744_v19  ;;  %450 = vmatpush1.msra.mxu1 %v3749_v20 }
  0x2e   :  { %380 = vmatprep.subr.mxu0 %v3756_v21  ;;  %451 = vmatprep.subr.mxu1 %v3761_v22 }
  0x2f   :  { %381 = vmatpush1.msra.mxu0 %v3768_v23  ;;  %452 = vmatpush1.msra.mxu1 %v3773_v24 }
  0x30   :  { %382 = vmatprep.subr.mxu0 %v3780_v25  ;;  %453 = vmatprep.subr.mxu1 %v3785_v26 }
  0x31   :  { %383 = vmatpush1.msra.mxu0 %v3792_v27  ;;  %454 = vmatpush1.msra.mxu1 %v3797_v28 }
  0x32   :  { %384 = vmatprep.subr.mxu0 %v3804_v29  ;;  %455 = vmatprep.subr.mxu1 %v3809_v30 }
  0x33   :  { %385 = vmatpush1.msra.mxu0 %v3816_v31  ;;  %456 = vmatpush1.msra.mxu1 %v3821_v32 }
  0x34   :  { %386 = vmatprep.subr.mxu0 %v3828_v33  ;;  %457 = vmatprep.subr.mxu1 %v3833_v34 }
  0x35   :  { %387 = vmatpush1.msra.mxu0 %v3840_v35  ;;  %458 = vmatpush1.msra.mxu1 %v3845_v36 }
  0x36   :  { %388 = vmatprep.subr.mxu0 %v3852_v37  ;;  %459 = vmatprep.subr.mxu1 %v3857_v38 }
  0x37   :  { %389 = vmatpush1.msra.mxu0 %v3864_v39  ;;  %460 = vmatpush1.msra.mxu1 %v3869_v40 }
  0x38   :  { %390 = vmatprep.subr.mxu0 %v3876_v41  ;;  %461 = vmatprep.subr.mxu1 %v3881_v42 }
  0x39   :  { %391 = vmatpush1.msra.mxu0 %v3888_v43  ;;  %462 = vmatpush1.msra.mxu1 %v3893_v44 }
  0x3a   :  { %392 = vmatprep.subr.mxu0 %v3900_v45  ;;  %463 = vmatprep.subr.mxu1 %v3905_v46 }
  0x3b   :  { %393 = vmatpush1.msra.mxu0 %v3912_v47  ;;  %464 = vmatpush1.msra.mxu1 %v3917_v48  ;;  %v6409_v47 = vld [vmem:[#allocation20_spill] sm:$0xff]  ;;  %v6410_v48 = vld [vmem:[#allocation21_spill] sm:$0xff] }
  0x3c   :  { %394 = vmatprep.subr.mxu0 %v3924_v49  ;;  %465 = vmatprep.subr.mxu1 %v3929_v50 }
  0x3d   :  { %395 = vmatpush1.msra.mxu0 %v3936_v51  ;;  %466 = vmatpush1.msra.mxu1 %v3941_v52 }
  0x3e   :  { %396 = vmatprep.subr.mxu0 %v3948_v53  ;;  %467 = vmatprep.subr.mxu1 %v3953_v54 }
  0x3f   :  { %397 = vmatpush1.msra.mxu0 %v3960_v55  ;;  %468 = vmatpush1.msra.mxu1 %v3965_v56 }
  0x40   :  { %398 = vmatprep.subr.mxu0 %v6408_v59  ;;  %469 = vmatprep.subr.mxu1 %v6409_v47  ;;  %v3592_v47 = vmov 1  }
  0x41   :  { %399 = vmatpush1.msra.mxu0 %v6410_v48  ;;  %470 = vmatpush1.msra.mxu1 %v3989_v60  ;;  %v6168_v60 = vlaneseq }
  0x42   :  { %400 = vmatprep.subr.mxu0 %v3996_v61  ;;  %471 = vmatprep.subr.mxu1 %v4001_v62 }
  0x43   :  { %401 = vmatpush1.msra.mxu0 %v4008_v63  ;;  %434 = vmatprep.mubr.f32.mxu0 %v6407_v57  ;;  %v4100_v61 = vshrl.u32 %v6168_v60, 7 }
  0x44   :  { %472 = vmatpush1.msra.mxu1 %v4013_v3  ;;  %505 = vmatprep.mubr.f32.mxu1 %v6407_v57  ;;  %v104_v3 = vld [vmem:[%s6134_s3] sm:$0xff] }
  0x45   :  { %546 = vmatprep.subr.mxu0 %v3638_v0  ;;  %617 = vmatprep.subr.mxu1 %v3643_v1  ;;  %6411 = vst [vmem:[#allocation28_spill] sm:$0xff] %v4100_v61  ;;  %v4103_v63 = vsub.s32 0, %v4100_v61  ;;  %v120_v57 = vsub.s32 2, %v4100_v61  ;;  %v4111_v1 = vsub.s32 1, %v4100_v61  ;;  %v160_v60 = vsub.s32 3, %v4100_v61 }
  0x46   :  { %3306 = vset.pattern.permute.xlu0 %v3592_v47  ;;  %v124_v47 = vsub.s32 4, %v4100_v61  ;;  %v164_v55 = vsub.s32 5, %v4100_v61 }
  0x47   :  { %359 = vperm.xlu0 %3306, %v4024_v58   ;;  %6412 = vst [vmem:[#allocation29_spill] sm:$0xff] %v4103_v63  ;;  %v117_v0 = vrot.slane %v104_v3, %v4103_v63  ;;  %6413 = vst [vmem:[#allocation30_spill] sm:$0xff] %v4111_v1  ;;  %v121_v58 = vrot.slane %v104_v3, %v120_v57  ;;  %v157_v48 = vrot.slane %v104_v3, %v4111_v1 }
  0x48   :  { %v125_v56 = vrot.slane %v104_v3, %v124_v47  ;;  %v161_v53 = vrot.slane %v104_v3, %v160_v60  ;;  %v128_v57 = vsub.s32 6, %v4100_v61  ;;  %v165_v50 = vrot.slane %v104_v3, %v164_v55 }
  0x49   :  { %v4116_v62 = vrot.slane %v117_v0, %v4103_v63  ;;  %v4121_v54 = vrot.slane %v121_v58, %v4103_v63  ;;  %v4125_v51 = vrot.slane %v157_v48, %v4111_v1  ;;  %v168_v60 = vsub.s32 7, %v4100_v61 }
  0x4a   :  { %v4129_v0 = vrot.slane %v125_v56, %v4103_v63  ;;  %v4133_v47 = vrot.slane %v161_v53, %v4111_v1  ;;  %v129_v46 = vrot.slane %v104_v3, %v128_v57  ;;  %v4139_v48 = vrot.slane %v165_v50, %v4111_v1 }
  0x4b   :  { %6414 = vst [vmem:[#allocation31_spill] sm:$0xff] %v4116_v62  ;;  %6415 = vst [vmem:[#allocation32_spill] sm:$0xff] %v4121_v54 }
  0x4c   :  { %6416 = vst [vmem:[#allocation33_spill] sm:$0xff] %v4125_v51  ;;  %6417 = vst [vmem:[#allocation34_spill] sm:$0xff] %v4129_v0  ;;  %v4143_v55 = vrot.slane %v129_v46, %v4103_v63  ;;  %v6437_v63 = vld [vmem:[#allocation23_spill] sm:$0xff] }
  0x4d   :  { %6418 = vst [vmem:[#allocation35_spill] sm:$0xff] %v4133_v47 }
  0x9f   :  { %v111_v59 = vpop.permute.xlu0 %110 }
  0xa0   :  { %v150_v52 = vmul.f32 %v4116_v62, %v111_v59  ;;  %v151_v49 = vmul.f32 %v4121_v54, %v111_v59  ;;  %v152_v62 = vmul.f32 %v4129_v0, %v111_v59  ;;  %v169_v54 = vrot.slane %v104_v3, %v168_v60 }
  0xa1   :  { %v153_v0 = vmul.f32 %v4143_v55, %v111_v59 }
  0xa2   :  { %v190_v58 = vadd.f32 %v4125_v51, %v150_v52  ;;  %v191_v45 = vadd.f32 %v4133_v47, %v151_v49  ;;  %v192_v52 = vadd.f32 %v4139_v48, %v152_v62  ;;  %v4148_v50 = vrot.slane %v169_v54, %v4111_v1 }
  0xe2   :  { %v260_v56 = vpop.f32.mrf.mxu0  ;;  %v331_v51 = vpop.f32.mrf.mxu1 }
  0xe3   :  { %v336_v44 = vadd.f32 %v260_v56, %v190_v58  ;;  %v338_v49 = vadd.f32 %v331_v51, %v192_v52  ;;  %v193_v58 = vadd.f32 %v4148_v50, %v153_v0 }
  0xe4   :  { %v262_v53 = vpop.f32.mrf.mxu0  ;;  %v333_v46 = vpop.f32.mrf.mxu1 }
  0xe5   :  { %v340_v43 = vmul.f32 0.5, %v336_v44  ;;  %v337_v57 = vadd.f32 %v262_v53, %v191_v45  ;;  %v339_v3 = vadd.f32 %v333_v46, %v193_v58  ;;  %v6419_v58 = vld [vmem:[#allocation5_spill] sm:$0xff]  ;;  %v6420_v46 = vld [vmem:[#allocation6_spill] sm:$0xff] }
  0xe7   :  { %3315 = vtanh.f32 %v340_v43  ;;  %v344_v61 = vmul.f32 0.5, %v337_v57  ;;  %v349_v60 = vmul.f32 0.5, %v339_v3  ;;  %v6421_v3 = vld [vmem:[#allocation7_spill] sm:$0xff] }
  0xe9   :  { %3317 = vtanh.f32 %v344_v61 }
  0xea   :  { %3319 = vtanh.f32 %v338_v49 }
  0xeb   :  { %3321 = vtanh.f32 %v349_v60  ;;  %v6422_v60 = vld [vmem:[#allocation8_spill] sm:$0xff] }
  0xf4   :  { %v3316_v44 = vpop.eup %3315 }
  0xf5   :  { %v342_v56 = vmul.f32 0.5, %v3316_v44  ;;  %v6423_v44 = vld [vmem:[#allocation9_spill] sm:$0xff] }
  0xf6   :  { %v3318_v62 = vpop.eup %3317 }
  0xf7   :  { %v343_v45 = vadd.f32 0.5, %v342_v56  ;;  %v346_v43 = vmul.f32 0.5, %v3318_v62  ;;  %v3320_v59 = vpop.eup %3319  ;;  %v6424_v56 = vld [vmem:[#allocation10_spill] sm:$0xff]  ;;  %v6425_v62 = vld [vmem:[#allocation11_spill] sm:$0xff] }
  0xf8   :  { %v3322_v51 = vpop.eup %3321 }
  0xf9   :  { %v347_v53 = vadd.f32 0.5, %v346_v43  ;;  %v354_v54 = vmul.f32 %v3320_v59, %v343_v45  ;;  %v351_v61 = vmul.f32 0.5, %v3322_v51  ;;  %v6426_v45 = vld [vmem:[#allocation12_spill] sm:$0xff]  ;;  %v6427_v43 = vld [vmem:[#allocation13_spill] sm:$0xff]  ;;  %v6429_v59 = vld [vmem:[#allocation15_spill] sm:$0xff] }
  0xfa   :  { %v6432_v51 = vld [vmem:[#allocation18_spill] sm:$0xff] }
  0xfb   :  { %v353_v57 = vmul.f32 0.0, %v347_v53  ;;  %v352_v0 = vadd.f32 0.5, %v351_v61  ;;  %v6428_v53 = vld [vmem:[#allocation14_spill] sm:$0xff]  ;;  %v6433_v61 = vld [vmem:[#allocation19_spill] sm:$0xff] }
  0xfd   :  { %v4151_v1 = vadd.f32 %v354_v54, %v353_v57  ;;  %v6430_v57 = vld [vmem:[#allocation16_spill] sm:$0xff]  ;;  %v6431_v54 = vld [vmem:[#allocation17_spill] sm:$0xff] }
  0xff   :  { %3323 = vtanh.f32 %v4151_v1 }
 0x10c   :  { %v3324_v52 = vpop.eup %3323 }
 0x10d   :  { %v357_v49 = vmul.f32 %v3324_v52, %v352_v0  ;;  %v6434_v0 = vld [vmem:[#allocation20_spill] sm:$0xff]  ;;  %v6435_v52 = vld [vmem:[#allocation21_spill] sm:$0xff] }
 0x10f   :  { %435 = vmatmul.mubr.f32.vlgmr.msra.gmra.mxu0 %v357_v49  ;;  %506 = vmatmul.mubr.f32.vlgmr.msra.gmra.mxu1 %v357_v49  ;;  %v6436_v49 = vld [vmem:[#allocation22_spill] sm:$0xff] }
 0x110   :  { %547 = vmatpush1.msra.mxu0 %v3648_v2  ;;  %618 = vmatpush1.msra.mxu1 %v3657_v4 }
 0x111   :  { %548 = vmatprep.subr.mxu0 %v3662_v5  ;;  %619 = vmatprep.subr.mxu1 %v3667_v6 }
 0x112   :  { %549 = vmatpush1.msra.mxu0 %v3674_v7  ;;  %620 = vmatpush1.msra.mxu1 %v3679_v8 }
 0x113   :  { %550 = vmatprep.subr.mxu0 %v3684_v9  ;;  %621 = vmatprep.subr.mxu1 %v3691_v10 }
 0x114   :  { %551 = vmatpush1.msra.mxu0 %v3696_v11  ;;  %622 = vmatpush1.msra.mxu1 %v3701_v12 }
 0x115   :  { %552 = vmatprep.subr.mxu0 %v3708_v13  ;;  %623 = vmatprep.subr.mxu1 %v3713_v14 }
 0x116   :  { %553 = vmatpush1.msra.mxu0 %v3720_v15  ;;  %624 = vmatpush1.msra.mxu1 %v3725_v16 }
 0x117   :  { %554 = vmatprep.subr.mxu0 %v3732_v17  ;;  %625 = vmatprep.subr.mxu1 %v3737_v18 }
 0x118   :  { %555 = vmatpush1.msra.mxu0 %v3744_v19  ;;  %626 = vmatpush1.msra.mxu1 %v3749_v20 }
 0x119   :  { %556 = vmatprep.subr.mxu0 %v3756_v21  ;;  %627 = vmatprep.subr.mxu1 %v3761_v22 }
 0x11a   :  { %557 = vmatpush1.msra.mxu0 %v3768_v23  ;;  %628 = vmatpush1.msra.mxu1 %v3773_v24 }
 0x11b   :  { %558 = vmatprep.subr.mxu0 %v3780_v25  ;;  %629 = vmatprep.subr.mxu1 %v3785_v26 }
 0x11c   :  { %559 = vmatpush1.msra.mxu0 %v3792_v27  ;;  %630 = vmatpush1.msra.mxu1 %v3797_v28 }
 0x11d   :  { %560 = vmatprep.subr.mxu0 %v3804_v29  ;;  %631 = vmatprep.subr.mxu1 %v3809_v30 }
 0x11e   :  { %561 = vmatpush1.msra.mxu0 %v3816_v31  ;;  %632 = vmatpush1.msra.mxu1 %v3821_v32 }
 0x11f   :  { %562 = vmatprep.subr.mxu0 %v3828_v33  ;;  %633 = vmatprep.subr.mxu1 %v3833_v34 }
 0x120   :  { %563 = vmatpush1.msra.mxu0 %v3840_v35  ;;  %634 = vmatpush1.msra.mxu1 %v3845_v36 }
 0x121   :  { %564 = vmatprep.subr.mxu0 %v3852_v37  ;;  %635 = vmatprep.subr.mxu1 %v3857_v38 }
 0x122   :  { %565 = vmatpush1.msra.mxu0 %v3864_v39  ;;  %636 = vmatpush1.msra.mxu1 %v3869_v40 }
 0x123   :  { %566 = vmatprep.subr.mxu0 %v3876_v41  ;;  %637 = vmatprep.subr.mxu1 %v3881_v42 }
 0x124   :  { %567 = vmatpush1.msra.mxu0 %v6419_v58  ;;  %638 = vmatpush1.msra.mxu1 %v6420_v46 }
 0x125   :  { %568 = vmatprep.subr.mxu0 %v6421_v3  ;;  %639 = vmatprep.subr.mxu1 %v6422_v60 }
 0x126   :  { %569 = vmatpush1.msra.mxu0 %v6423_v44  ;;  %640 = vmatpush1.msra.mxu1 %v6424_v56  ;;  %v6448_v56 = vld [vmem:[#allocation34_spill] sm:$0xff] }
 0x127   :  { %570 = vmatprep.subr.mxu0 %v6425_v62  ;;  %641 = vmatprep.subr.mxu1 %v6426_v45 }
 0x128   :  { %571 = vmatpush1.msra.mxu0 %v6427_v43  ;;  %642 = vmatpush1.msra.mxu1 %v6428_v53  ;;  %v6438_v43 = vld [vmem:[#allocation24_spill] sm:$0xff]  ;;  %v6439_v53 = vld [vmem:[#allocation25_spill] sm:$0xff] }
 0x129   :  { %572 = vmatprep.subr.mxu0 %v6429_v59  ;;  %643 = vmatprep.subr.mxu1 %v6430_v57  ;;  %v6440_v59 = vmov 0.0   ;;  %v6441_v57 = vld [vmem:[#allocation26_spill] sm:$0xff] }
 0x12a   :  { %573 = vmatpush1.msra.mxu0 %v6431_v54  ;;  %644 = vmatpush1.msra.mxu1 %v6432_v51  ;;  %v6442_v51 = vld [vmem:[#allocation3_spill] sm:$0xff] }
 0x12b   :  { %574 = vmatprep.subr.mxu0 %v6433_v61  ;;  %645 = vmatprep.subr.mxu1 %v6434_v0  ;;  %v6443_v61 = vld [vmem:[#allocation4_spill] sm:$0xff]  ;;  %v3593_v0 = vmov 2  }
 0x12c   :  { %575 = vmatpush1.msra.mxu0 %v6435_v52  ;;  %646 = vmatpush1.msra.mxu1 %v6436_v49  ;;  %v6444_v52 = vld [vmem:[#allocation27_spill] sm:$0xff]  ;;  %v360_v49 = vpop.permute.xlu0 %359 }
 0x12d   :  { %576 = vmatprep.subr.mxu0 %v6437_v63  ;;  %647 = vmatprep.subr.mxu1 %v6438_v43  ;;  %v6445_v63 = vld [vmem:[#allocation31_spill] sm:$0xff]  ;;  %v6446_v43 = vld [vmem:[#allocation32_spill] sm:$0xff]  ;;  %v364_v44 = vmul.f32 %v360_v49, %v6448_v56 }
 0x12e   :  { %577 = vmatpush1.msra.mxu0 %v6439_v53  ;;  %610 = vmatprep.mubr.f32.mxu0 %v6440_v59  ;;  %v362_v54 = vmul.f32 %v360_v49, %v6445_v63  ;;  %v363_v45 = vmul.f32 %v360_v49, %v6446_v43  ;;  %v6447_v53 = vld [vmem:[#allocation33_spill] sm:$0xff]  ;;  %v365_v63 = vmul.f32 %v360_v49, %v4143_v55 }
 0x12f   :  { %648 = vmatpush1.msra.mxu1 %v6441_v57  ;;  %681 = vmatprep.mubr.f32.mxu1 %v6440_v59 }
 0x130   :  { %722 = vmatprep.subr.mxu0 %v6442_v51  ;;  %793 = vmatprep.subr.mxu1 %v6443_v61  ;;  %v366_v62 = vadd.f32 %v362_v54, %v6447_v53  ;;  %v367_v57 = vadd.f32 %v363_v45, %v4133_v47  ;;  %v368_v61 = vadd.f32 %v364_v44, %v4139_v48 }
 0x131   :  { %3307 = vset.pattern.permute.xlu1 %v3593_v0  ;;  %v369_v54 = vadd.f32 %v365_v63, %v4148_v50 }
 0x132   :  { %535 = vperm.xlu1 %3307, %v6444_v52  }
 0x1cf   :  { %v436_v59 = vpop.f32.mrf.mxu0  ;;  %v507_v46 = vpop.f32.mrf.mxu1 }
 0x1d0   :  { %v512_v60 = vadd.f32 %v436_v59, %v366_v62  ;;  %v514_v58 = vadd.f32 %v507_v46, %v368_v61  ;;  %v6452_v61 = vld [vmem:[#allocation8_spill] sm:$0xff] }
 0x1d1   :  { %v438_v51 = vpop.f32.mrf.mxu0  ;;  %v509_v53 = vpop.f32.mrf.mxu1 }
 0x1d2   :  { %v516_v3 = vmul.f32 0.5, %v512_v60  ;;  %v513_v0 = vadd.f32 %v438_v51, %v367_v57  ;;  %v515_v56 = vadd.f32 %v509_v53, %v369_v54  ;;  %v6455_v54 = vld [vmem:[#allocation11_spill] sm:$0xff] }
 0x1d4   :  { %3325 = vtanh.f32 %v516_v3  ;;  %v520_v52 = vmul.f32 0.5, %v513_v0  ;;  %v525_v45 = vmul.f32 0.5, %v515_v56  ;;  %v6454_v0 = vld [vmem:[#allocation10_spill] sm:$0xff] }
 0x1d6   :  { %3327 = vtanh.f32 %v520_v52  ;;  %v6453_v52 = vld [vmem:[#allocation9_spill] sm:$0xff] }
 0x1d7   :  { %3329 = vtanh.f32 %v514_v58 }
 0x1d8   :  { %3331 = vtanh.f32 %v525_v45  ;;  %v6456_v45 = vld [vmem:[#allocation12_spill] sm:$0xff] }
 0x1e1   :  { %v3326_v47 = vpop.eup %3325 }
 0x1e2   :  { %v518_v62 = vmul.f32 0.5, %v3326_v47  ;;  %v6450_v47 = vld [vmem:[#allocation6_spill] sm:$0xff] }
 0x1e3   :  { %v3328_v59 = vpop.eup %3327 }
 0x1e4   :  { %v519_v60 = vadd.f32 0.5, %v518_v62  ;;  %v522_v43 = vmul.f32 0.5, %v3328_v59  ;;  %v3330_v57 = vpop.eup %3329  ;;  %v6457_v62 = vld [vmem:[#allocation13_spill] sm:$0xff]  ;;  %v6458_v59 = vld [vmem:[#allocation14_spill] sm:$0xff] }
 0x1e5   :  { %v3332_v63 = vpop.eup %3331 }
 0x1e6   :  { %v523_v44 = vadd.f32 0.5, %v522_v43  ;;  %v530_v51 = vmul.f32 %v3330_v57, %v519_v60  ;;  %v527_v46 = vmul.f32 0.5, %v3332_v63  ;;  %v6451_v43 = vld [vmem:[#allocation7_spill] sm:$0xff]  ;;  %v6461_v57 = vld [vmem:[#allocation17_spill] sm:$0xff]  ;;  %v6464_v63 = vld [vmem:[#allocation20_spill] sm:$0xff] }
 0x1e7   :  { %v6459_v60 = vld [vmem:[#allocation15_spill] sm:$0xff] }
 0x1e8   :  { %v529_v3 = vmul.f32 %v523_v44, %v4151_v1  ;;  %v528_v58 = vadd.f32 0.5, %v527_v46  ;;  %v6449_v1 = vld [vmem:[#allocation5_spill] sm:$0xff]  ;;  %v6460_v44 = vld [vmem:[#allocation16_spill] sm:$0xff] }
 0x1e9   :  { %v6465_v46 = vld [vmem:[#allocation21_spill] sm:$0xff] }
 0x1ea   :  { %v4230_v49 = vadd.f32 %v530_v51, %v529_v3  ;;  %v6462_v3 = vld [vmem:[#allocation18_spill] sm:$0xff]  ;;  %v6463_v51 = vld [vmem:[#allocation19_spill] sm:$0xff] }
 0x1ec   :  { %3333 = vtanh.f32 %v4230_v49 }
 0x1f9   :  { %v3334_v53 = vpop.eup %3333 }
 0x1fa   :  { %v533_v56 = vmul.f32 %v3334_v53, %v528_v58  ;;  %v6466_v58 = vld [vmem:[#allocation22_spill] sm:$0xff]  ;;  %v6467_v53 = vld [vmem:[#allocation23_spill] sm:$0xff] }
 0x1fc   :  { %611 = vmatmul.mubr.f32.vlgmr.msra.gmra.mxu0 %v533_v56  ;;  %682 = vmatmul.mubr.f32.vlgmr.msra.gmra.mxu1 %v533_v56  ;;  %v6468_v56 = vld [vmem:[#allocation24_spill] sm:$0xff] }
 0x1fd   :  { %723 = vmatpush1.msra.mxu0 %v3648_v2  ;;  %794 = vmatpush1.msra.mxu1 %v3657_v4 }
 0x1fe   :  { %724 = vmatprep.subr.mxu0 %v3662_v5  ;;  %795 = vmatprep.subr.mxu1 %v3667_v6 }
 0x1ff   :  { %725 = vmatpush1.msra.mxu0 %v3674_v7  ;;  %796 = vmatpush1.msra.mxu1 %v3679_v8 }
 0x200   :  { %726 = vmatprep.subr.mxu0 %v3684_v9  ;;  %797 = vmatprep.subr.mxu1 %v3691_v10 }
 0x201   :  { %727 = vmatpush1.msra.mxu0 %v3696_v11  ;;  %798 = vmatpush1.msra.mxu1 %v3701_v12 }
 0x202   :  { %728 = vmatprep.subr.mxu0 %v3708_v13  ;;  %799 = vmatprep.subr.mxu1 %v3713_v14 }
 0x203   :  { %729 = vmatpush1.msra.mxu0 %v3720_v15  ;;  %800 = vmatpush1.msra.mxu1 %v3725_v16 }
 0x204   :  { %730 = vmatprep.subr.mxu0 %v3732_v17  ;;  %801 = vmatprep.subr.mxu1 %v3737_v18 }
 0x205   :  { %731 = vmatpush1.msra.mxu0 %v3744_v19  ;;  %802 = vmatpush1.msra.mxu1 %v3749_v20 }
 0x206   :  { %732 = vmatprep.subr.mxu0 %v3756_v21  ;;  %803 = vmatprep.subr.mxu1 %v3761_v22 }
 0x207   :  { %733 = vmatpush1.msra.mxu0 %v3768_v23  ;;  %804 = vmatpush1.msra.mxu1 %v3773_v24 }
 0x208   :  { %734 = vmatprep.subr.mxu0 %v3780_v25  ;;  %805 = vmatprep.subr.mxu1 %v3785_v26 }
 0x209   :  { %735 = vmatpush1.msra.mxu0 %v3792_v27  ;;  %806 = vmatpush1.msra.mxu1 %v3797_v28 }
 0x20a   :  { %736 = vmatprep.subr.mxu0 %v3804_v29  ;;  %807 = vmatprep.subr.mxu1 %v3809_v30 }
 0x20b   :  { %737 = vmatpush1.msra.mxu0 %v3816_v31  ;;  %808 = vmatpush1.msra.mxu1 %v3821_v32 }
 0x20c   :  { %738 = vmatprep.subr.mxu0 %v3828_v33  ;;  %809 = vmatprep.subr.mxu1 %v3833_v34 }
 0x20d   :  { %739 = vmatpush1.msra.mxu0 %v3840_v35  ;;  %810 = vmatpush1.msra.mxu1 %v3845_v36 }
 0x20e   :  { %740 = vmatprep.subr.mxu0 %v3852_v37  ;;  %811 = vmatprep.subr.mxu1 %v3857_v38 }
 0x20f   :  { %741 = vmatpush1.msra.mxu0 %v3864_v39  ;;  %812 = vmatpush1.msra.mxu1 %v3869_v40 }
 0x210   :  { %742 = vmatprep.subr.mxu0 %v3876_v41  ;;  %813 = vmatprep.subr.mxu1 %v3881_v42 }
 0x211   :  { %743 = vmatpush1.msra.mxu0 %v6449_v1  ;;  %814 = vmatpush1.msra.mxu1 %v6450_v47 }
 0x212   :  { %744 = vmatprep.subr.mxu0 %v6451_v43  ;;  %815 = vmatprep.subr.mxu1 %v6452_v61 }
 0x213   :  { %745 = vmatpush1.msra.mxu0 %v6453_v52  ;;  %816 = vmatpush1.msra.mxu1 %v6454_v0 }
 0x214   :  { %746 = vmatprep.subr.mxu0 %v6455_v54  ;;  %817 = vmatprep.subr.mxu1 %v6456_v45  ;;  %v6478_v54 = vld [vmem:[#allocation34_spill] sm:$0xff] }
 0x215   :  { %747 = vmatpush1.msra.mxu0 %v6457_v62  ;;  %818 = vmatpush1.msra.mxu1 %v6458_v59  ;;  %v6469_v59 = vld [vmem:[#allocation25_spill] sm:$0xff] }
 0x216   :  { %748 = vmatprep.subr.mxu0 %v6459_v60  ;;  %819 = vmatprep.subr.mxu1 %v6460_v44  ;;  %v6470_v60 = vmov 0.0   ;;  %v6471_v44 = vld [vmem:[#allocation26_spill] sm:$0xff] }
 0x217   :  { %749 = vmatpush1.msra.mxu0 %v6461_v57  ;;  %820 = vmatpush1.msra.mxu1 %v6462_v3  ;;  %v6472_v3 = vld [vmem:[#allocation3_spill] sm:$0xff] }
 0x218   :  { %750 = vmatprep.subr.mxu0 %v6463_v51  ;;  %821 = vmatprep.subr.mxu1 %v6464_v63  ;;  %v6473_v51 = vld [vmem:[#allocation4_spill] sm:$0xff]  ;;  %v3594_v63 = vmov 3  }
 0x219   :  { %751 = vmatpush1.msra.mxu0 %v6465_v46  ;;  %822 = vmatpush1.msra.mxu1 %v6466_v58  ;;  %v6474_v46 = vld [vmem:[#allocation27_spill] sm:$0xff]  ;;  %v536_v58 = vpop.permute.xlu1 %535 }
 0x21a   :  { %752 = vmatprep.subr.mxu0 %v6467_v53  ;;  %823 = vmatprep.subr.mxu1 %v6468_v56  ;;  %v6475_v53 = vld [vmem:[#allocation31_spill] sm:$0xff]  ;;  %v6476_v56 = vld [vmem:[#allocation32_spill] sm:$0xff]  ;;  %v540_v0 = vmul.f32 %v536_v58, %v6478_v54 }
 0x21b   :  { %753 = vmatpush1.msra.mxu0 %v6469_v59  ;;  %786 = vmatprep.mubr.f32.mxu0 %v6470_v60  ;;  %v538_v57 = vmul.f32 %v536_v58, %v6475_v53  ;;  %v539_v62 = vmul.f32 %v536_v58, %v6476_v56  ;;  %v6477_v59 = vld [vmem:[#allocation33_spill] sm:$0xff]  ;;  %v541_v53 = vmul.f32 %v536_v58, %v4143_v55 }
 0x21c   :  { %824 = vmatpush1.msra.mxu1 %v6471_v44  ;;  %857 = vmatprep.mubr.f32.mxu1 %v6470_v60  ;;  %v6479_v44 = vld [vmem:[#allocation35_spill] sm:$0xff] }
 0x21d   :  { %898 = vmatprep.subr.mxu0 %v6472_v3  ;;  %969 = vmatprep.subr.mxu1 %v6473_v51  ;;  %v542_v45 = vadd.f32 %v538_v57, %v6477_v59  ;;  %v543_v52 = vadd.f32 %v539_v62, %v6479_v44  ;;  %v544_v51 = vadd.f32 %v540_v0, %v4139_v48 }
 0x21e   :  { %3308 = vset.pattern.permute.xlu1 %v3594_v63  ;;  %v545_v57 = vadd.f32 %v541_v53, %v4148_v50 }
 0x21f   :  { %711 = vperm.xlu1 %3308, %v6474_v46  }
 0x2bc   :  { %v612_v60 = vpop.f32.mrf.mxu0  ;;  %v683_v47 = vpop.f32.mrf.mxu1 }
 0x2bd   :  { %v688_v61 = vadd.f32 %v612_v60, %v542_v45  ;;  %v690_v1 = vadd.f32 %v683_v47, %v544_v51 }
 0x2be   :  { %v614_v3 = vpop.f32.mrf.mxu0  ;;  %v685_v59 = vpop.f32.mrf.mxu1 }
 0x2bf   :  { %v692_v43 = vmul.f32 0.5, %v688_v61  ;;  %v689_v63 = vadd.f32 %v614_v3, %v543_v52  ;;  %v691_v54 = vadd.f32 %v685_v59, %v545_v57 }
 0x2c1   :  { %3335 = vtanh.f32 %v692_v43  ;;  %v696_v46 = vmul.f32 0.5, %v689_v63  ;;  %v701_v62 = vmul.f32 0.5, %v691_v54 }
 0x2c3   :  { %3337 = vtanh.f32 %v696_v46 }
 0x2c4   :  { %3339 = vtanh.f32 %v690_v1 }
 0x2c5   :  { %3341 = vtanh.f32 %v701_v62 }
 0x2ce   :  { %v3336_v44 = vpop.eup %3335 }
 0x2cf   :  { %v694_v45 = vmul.f32 0.5, %v3336_v44 }
 0x2d0   :  { %v3338_v60 = vpop.eup %3337 }
 0x2d1   :  { %v695_v61 = vadd.f32 0.5, %v694_v45  ;;  %v698_v56 = vmul.f32 0.5, %v3338_v60  ;;  %v3340_v0 = vpop.eup %3339 }
 0x2d2   :  { %v3342_v47 = vpop.eup %3341 }
 0x2d3   :  { %v699_v52 = vadd.f32 0.5, %v698_v56  ;;  %v706_v3 = vmul.f32 %v3340_v0, %v695_v61  ;;  %v703_v46 = vmul.f32 0.5, %v3342_v47 }
 0x2d5   :  { %v705_v43 = vmul.f32 %v699_v52, %v4230_v49  ;;  %v704_v1 = vadd.f32 0.5, %v703_v46 }
 0x2d7   :  { %v4309_v58 = vadd.f32 %v706_v3, %v705_v43 }
 0x2d9   :  { %3343 = vtanh.f32 %v4309_v58 }
 0x2e6   :  { %v3344_v59 = vpop.eup %3343 }
 0x2e7   :  { %v709_v54 = vmul.f32 %v3344_v59, %v704_v1 }
 0x2e9   :  { %787 = vmatmul.mubr.f32.vlgmr.msra.gmra.mxu0 %v709_v54  ;;  %858 = vmatmul.mubr.f32.vlgmr.msra.gmra.mxu1 %v709_v54 }
 0x2ea   :  { %899 = vmatpush1.msra.mxu0 %v3648_v2  ;;  %970 = vmatpush1.msra.mxu1 %v3657_v4  ;;  %v6480_v2 = vld [vmem:[#allocation5_spill] sm:$0xff]  ;;  %v6481_v4 = vld [vmem:[#allocation6_spill] sm:$0xff] }
 0x2eb   :  { %900 = vmatprep.subr.mxu0 %v3662_v5  ;;  %971 = vmatprep.subr.mxu1 %v3667_v6  ;;  %v6482_v5 = vld [vmem:[#allocation7_spill] sm:$0xff]  ;;  %v6483_v6 = vld [vmem:[#allocation8_spill] sm:$0xff] }
 0x2ec   :  { %901 = vmatpush1.msra.mxu0 %v3674_v7  ;;  %972 = vmatpush1.msra.mxu1 %v3679_v8  ;;  %v6484_v7 = vld [vmem:[#allocation9_spill] sm:$0xff]  ;;  %v6485_v8 = vld [vmem:[#allocation10_spill] sm:$0xff] }
 0x2ed   :  { %902 = vmatprep.subr.mxu0 %v3684_v9  ;;  %973 = vmatprep.subr.mxu1 %v3691_v10  ;;  %v6486_v9 = vld [vmem:[#allocation11_spill] sm:$0xff]  ;;  %v6487_v10 = vld [vmem:[#allocation12_spill] sm:$0xff] }
 0x2ee   :  { %903 = vmatpush1.msra.mxu0 %v3696_v11  ;;  %974 = vmatpush1.msra.mxu1 %v3701_v12  ;;  %v6488_v11 = vld [vmem:[#allocation13_spill] sm:$0xff]  ;;  %v6489_v12 = vld [vmem:[#allocation14_spill] sm:$0xff] }
 0x2ef   :  { %904 = vmatprep.subr.mxu0 %v3708_v13  ;;  %975 = vmatprep.subr.mxu1 %v3713_v14  ;;  %v6490_v13 = vld [vmem:[#allocation15_spill] sm:$0xff]  ;;  %v6491_v14 = vld [vmem:[#allocation16_spill] sm:$0xff] }
 0x2f0   :  { %905 = vmatpush1.msra.mxu0 %v3720_v15  ;;  %976 = vmatpush1.msra.mxu1 %v3725_v16  ;;  %v6492_v15 = vld [vmem:[#allocation17_spill] sm:$0xff]  ;;  %v6493_v16 = vld [vmem:[#allocation18_spill] sm:$0xff] }
 0x2f1   :  { %906 = vmatprep.subr.mxu0 %v3732_v17  ;;  %977 = vmatprep.subr.mxu1 %v3737_v18  ;;  %v6494_v17 = vld [vmem:[#allocation19_spill] sm:$0xff]  ;;  %v6495_v18 = vld [vmem:[#allocation20_spill] sm:$0xff] }
 0x2f2   :  { %907 = vmatpush1.msra.mxu0 %v3744_v19  ;;  %978 = vmatpush1.msra.mxu1 %v3749_v20  ;;  %v6496_v19 = vld [vmem:[#allocation21_spill] sm:$0xff]  ;;  %v6497_v20 = vld [vmem:[#allocation22_spill] sm:$0xff] }
 0x2f3   :  { %908 = vmatprep.subr.mxu0 %v3756_v21  ;;  %979 = vmatprep.subr.mxu1 %v3761_v22  ;;  %v6498_v21 = vld [vmem:[#allocation23_spill] sm:$0xff]  ;;  %v6499_v22 = vld [vmem:[#allocation24_spill] sm:$0xff] }
 0x2f4   :  { %909 = vmatpush1.msra.mxu0 %v3768_v23  ;;  %980 = vmatpush1.msra.mxu1 %v3773_v24  ;;  %v6500_v23 = vld [vmem:[#allocation25_spill] sm:$0xff]  ;;  %v6501_v24 = vmov 0.0  }
 0x2f5   :  { %910 = vmatprep.subr.mxu0 %v3780_v25  ;;  %981 = vmatprep.subr.mxu1 %v3785_v26  ;;  %v6502_v25 = vld [vmem:[#allocation26_spill] sm:$0xff]  ;;  %v4379_v26 = vld [vmem:[%s6132_s1 + $0x1e8] sm:$0xff] }
 0x2f6   :  { %911 = vmatpush1.msra.mxu0 %v3792_v27  ;;  %982 = vmatpush1.msra.mxu1 %v3797_v28  ;;  %6503 = vst [vmem:[#allocation3_spill] sm:$0xff] %v4379_v26  ;;  %v4385_v27 = vld [vmem:[%s6132_s1 + $0x1f8] sm:$0xff]  ;;  %v3595_v28 = vmov 4  }
 0x2f7   :  { %912 = vmatprep.subr.mxu0 %v3804_v29  ;;  %983 = vmatprep.subr.mxu1 %v3809_v30  ;;  %6504 = vst [vmem:[#allocation4_spill] sm:$0xff] %v4385_v27  ;;  %v6505_v29 = vld [vmem:[#allocation27_spill] sm:$0xff]  ;;  %v712_v30 = vpop.permute.xlu1 %711 }
 0x2f8   :  { %913 = vmatpush1.msra.mxu0 %v3816_v31  ;;  %984 = vmatpush1.msra.mxu1 %v3821_v32  ;;  %v6506_v31 = vld [vmem:[#allocation31_spill] sm:$0xff]  ;;  %v717_v57 = vmul.f32 %v712_v30, %v4143_v55 }
 0x2f9   :  { %914 = vmatprep.subr.mxu0 %v3828_v33  ;;  %985 = vmatprep.subr.mxu1 %v3833_v34  ;;  %v714_v32 = vmul.f32 %v712_v30, %v6506_v31  ;;  %v6507_v33 = vld [vmem:[#allocation32_spill] sm:$0xff] }
 0x2fa   :  { %915 = vmatpush1.msra.mxu0 %v3840_v35  ;;  %986 = vmatpush1.msra.mxu1 %v3845_v36  ;;  %v715_v34 = vmul.f32 %v712_v30, %v6507_v33  ;;  %v6508_v35 = vld [vmem:[#allocation33_spill] sm:$0xff]  ;;  %v721_v45 = vadd.f32 %v717_v57, %v4148_v50  ;;  %v4596_v57 = vld [vmem:[%s6132_s1 + $0xe0] sm:$0xff] }
 0x2fb   :  { %916 = vmatprep.subr.mxu0 %v3852_v37  ;;  %987 = vmatprep.subr.mxu1 %v3857_v38  ;;  %v718_v36 = vadd.f32 %v714_v32, %v6508_v35  ;;  %v6509_v37 = vld [vmem:[#allocation34_spill] sm:$0xff] }
 0x2fc   :  { %917 = vmatpush1.msra.mxu0 %v3864_v39  ;;  %988 = vmatpush1.msra.mxu1 %v3869_v40  ;;  %v716_v38 = vmul.f32 %v712_v30, %v6509_v37  ;;  %v6510_v39 = vld [vmem:[#allocation35_spill] sm:$0xff]  ;;  %v4512_v30 = vld [vmem:[%s6132_s1 + $0x148] sm:$0xff]  ;;  %v4518_v32 = vld [vmem:[%s6132_s1 + $0x158] sm:$0xff] }
 0x2fd   :  { %918 = vmatprep.subr.mxu0 %v3876_v41  ;;  %989 = vmatprep.subr.mxu1 %v3881_v42  ;;  %v719_v40 = vadd.f32 %v715_v34, %v6510_v39  ;;  %6517 = vst [vmem:[#allocation11_spill] sm:$0xff] %v4518_v32  ;;  %v4524_v34 = vld [vmem:[%s6132_s1 + $0x140] sm:$0xff] }
 0x2fe   :  { %919 = vmatpush1.msra.mxu0 %v6480_v2  ;;  %990 = vmatpush1.msra.mxu1 %v6481_v4  ;;  %v720_v53 = vadd.f32 %v716_v38, %v4139_v48  ;;  %v4536_v38 = vld [vmem:[%s6132_s1 + $0x128] sm:$0xff] }
 0x2ff   :  { %920 = vmatprep.subr.mxu0 %v6482_v5  ;;  %991 = vmatprep.subr.mxu1 %v6483_v6 }
 0x300   :  { %921 = vmatpush1.msra.mxu0 %v6484_v7  ;;  %992 = vmatpush1.msra.mxu1 %v6485_v8 }
 0x301   :  { %922 = vmatprep.subr.mxu0 %v6486_v9  ;;  %993 = vmatprep.subr.mxu1 %v6487_v10  ;;  %v4404_v10 = vld [vmem:[%s6132_s1 + $0x1e0] sm:$0xff] }
 0x302   :  { %923 = vmatpush1.msra.mxu0 %v6488_v11  ;;  %994 = vmatpush1.msra.mxu1 %v6489_v12  ;;  %v4416_v11 = vld [vmem:[%s6132_s1 + $0x1c8] sm:$0xff]  ;;  %v4422_v12 = vld [vmem:[%s6132_s1 + $0x1d8] sm:$0xff] }
 0x303   :  { %924 = vmatprep.subr.mxu0 %v6490_v13  ;;  %995 = vmatprep.subr.mxu1 %v6491_v14  ;;  %v4428_v13 = vld [vmem:[%s6132_s1 + $0x1c0] sm:$0xff]  ;;  %v4434_v14 = vld [vmem:[%s6132_s1 + $0x1d0] sm:$0xff] }
 0x304   :  { %925 = vmatpush1.msra.mxu0 %v6492_v15  ;;  %996 = vmatpush1.msra.mxu1 %v6493_v16  ;;  %v4440_v15 = vld [vmem:[%s6132_s1 + $0x1a8] sm:$0xff]  ;;  %v4446_v16 = vld [vmem:[%s6132_s1 + $0x1b8] sm:$0xff] }
 0x305   :  { %926 = vmatprep.subr.mxu0 %v6494_v17  ;;  %997 = vmatprep.subr.mxu1 %v6495_v18  ;;  %6511 = vst [vmem:[#allocation5_spill] sm:$0xff] %v4446_v16  ;;  %v4452_v17 = vld [vmem:[%s6132_s1 + $0x1a0] sm:$0xff]  ;;  %v4458_v18 = vld [vmem:[%s6132_s1 + $0x1b0] sm:$0xff] }
 0x306   :  { %927 = vmatpush1.msra.mxu0 %v6496_v19  ;;  %998 = vmatpush1.msra.mxu1 %v6497_v20  ;;  %6512 = vst [vmem:[#allocation6_spill] sm:$0xff] %v4458_v18  ;;  %v4464_v19 = vld [vmem:[%s6132_s1 + $0x188] sm:$0xff]  ;;  %v4470_v20 = vld [vmem:[%s6132_s1 + $0x198] sm:$0xff] }
 0x307   :  { %928 = vmatprep.subr.mxu0 %v6498_v21  ;;  %999 = vmatprep.subr.mxu1 %v6499_v22  ;;  %6513 = vst [vmem:[#allocation7_spill] sm:$0xff] %v4470_v20  ;;  %v4476_v21 = vld [vmem:[%s6132_s1 + $0x180] sm:$0xff]  ;;  %v4482_v22 = vld [vmem:[%s6132_s1 + $0x190] sm:$0xff] }
 0x308   :  { %929 = vmatpush1.msra.mxu0 %v6500_v23  ;;  %962 = vmatprep.mubr.f32.mxu0 %v6501_v24  ;;  %6514 = vst [vmem:[#allocation8_spill] sm:$0xff] %v4482_v22  ;;  %v4488_v23 = vld [vmem:[%s6132_s1 + $0x168] sm:$0xff] }
 0x309   :  { %1000 = vmatpush1.msra.mxu1 %v6502_v25  ;;  %1033 = vmatprep.mubr.f32.mxu1 %v6501_v24  ;;  %v4494_v25 = vld [vmem:[%s6132_s1 + $0x178] sm:$0xff] }
 0x30a   :  { %1074 = vmatprep.subr.mxu0 %v4379_v26  ;;  %1145 = vmatprep.subr.mxu1 %v4385_v27  ;;  %6515 = vst [vmem:[#allocation9_spill] sm:$0xff] %v4494_v25 }
 0x30b   :  { %3309 = vset.pattern.permute.xlu1 %v3595_v28  ;;  %v4500_v28 = vld [vmem:[%s6132_s1 + $0x160] sm:$0xff] }
 0x30c   :  { %887 = vperm.xlu1 %3309, %v6505_v29   ;;  %v4506_v29 = vld [vmem:[%s6132_s1 + $0x170] sm:$0xff] }
 0x30d   :  { %6516 = vst [vmem:[#allocation10_spill] sm:$0xff] %v4506_v29 }
 0x3a9   :  { %v788_v41 = vpop.f32.mrf.mxu0  ;;  %v859_v51 = vpop.f32.mrf.mxu1 }
 0x3aa   :  { %v864_v42 = vadd.f32 %v788_v41, %v718_v36  ;;  %v866_v62 = vadd.f32 %v859_v51, %v720_v53  ;;  %v4530_v36 = vld [vmem:[%s6132_s1 + $0x150] sm:$0xff]  ;;  %v4548_v41 = vld [vmem:[%s6132_s1 + $0x120] sm:$0xff]  ;;  %v4584_v51 = vld [vmem:[%s6132_s1 + $0xe8] sm:$0xff] }
 0x3ab   :  { %v790_v49 = vpop.f32.mrf.mxu0  ;;  %v861_v60 = vpop.f32.mrf.mxu1  ;;  %6518 = vst [vmem:[#allocation12_spill] sm:$0xff] %v4530_v36  ;;  %v4572_v53 = vld [vmem:[%s6132_s1 + $0x100] sm:$0xff] }
 0x3ac   :  { %v868_v44 = vmul.f32 0.5, %v864_v42  ;;  %v865_v56 = vadd.f32 %v790_v49, %v719_v40  ;;  %v867_v61 = vadd.f32 %v861_v60, %v721_v45  ;;  %v4542_v40 = vld [vmem:[%s6132_s1 + $0x138] sm:$0xff]  ;;  %v4554_v42 = vld [vmem:[%s6132_s1 + $0x130] sm:$0xff]  ;;  %v4560_v49 = vld [vmem:[%s6132_s1 + $0x108] sm:$0xff] }
 0x3ad   :  { %6519 = vst [vmem:[#allocation13_spill] sm:$0xff] %v4542_v40  ;;  %6520 = vst [vmem:[#allocation14_spill] sm:$0xff] %v4554_v42  ;;  %v4608_v45 = vld [vmem:[%s6132_s1 + $0xc8] sm:$0xff]  ;;  %v4614_v60 = vld [vmem:[%s6132_s1 + $0xd8] sm:$0xff] }
 0x3ae   :  { %3345 = vtanh.f32 %v868_v44  ;;  %v872_v63 = vmul.f32 0.5, %v865_v56  ;;  %v877_v52 = vmul.f32 0.5, %v867_v61  ;;  %v4566_v44 = vld [vmem:[%s6132_s1 + $0x118] sm:$0xff]  ;;  %v4578_v56 = vld [vmem:[%s6132_s1 + $0x110] sm:$0xff]  ;;  %6525 = vst [vmem:[#allocation19_spill] sm:$0xff] %v4614_v60  ;;  %v4620_v61 = vld [vmem:[%s6132_s1 + $0xc0] sm:$0xff] }
 0x3af   :  { %6521 = vst [vmem:[#allocation15_spill] sm:$0xff] %v4566_v44  ;;  %6522 = vst [vmem:[#allocation16_spill] sm:$0xff] %v4578_v56 }
 0x3b0   :  { %3347 = vtanh.f32 %v872_v63  ;;  %v4590_v63 = vld [vmem:[%s6132_s1 + $0xf8] sm:$0xff] }
 0x3b1   :  { %3349 = vtanh.f32 %v866_v62  ;;  %6523 = vst [vmem:[#allocation17_spill] sm:$0xff] %v4590_v63  ;;  %v4602_v62 = vld [vmem:[%s6132_s1 + $0xf0] sm:$0xff] }
 0x3b2   :  { %3351 = vtanh.f32 %v877_v52  ;;  %6524 = vst [vmem:[#allocation18_spill] sm:$0xff] %v4602_v62  ;;  %v4626_v52 = vld [vmem:[%s6132_s1 + $0xd0] sm:$0xff] }
 0x3b3   :  { %6526 = vst [vmem:[#allocation20_spill] sm:$0xff] %v4626_v52 }
 0x3bb   :  { %v3346_v0 = vpop.eup %3345 }
 0x3bc   :  { %v870_v43 = vmul.f32 0.5, %v3346_v0  ;;  %v4632_v0 = vld [vmem:[%s6132_s1 + $0xa8] sm:$0xff] }
 0x3bd   :  { %v3348_v3 = vpop.eup %3347 }
 0x3be   :  { %v871_v47 = vadd.f32 0.5, %v870_v43  ;;  %v874_v46 = vmul.f32 0.5, %v3348_v3  ;;  %v3350_v59 = vpop.eup %3349  ;;  %v4638_v43 = vld [vmem:[%s6132_s1 + $0xb8] sm:$0xff]  ;;  %v4644_v3 = vld [vmem:[%s6132_s1 + $0xa0] sm:$0xff] }
 0x3bf   :  { %v3352_v5 = vpop.eup %3351  ;;  %6527 = vst [vmem:[#allocation21_spill] sm:$0xff] %v4638_v43  ;;  %6528 = vst [vmem:[#allocation22_spill] sm:$0xff] %v4644_v3 }
 0x3c0   :  { %v875_v1 = vadd.f32 0.5, %v874_v46  ;;  %v882_v2 = vmul.f32 %v3350_v59, %v871_v47  ;;  %v879_v6 = vmul.f32 0.5, %v3352_v5  ;;  %v4650_v47 = vld [vmem:[%s6132_s1 + $0xb0] sm:$0xff]  ;;  %v4656_v46 = vld [vmem:[%s6132_s1 + $0x88] sm:$0xff]  ;;  %v4668_v59 = vld [vmem:[%s6132_s1 + $0x80] sm:$0xff] }
 0x3c1   :  { %6529 = vst [vmem:[#allocation23_spill] sm:$0xff] %v4650_v47  ;;  %6530 = vst [vmem:[#allocation24_spill] sm:$0xff] %v4656_v46  ;;  %v4686_v5 = vld [vmem:[%s6132_s1 + $0x78] sm:$0xff] }
 0x3c2   :  { %v881_v54 = vmul.f32 %v875_v1, %v4309_v58  ;;  %v880_v7 = vadd.f32 0.5, %v879_v6  ;;  %v4410_v58 = vld [vmem:[%s6132_s1 + $0x1f0] sm:$0xff]  ;;  %v4662_v1 = vld [vmem:[%s6132_s1 + $0x98] sm:$0xff]  ;;  %6532 = vst [vmem:[#allocation26_spill] sm:$0xff] %v4668_v59  ;;  %6535 = vst [vmem:[#allocation37_spill] sm:$0xff] %v4686_v5 }
 0x3c3   :  { %6531 = vst [vmem:[#allocation25_spill] sm:$0xff] %v4662_v1  ;;  %v4692_v6 = vld [vmem:[%s6132_s1 + $0x60] sm:$0xff] }
 0x3c4   :  { %v4398_v4 = vadd.f32 %v882_v2, %v881_v54  ;;  %v4674_v54 = vld [vmem:[%s6132_s1 + $0x90] sm:$0xff]  ;;  %v4680_v2 = vld [vmem:[%s6132_s1 + $0x68] sm:$0xff]  ;;  %6536 = vst [vmem:[#allocation38_spill] sm:$0xff] %v4692_v6 }
 0x3c5   :  { %6533 = vst [vmem:[#allocation27_spill] sm:$0xff] %v4674_v54  ;;  %6534 = vst [vmem:[#allocation36_spill] sm:$0xff] %v4680_v2 }
 0x3c6   :  { %3353 = vtanh.f32 %v4398_v4 }
 0x3d3   :  { %v3354_v8 = vpop.eup %3353 }
 0x3d4   :  { %v885_v9 = vmul.f32 %v3354_v8, %v880_v7  ;;  %v4698_v7 = vld [vmem:[%s6132_s1 + $0x70] sm:$0xff]  ;;  %v4704_v8 = vld [vmem:[%s6132_s1 + $0x48] sm:$0xff] }
 0x3d5   :  { %6537 = vst [vmem:[#allocation39_spill] sm:$0xff] %v4698_v7  ;;  %6538 = vst [vmem:[#allocation40_spill] sm:$0xff] %v4704_v8 }
 0x3d6   :  { %963 = vmatmul.mubr.f32.vlgmr.msra.gmra.mxu0 %v885_v9  ;;  %1034 = vmatmul.mubr.f32.vlgmr.msra.gmra.mxu1 %v885_v9  ;;  %v4710_v9 = vld [vmem:[%s6132_s1 + $0x58] sm:$0xff] }
 0x3d7   :  { %1075 = vmatpush1.msra.mxu0 %v4404_v10  ;;  %1146 = vmatpush1.msra.mxu1 %v4410_v58  ;;  %6539 = vst [vmem:[#allocation41_spill] sm:$0xff] %v4710_v9 }
 0x3d8   :  { %1076 = vmatprep.subr.mxu0 %v4416_v11  ;;  %1147 = vmatprep.subr.mxu1 %v4422_v12 }
 0x3d9   :  { %1077 = vmatpush1.msra.mxu0 %v4428_v13  ;;  %1148 = vmatpush1.msra.mxu1 %v4434_v14 }
 0x3da   :  { %1078 = vmatprep.subr.mxu0 %v4440_v15  ;;  %1149 = vmatprep.subr.mxu1 %v4446_v16 }
 0x3db   :  { %1079 = vmatpush1.msra.mxu0 %v4452_v17  ;;  %1150 = vmatpush1.msra.mxu1 %v4458_v18 }
 0x3dc   :  { %1080 = vmatprep.subr.mxu0 %v4464_v19  ;;  %1151 = vmatprep.subr.mxu1 %v4470_v20 }
 0x3dd   :  { %1081 = vmatpush1.msra.mxu0 %v4476_v21  ;;  %1152 = vmatpush1.msra.mxu1 %v4482_v22 }
 0x3de   :  { %1082 = vmatprep.subr.mxu0 %v4488_v23  ;;  %1153 = vmatprep.subr.mxu1 %v4494_v25 }
 0x3df   :  { %1083 = vmatpush1.msra.mxu0 %v4500_v28  ;;  %1154 = vmatpush1.msra.mxu1 %v4506_v29 }
 0x3e0   :  { %1084 = vmatprep.subr.mxu0 %v4512_v30  ;;  %1155 = vmatprep.subr.mxu1 %v4518_v32 }
 0x3e1   :  { %1085 = vmatpush1.msra.mxu0 %v4524_v34  ;;  %1156 = vmatpush1.msra.mxu1 %v4530_v36 }
 0x3e2   :  { %1086 = vmatprep.subr.mxu0 %v4536_v38  ;;  %1157 = vmatprep.subr.mxu1 %v4542_v40 }
 0x3e3   :  { %1087 = vmatpush1.msra.mxu0 %v4548_v41  ;;  %1158 = vmatpush1.msra.mxu1 %v4554_v42 }
 0x3e4   :  { %1088 = vmatprep.subr.mxu0 %v4560_v49  ;;  %1159 = vmatprep.subr.mxu1 %v4566_v44 }
 0x3e5   :  { %1089 = vmatpush1.msra.mxu0 %v4572_v53  ;;  %1160 = vmatpush1.msra.mxu1 %v4578_v56 }
 0x3e6   :  { %1090 = vmatprep.subr.mxu0 %v4584_v51  ;;  %1161 = vmatprep.subr.mxu1 %v4590_v63 }
 0x3e7   :  { %1091 = vmatpush1.msra.mxu0 %v4596_v57  ;;  %1162 = vmatpush1.msra.mxu1 %v4602_v62 }
 0x3e8   :  { %1092 = vmatprep.subr.mxu0 %v4608_v45  ;;  %1163 = vmatprep.subr.mxu1 %v4614_v60 }
 0x3e9   :  { %1093 = vmatpush1.msra.mxu0 %v4620_v61  ;;  %1164 = vmatpush1.msra.mxu1 %v4626_v52 }
 0x3ea   :  { %1094 = vmatprep.subr.mxu0 %v4632_v0  ;;  %1165 = vmatprep.subr.mxu1 %v4638_v43 }
 0x3eb   :  { %1095 = vmatpush1.msra.mxu0 %v4644_v3  ;;  %1166 = vmatpush1.msra.mxu1 %v4650_v47 }
 0x3ec   :  { %1096 = vmatprep.subr.mxu0 %v4656_v46  ;;  %1167 = vmatprep.subr.mxu1 %v4662_v1 }
 0x3ed   :  { %1097 = vmatpush1.msra.mxu0 %v4668_v59  ;;  %1168 = vmatpush1.msra.mxu1 %v4674_v54 }
 0x3ee   :  { %1098 = vmatprep.subr.mxu0 %v4680_v2  ;;  %1169 = vmatprep.subr.mxu1 %v4686_v5  ;;  %v888_v5 = vpop.permute.xlu1 %887 }
 0x3ef   :  { %1099 = vmatpush1.msra.mxu0 %v4692_v6  ;;  %1170 = vmatpush1.msra.mxu1 %v4698_v7  ;;  %v4716_v6 = vld [vmem:[%s6132_s1 + $0x40] sm:$0xff]  ;;  %v4722_v7 = vld [vmem:[%s6132_s1 + $0x50] sm:$0xff] }
 0x3f0   :  { %1100 = vmatprep.subr.mxu0 %v4704_v8  ;;  %1171 = vmatprep.subr.mxu1 %v4710_v9  ;;  %6540 = vst [vmem:[#allocation42_spill] sm:$0xff] %v4716_v6  ;;  %6541 = vst [vmem:[#allocation43_spill] sm:$0xff] %v4722_v7  ;;  %v4728_v8 = vld [vmem:[%s6132_s1 + $0x28] sm:$0xff]  ;;  %v4734_v9 = vld [vmem:[%s6132_s1 + $0x38] sm:$0xff] }
 0x3f1   :  { %1101 = vmatpush1.msra.mxu0 %v4716_v6  ;;  %1172 = vmatpush1.msra.mxu1 %v4722_v7  ;;  %6542 = vst [vmem:[#allocation44_spill] sm:$0xff] %v4728_v8  ;;  %6543 = vst [vmem:[#allocation45_spill] sm:$0xff] %v4734_v9  ;;  %v4740_v6 = vld [vmem:[%s6132_s1 + $0x20] sm:$0xff]  ;;  %v4746_v7 = vld [vmem:[%s6132_s1 + $0x30] sm:$0xff] }
 0x3f2   :  { %1102 = vmatprep.subr.mxu0 %v4728_v8  ;;  %1173 = vmatprep.subr.mxu1 %v4734_v9  ;;  %6544 = vst [vmem:[#allocation46_spill] sm:$0xff] %v4740_v6  ;;  %6545 = vst [vmem:[#allocation47_spill] sm:$0xff] %v4746_v7  ;;  %v4752_v8 = vld [vmem:[%s6132_s1 + $0x8] sm:$0xff]  ;;  %v4758_v9 = vld [vmem:[%s6132_s1 + $0x18] sm:$0xff] }
 0x3f3   :  { %1103 = vmatpush1.msra.mxu0 %v4740_v6  ;;  %1174 = vmatpush1.msra.mxu1 %v4746_v7  ;;  %6546 = vst [vmem:[#allocation48_spill] sm:$0xff] %v4752_v8  ;;  %6547 = vst [vmem:[#allocation49_spill] sm:$0xff] %v4758_v9  ;;  %v4764_v6 = vld [vmem:[%s6132_s1] sm:$0xff]  ;;  %v6551_v7 = vmov 0  }
 0x3f4   :  { %1104 = vmatprep.subr.mxu0 %v4752_v8  ;;  %1175 = vmatprep.subr.mxu1 %v4758_v9  ;;  %6548 = vst [vmem:[#allocation50_spill] sm:$0xff] %v4764_v6  ;;  %v4771_v8 = vld [vmem:[%s6132_s1 + $0x10] sm:$0xff]  ;;  %v3596_v9 = vmov 5  }
 0x3f5   :  { %1105 = vmatpush1.msra.mxu0 %v4764_v6  ;;  %1138 = vmatprep.mubr.f32.mxu0 %v6501_v24  ;;  %6549 = vst [vmem:[#allocation51_spill] sm:$0xff] %v4771_v8  ;;  %v4780_v6 = vld [vmem:[%s6133_s0] sm:$0xf] }
 0x3f6   :  { %1176 = vmatpush1.msra.mxu1 %v4771_v8  ;;  %1209 = vmatprep.mubr.f32.mxu1 %v6501_v24  ;;  %6550 = vst [vmem:[#allocation52_spill] sm:$0xff] %v4780_v6  ;;  %v890_v8 = vmul.f32 %v888_v5, %v6506_v31  ;;  %v891_v24 = vmul.f32 %v888_v5, %v6507_v33 }
 0x3f7   :  { %1250 = vmatprep.subr.mxu0 %v4379_v26  ;;  %1321 = vmatprep.subr.mxu1 %v4385_v27  ;;  %v892_v27 = vmul.f32 %v888_v5, %v6509_v37  ;;  %v893_v31 = vmul.f32 %v888_v5, %v4143_v55 }
 0x3f8   :  { %3310 = vset.pattern.permute.xlu0 %v3596_v9  ;;  %v894_v26 = vadd.f32 %v890_v8, %v6508_v35  ;;  %v895_v9 = vadd.f32 %v891_v24, %v6510_v39 }
 0x3f9   :  { %1063 = vperm.xlu0 %3310, %v4780_v6   ;;  %v896_v46 = vadd.f32 %v892_v27, %v4139_v48  ;;  %v897_v8 = vadd.f32 %v893_v31, %v4148_v50 }
 0x3fd   :  { %3314 = vset.pattern.permute.xlu0 %v6551_v7 }
 0x496   :  { %v964_v2 = vpop.f32.mrf.mxu0  ;;  %v1035_v47 = vpop.f32.mrf.mxu1 }
 0x497   :  { %v1040_v54 = vadd.f32 %v964_v2, %v894_v26  ;;  %v1042_v3 = vadd.f32 %v1035_v47, %v896_v46  ;;  %v6555_v46 = vld [vmem:[#allocation25_spill] sm:$0xff] }
 0x498   :  { %v966_v59 = vpop.f32.mrf.mxu0  ;;  %v1037_v35 = vpop.f32.mrf.mxu1 }
 0x499   :  { %v1044_v1 = vmul.f32 0.5, %v1040_v54  ;;  %v1041_v6 = vadd.f32 %v966_v59, %v895_v9  ;;  %v1043_v37 = vadd.f32 %v1037_v35, %v897_v8  ;;  %v6557_v9 = vld [vmem:[#allocation27_spill] sm:$0xff]  ;;  %v6558_v8 = vld [vmem:[#allocation36_spill] sm:$0xff] }
 0x49b   :  { %3355 = vtanh.f32 %v1044_v1  ;;  %v1048_v7 = vmul.f32 0.5, %v1041_v6  ;;  %v1053_v24 = vmul.f32 0.5, %v1043_v37 }
 0x49d   :  { %3357 = vtanh.f32 %v1048_v7  ;;  %v6556_v7 = vld [vmem:[#allocation26_spill] sm:$0xff] }
 0x49e   :  { %3359 = vtanh.f32 %v1042_v3 }
 0x49f   :  { %3361 = vtanh.f32 %v1053_v24  ;;  %v6559_v24 = vld [vmem:[#allocation37_spill] sm:$0xff] }
 0x4a8   :  { %v3356_v39 = vpop.eup %3355 }
 0x4a9   :  { %v1046_v26 = vmul.f32 0.5, %v3356_v39  ;;  %v6553_v39 = vld [vmem:[#allocation23_spill] sm:$0xff] }
 0x4aa   :  { %v3358_v2 = vpop.eup %3357 }
 0x4ab   :  { %v1047_v54 = vadd.f32 0.5, %v1046_v26  ;;  %v1050_v33 = vmul.f32 0.5, %v3358_v2  ;;  %v3360_v59 = vpop.eup %3359  ;;  %v6560_v26 = vld [vmem:[#allocation38_spill] sm:$0xff]  ;;  %v6561_v2 = vld [vmem:[#allocation39_spill] sm:$0xff] }
 0x4ac   :  { %v3362_v31 = vpop.eup %3361 }
 0x4ad   :  { %v1051_v27 = vadd.f32 0.5, %v1050_v33  ;;  %v1058_v6 = vmul.f32 %v3360_v59, %v1047_v54  ;;  %v1055_v47 = vmul.f32 0.5, %v3362_v31  ;;  %v6552_v33 = vld [vmem:[#allocation22_spill] sm:$0xff]  ;;  %v6562_v54 = vld [vmem:[#allocation40_spill] sm:$0xff]  ;;  %v6567_v31 = vld [vmem:[#allocation45_spill] sm:$0xff] }
 0x4ae   :  { %v6564_v59 = vld [vmem:[#allocation42_spill] sm:$0xff] }
 0x4af   :  { %v1057_v1 = vmul.f32 %v1051_v27, %v4398_v4  ;;  %v1056_v3 = vadd.f32 0.5, %v1055_v47  ;;  %v6554_v4 = vld [vmem:[#allocation24_spill] sm:$0xff]  ;;  %v6563_v27 = vld [vmem:[#allocation41_spill] sm:$0xff]  ;;  %v6568_v47 = vld [vmem:[#allocation46_spill] sm:$0xff] }
 0x4b1   :  { %v4793_v5 = vadd.f32 %v1058_v6, %v1057_v1  ;;  %v6565_v1 = vld [vmem:[#allocation43_spill] sm:$0xff]  ;;  %v6566_v6 = vld [vmem:[#allocation44_spill] sm:$0xff] }
 0x4b3   :  { %3363 = vtanh.f32 %v4793_v5 }
 0x4c0   :  { %v3364_v35 = vpop.eup %3363 }
 0x4c1   :  { %v1061_v37 = vmul.f32 %v3364_v35, %v1056_v3  ;;  %v6569_v3 = vld [vmem:[#allocation47_spill] sm:$0xff]  ;;  %v6570_v35 = vld [vmem:[#allocation48_spill] sm:$0xff] }
 0x4c3   :  { %1139 = vmatmul.mubr.f32.vlgmr.msra.gmra.mxu0 %v1061_v37  ;;  %1210 = vmatmul.mubr.f32.vlgmr.msra.gmra.mxu1 %v1061_v37  ;;  %v6571_v37 = vld [vmem:[#allocation49_spill] sm:$0xff] }
 0x4c4   :  { %1251 = vmatpush1.msra.mxu0 %v4404_v10  ;;  %1322 = vmatpush1.msra.mxu1 %v4410_v58 }
 0x4c5   :  { %1252 = vmatprep.subr.mxu0 %v4416_v11  ;;  %1323 = vmatprep.subr.mxu1 %v4422_v12 }
 0x4c6   :  { %1253 = vmatpush1.msra.mxu0 %v4428_v13  ;;  %1324 = vmatpush1.msra.mxu1 %v4434_v14 }
 0x4c7   :  { %1254 = vmatprep.subr.mxu0 %v4440_v15  ;;  %1325 = vmatprep.subr.mxu1 %v4446_v16 }
 0x4c8   :  { %1255 = vmatpush1.msra.mxu0 %v4452_v17  ;;  %1326 = vmatpush1.msra.mxu1 %v4458_v18 }
 0x4c9   :  { %1256 = vmatprep.subr.mxu0 %v4464_v19  ;;  %1327 = vmatprep.subr.mxu1 %v4470_v20 }
 0x4ca   :  { %1257 = vmatpush1.msra.mxu0 %v4476_v21  ;;  %1328 = vmatpush1.msra.mxu1 %v4482_v22 }
 0x4cb   :  { %1258 = vmatprep.subr.mxu0 %v4488_v23  ;;  %1329 = vmatprep.subr.mxu1 %v4494_v25 }
 0x4cc   :  { %1259 = vmatpush1.msra.mxu0 %v4500_v28  ;;  %1330 = vmatpush1.msra.mxu1 %v4506_v29 }
 0x4cd   :  { %1260 = vmatprep.subr.mxu0 %v4512_v30  ;;  %1331 = vmatprep.subr.mxu1 %v4518_v32 }
 0x4ce   :  { %1261 = vmatpush1.msra.mxu0 %v4524_v34  ;;  %1332 = vmatpush1.msra.mxu1 %v4530_v36 }
 0x4cf   :  { %1262 = vmatprep.subr.mxu0 %v4536_v38  ;;  %1333 = vmatprep.subr.mxu1 %v4542_v40 }
 0x4d0   :  { %1263 = vmatpush1.msra.mxu0 %v4548_v41  ;;  %1334 = vmatpush1.msra.mxu1 %v4554_v42 }
 0x4d1   :  { %1264 = vmatprep.subr.mxu0 %v4560_v49  ;;  %1335 = vmatprep.subr.mxu1 %v4566_v44 }
 0x4d2   :  { %1265 = vmatpush1.msra.mxu0 %v4572_v53  ;;  %1336 = vmatpush1.msra.mxu1 %v4578_v56 }
 0x4d3   :  { %1266 = vmatprep.subr.mxu0 %v4584_v51  ;;  %1337 = vmatprep.subr.mxu1 %v4590_v63 }
 0x4d4   :  { %1267 = vmatpush1.msra.mxu0 %v4596_v57  ;;  %1338 = vmatpush1.msra.mxu1 %v4602_v62 }
 0x4d5   :  { %1268 = vmatprep.subr.mxu0 %v4608_v45  ;;  %1339 = vmatprep.subr.mxu1 %v4614_v60 }
 0x4d6   :  { %1269 = vmatpush1.msra.mxu0 %v4620_v61  ;;  %1340 = vmatpush1.msra.mxu1 %v4626_v52 }
 0x4d7   :  { %1270 = vmatprep.subr.mxu0 %v4632_v0  ;;  %1341 = vmatprep.subr.mxu1 %v4638_v43 }
 0x4d8   :  { %1271 = vmatpush1.msra.mxu0 %v6552_v33  ;;  %1342 = vmatpush1.msra.mxu1 %v6553_v39 }
 0x4d9   :  { %1272 = vmatprep.subr.mxu0 %v6554_v4  ;;  %1343 = vmatprep.subr.mxu1 %v6555_v46 }
 0x4da   :  { %1273 = vmatpush1.msra.mxu0 %v6556_v7  ;;  %1344 = vmatpush1.msra.mxu1 %v6557_v9 }
 0x4db   :  { %1274 = vmatprep.subr.mxu0 %v6558_v8  ;;  %1345 = vmatprep.subr.mxu1 %v6559_v24  ;;  %v6581_v8 = vld [vmem:[#allocation34_spill] sm:$0xff] }
 0x4dc   :  { %1275 = vmatpush1.msra.mxu0 %v6560_v26  ;;  %1346 = vmatpush1.msra.mxu1 %v6561_v2  ;;  %v6572_v2 = vld [vmem:[#allocation50_spill] sm:$0xff] }
 0x4dd   :  { %1276 = vmatprep.subr.mxu0 %v6562_v54  ;;  %1347 = vmatprep.subr.mxu1 %v6563_v27  ;;  %v6573_v54 = vmov 0.0   ;;  %v6574_v27 = vld [vmem:[#allocation51_spill] sm:$0xff] }
 0x4de   :  { %1277 = vmatpush1.msra.mxu0 %v6564_v59  ;;  %1348 = vmatpush1.msra.mxu1 %v6565_v1  ;;  %v6575_v1 = vld [vmem:[#allocation3_spill] sm:$0xff] }
 0x4df   :  { %1278 = vmatprep.subr.mxu0 %v6566_v6  ;;  %1349 = vmatprep.subr.mxu1 %v6567_v31  ;;  %v6576_v6 = vld [vmem:[#allocation4_spill] sm:$0xff]  ;;  %v3597_v31 = vmov 6  }
 0x4e0   :  { %1279 = vmatpush1.msra.mxu0 %v6568_v47  ;;  %1350 = vmatpush1.msra.mxu1 %v6569_v3  ;;  %v6577_v47 = vld [vmem:[#allocation52_spill] sm:$0xff]  ;;  %v1064_v3 = vpop.permute.xlu0 %1063 }
 0x4e1   :  { %1280 = vmatprep.subr.mxu0 %v6570_v35  ;;  %1351 = vmatprep.subr.mxu1 %v6571_v37  ;;  %v6578_v35 = vld [vmem:[#allocation31_spill] sm:$0xff]  ;;  %v6579_v37 = vld [vmem:[#allocation32_spill] sm:$0xff]  ;;  %v1068_v9 = vmul.f32 %v1064_v3, %v6581_v8 }
 0x4e2   :  { %1281 = vmatpush1.msra.mxu0 %v6572_v2  ;;  %1314 = vmatprep.mubr.f32.mxu0 %v6573_v54  ;;  %v1066_v59 = vmul.f32 %v1064_v3, %v6578_v35  ;;  %v1067_v26 = vmul.f32 %v1064_v3, %v6579_v37  ;;  %v6580_v2 = vld [vmem:[#allocation33_spill] sm:$0xff]  ;;  %v1069_v35 = vmul.f32 %v1064_v3, %v4143_v55 }
 0x4e3   :  { %1352 = vmatpush1.msra.mxu1 %v6574_v27  ;;  %1385 = vmatprep.mubr.f32.mxu1 %v6573_v54  ;;  %v6582_v27 = vld [vmem:[#allocation35_spill] sm:$0xff] }
 0x4e4   :  { %1426 = vmatprep.subr.mxu0 %v6575_v1  ;;  %1497 = vmatprep.subr.mxu1 %v6576_v6  ;;  %v1070_v24 = vadd.f32 %v1066_v59, %v6580_v2  ;;  %v1071_v7 = vadd.f32 %v1067_v26, %v6582_v27  ;;  %v1072_v6 = vadd.f32 %v1068_v9, %v4139_v48 }
 0x4e5   :  { %3311 = vset.pattern.permute.xlu1 %v3597_v31  ;;  %v1073_v59 = vadd.f32 %v1069_v35, %v4148_v50  ;;  %v6586_v35 = vld [vmem:[#allocation25_spill] sm:$0xff] }
 0x4e6   :  { %1239 = vperm.xlu1 %3311, %v6577_v47  }
 0x583   :  { %v1140_v54 = vpop.f32.mrf.mxu0  ;;  %v1211_v39 = vpop.f32.mrf.mxu1 }
 0x584   :  { %v1216_v46 = vadd.f32 %v1140_v54, %v1070_v24  ;;  %v1218_v33 = vadd.f32 %v1211_v39, %v1072_v6 }
 0x585   :  { %v1142_v1 = vpop.f32.mrf.mxu0  ;;  %v1213_v2 = vpop.f32.mrf.mxu1 }
 0x586   :  { %v1220_v4 = vmul.f32 0.5, %v1216_v46  ;;  %v1217_v31 = vadd.f32 %v1142_v1, %v1071_v7  ;;  %v1219_v8 = vadd.f32 %v1213_v2, %v1073_v59  ;;  %v6589_v59 = vld [vmem:[#allocation36_spill] sm:$0xff] }
 0x588   :  { %3365 = vtanh.f32 %v1220_v4  ;;  %v1224_v47 = vmul.f32 0.5, %v1217_v31  ;;  %v1229_v26 = vmul.f32 0.5, %v1219_v8  ;;  %v6588_v31 = vld [vmem:[#allocation27_spill] sm:$0xff] }
 0x58a   :  { %3367 = vtanh.f32 %v1224_v47  ;;  %v6585_v47 = vld [vmem:[#allocation24_spill] sm:$0xff] }
 0x58b   :  { %3369 = vtanh.f32 %v1218_v33 }
 0x58c   :  { %3371 = vtanh.f32 %v1229_v26  ;;  %v6590_v26 = vld [vmem:[#allocation37_spill] sm:$0xff] }
 0x595   :  { %v3366_v27 = vpop.eup %3365 }
 0x596   :  { %v1222_v24 = vmul.f32 0.5, %v3366_v27  ;;  %v6584_v27 = vld [vmem:[#allocation23_spill] sm:$0xff] }
 0x597   :  { %v3368_v54 = vpop.eup %3367 }
 0x598   :  { %v1223_v46 = vadd.f32 0.5, %v1222_v24  ;;  %v1226_v37 = vmul.f32 0.5, %v3368_v54  ;;  %v3370_v9 = vpop.eup %3369  ;;  %v6591_v24 = vld [vmem:[#allocation38_spill] sm:$0xff]  ;;  %v6592_v54 = vld [vmem:[#allocation39_spill] sm:$0xff] }
 0x599   :  { %v3372_v39 = vpop.eup %3371 }
 0x59a   :  { %v1227_v7 = vadd.f32 0.5, %v1226_v37  ;;  %v1234_v1 = vmul.f32 %v3370_v9, %v1223_v46  ;;  %v1231_v6 = vmul.f32 0.5, %v3372_v39  ;;  %v6587_v37 = vld [vmem:[#allocation26_spill] sm:$0xff]  ;;  %v6593_v46 = vld [vmem:[#allocation40_spill] sm:$0xff]  ;;  %v6598_v39 = vld [vmem:[#allocation45_spill] sm:$0xff] }
 0x59b   :  { %v6595_v9 = vld [vmem:[#allocation42_spill] sm:$0xff] }
 0x59c   :  { %v1233_v4 = vmul.f32 %v1227_v7, %v4793_v5  ;;  %v1232_v33 = vadd.f32 0.5, %v1231_v6  ;;  %v6583_v5 = vld [vmem:[#allocation22_spill] sm:$0xff]  ;;  %v6594_v7 = vld [vmem:[#allocation41_spill] sm:$0xff] }
 0x59d   :  { %v6599_v6 = vld [vmem:[#allocation46_spill] sm:$0xff] }
 0x59e   :  { %v4872_v3 = vadd.f32 %v1234_v1, %v1233_v4  ;;  %v6596_v4 = vld [vmem:[#allocation43_spill] sm:$0xff]  ;;  %v6597_v1 = vld [vmem:[#allocation44_spill] sm:$0xff] }
 0x5a0   :  { %3373 = vtanh.f32 %v4872_v3 }
 0x5ad   :  { %v3374_v2 = vpop.eup %3373 }
 0x5ae   :  { %v1237_v8 = vmul.f32 %v3374_v2, %v1232_v33  ;;  %v6600_v33 = vld [vmem:[#allocation47_spill] sm:$0xff]  ;;  %v6601_v2 = vld [vmem:[#allocation48_spill] sm:$0xff] }
 0x5b0   :  { %1315 = vmatmul.mubr.f32.vlgmr.msra.gmra.mxu0 %v1237_v8  ;;  %1386 = vmatmul.mubr.f32.vlgmr.msra.gmra.mxu1 %v1237_v8  ;;  %v6602_v8 = vld [vmem:[#allocation49_spill] sm:$0xff] }
 0x5b1   :  { %1427 = vmatpush1.msra.mxu0 %v4404_v10  ;;  %1498 = vmatpush1.msra.mxu1 %v4410_v58 }
 0x5b2   :  { %1428 = vmatprep.subr.mxu0 %v4416_v11  ;;  %1499 = vmatprep.subr.mxu1 %v4422_v12 }
 0x5b3   :  { %1429 = vmatpush1.msra.mxu0 %v4428_v13  ;;  %1500 = vmatpush1.msra.mxu1 %v4434_v14 }
 0x5b4   :  { %1430 = vmatprep.subr.mxu0 %v4440_v15  ;;  %1501 = vmatprep.subr.mxu1 %v4446_v16 }
 0x5b5   :  { %1431 = vmatpush1.msra.mxu0 %v4452_v17  ;;  %1502 = vmatpush1.msra.mxu1 %v4458_v18 }
 0x5b6   :  { %1432 = vmatprep.subr.mxu0 %v4464_v19  ;;  %1503 = vmatprep.subr.mxu1 %v4470_v20 }
 0x5b7   :  { %1433 = vmatpush1.msra.mxu0 %v4476_v21  ;;  %1504 = vmatpush1.msra.mxu1 %v4482_v22 }
 0x5b8   :  { %1434 = vmatprep.subr.mxu0 %v4488_v23  ;;  %1505 = vmatprep.subr.mxu1 %v4494_v25 }
 0x5b9   :  { %1435 = vmatpush1.msra.mxu0 %v4500_v28  ;;  %1506 = vmatpush1.msra.mxu1 %v4506_v29 }
 0x5ba   :  { %1436 = vmatprep.subr.mxu0 %v4512_v30  ;;  %1507 = vmatprep.subr.mxu1 %v4518_v32 }
 0x5bb   :  { %1437 = vmatpush1.msra.mxu0 %v4524_v34  ;;  %1508 = vmatpush1.msra.mxu1 %v4530_v36 }
 0x5bc   :  { %1438 = vmatprep.subr.mxu0 %v4536_v38  ;;  %1509 = vmatprep.subr.mxu1 %v4542_v40 }
 0x5bd   :  { %1439 = vmatpush1.msra.mxu0 %v4548_v41  ;;  %1510 = vmatpush1.msra.mxu1 %v4554_v42 }
 0x5be   :  { %1440 = vmatprep.subr.mxu0 %v4560_v49  ;;  %1511 = vmatprep.subr.mxu1 %v4566_v44 }
 0x5bf   :  { %1441 = vmatpush1.msra.mxu0 %v4572_v53  ;;  %1512 = vmatpush1.msra.mxu1 %v4578_v56  ;;  %v6613_v56 = vld [vmem:[#allocation35_spill] sm:$0xff] }
 0x5c0   :  { %1442 = vmatprep.subr.mxu0 %v4584_v51  ;;  %1513 = vmatprep.subr.mxu1 %v4590_v63 }
 0x5c1   :  { %1443 = vmatpush1.msra.mxu0 %v4596_v57  ;;  %1514 = vmatpush1.msra.mxu1 %v4602_v62 }
 0x5c2   :  { %1444 = vmatprep.subr.mxu0 %v4608_v45  ;;  %1515 = vmatprep.subr.mxu1 %v4614_v60  ;;  %v6611_v60 = vld [vmem:[#allocation33_spill] sm:$0xff] }
 0x5c3   :  { %1445 = vmatpush1.msra.mxu0 %v4620_v61  ;;  %1516 = vmatpush1.msra.mxu1 %v4626_v52 }
 0x5c4   :  { %1446 = vmatprep.subr.mxu0 %v4632_v0  ;;  %1517 = vmatprep.subr.mxu1 %v4638_v43  ;;  %v6610_v43 = vld [vmem:[#allocation32_spill] sm:$0xff] }
 0x5c5   :  { %1447 = vmatpush1.msra.mxu0 %v6583_v5  ;;  %1518 = vmatpush1.msra.mxu1 %v6584_v27 }
 0x5c6   :  { %1448 = vmatprep.subr.mxu0 %v6585_v47  ;;  %1519 = vmatprep.subr.mxu1 %v6586_v35  ;;  %v1240_v35 = vpop.permute.xlu1 %1239 }
 0x5c7   :  { %1449 = vmatpush1.msra.mxu0 %v6587_v37  ;;  %1520 = vmatpush1.msra.mxu1 %v6588_v31  ;;  %v6607_v31 = vld [vmem:[#allocation52_spill] sm:$0xff]  ;;  %v1243_v52 = vmul.f32 %v1240_v35, %v6610_v43  ;;  %v1245_v29 = vmul.f32 %v1240_v35, %v4143_v55 }
 0x5c8   :  { %1450 = vmatprep.subr.mxu0 %v6589_v59  ;;  %1521 = vmatprep.subr.mxu1 %v6590_v26  ;;  %v6604_v26 = vmov 0.0  }
 0x5c9   :  { %1451 = vmatpush1.msra.mxu0 %v6591_v24  ;;  %1522 = vmatpush1.msra.mxu1 %v6592_v54  ;;  %v6603_v54 = vld [vmem:[#allocation50_spill] sm:$0xff]  ;;  %v1247_v44 = vadd.f32 %v1243_v52, %v6613_v56 }
 0x5ca   :  { %1452 = vmatprep.subr.mxu0 %v6593_v46  ;;  %1523 = vmatprep.subr.mxu1 %v6594_v7  ;;  %v6605_v7 = vld [vmem:[#allocation51_spill] sm:$0xff] }
 0x5cb   :  { %1453 = vmatpush1.msra.mxu0 %v6595_v9  ;;  %1524 = vmatpush1.msra.mxu1 %v6596_v4  ;;  %v6606_v4 = vld [vmem:[#allocation3_spill] sm:$0xff] }
 0x5cc   :  { %1454 = vmatprep.subr.mxu0 %v6597_v1  ;;  %1525 = vmatprep.subr.mxu1 %v6598_v39  ;;  %v3598_v39 = vmov 7  }
 0x5cd   :  { %1455 = vmatpush1.msra.mxu0 %v6599_v6  ;;  %1526 = vmatpush1.msra.mxu1 %v6600_v33  ;;  %v6608_v33 = vmov 0  }
 0x5ce   :  { %1456 = vmatprep.subr.mxu0 %v6601_v2  ;;  %1527 = vmatprep.subr.mxu1 %v6602_v8  ;;  %v6609_v8 = vld [vmem:[#allocation31_spill] sm:$0xff] }
 0x5cf   :  { %1457 = vmatpush1.msra.mxu0 %v6603_v54  ;;  %1490 = vmatprep.mubr.f32.mxu0 %v6604_v26  ;;  %v1242_v27 = vmul.f32 %v1240_v35, %v6609_v8 }
 0x5d0   :  { %1528 = vmatpush1.msra.mxu1 %v6605_v7  ;;  %1561 = vmatprep.mubr.f32.mxu1 %v6604_v26  ;;  %v6612_v7 = vld [vmem:[#allocation34_spill] sm:$0xff] }
 0x5d1   :  { %3085 = vmatprep.subr.mxu0 %v6604_v26  ;;  %1684 = vmatprep.subr.mxu1 %v6606_v4  ;;  %v1246_v62 = vadd.f32 %v1242_v27, %v6611_v60  ;;  %v1244_v63 = vmul.f32 %v1240_v35, %v6612_v7  ;;  %v1249_v27 = vadd.f32 %v1245_v29, %v4148_v50 }
 0x5d2   :  { %3312 = vset.pattern.permute.xlu1 %v3598_v39 }
 0x5d3   :  { %1415 = vperm.xlu1 %3312, %v6607_v31   ;;  %v1248_v39 = vadd.f32 %v1244_v63, %v4139_v48 }
 0x5d7   :  { %3313 = vset.pattern.permute.xlu1 %v6608_v33 }
 0x670   :  { %v1316_v42 = vpop.f32.mrf.mxu0  ;;  %v1387_v32 = vpop.f32.mrf.mxu1 }
 0x671   :  { %v1392_v40 = vadd.f32 %v1316_v42, %v1246_v62  ;;  %v1394_v25 = vadd.f32 %v1387_v32, %v1248_v39 }
 0x672   :  { %v1318_v4 = vpop.f32.mrf.mxu0  ;;  %v1389_v22 = vpop.f32.mrf.mxu1 }
 0x673   :  { %v1396_v36 = vmul.f32 0.5, %v1392_v40  ;;  %v1393_v31 = vadd.f32 %v1318_v4, %v1247_v44  ;;  %v1395_v20 = vadd.f32 %v1389_v22, %v1249_v27 }
 0x675   :  { %3375 = vtanh.f32 %v1396_v36  ;;  %v1400_v33 = vmul.f32 0.5, %v1393_v31  ;;  %v1405_v52 = vmul.f32 0.5, %v1395_v20 }
 0x677   :  { %3377 = vtanh.f32 %v1400_v33 }
 0x678   :  { %3379 = vtanh.f32 %v1394_v25 }
 0x679   :  { %3381 = vtanh.f32 %v1405_v52 }
 0x682   :  { %v3376_v18 = vpop.eup %3375 }
 0x683   :  { %v1398_v42 = vmul.f32 0.5, %v3376_v18  ;;  %v5033_v18 = vld [vmem:[%s6135_s2 + $0x48] sm:$0xff] }
 0x684   :  { %v3378_v62 = vpop.eup %3377 }
 0x685   :  { %v1399_v40 = vadd.f32 0.5, %v1398_v42  ;;  %v1402_v16 = vmul.f32 0.5, %v3378_v62  ;;  %v3380_v63 = vpop.eup %3379 }
 0x686   :  { %v3382_v29 = vpop.eup %3381 }
 0x687   :  { %v1403_v44 = vadd.f32 0.5, %v1402_v16  ;;  %v1410_v4 = vmul.f32 %v3380_v63, %v1399_v40  ;;  %v1407_v32 = vmul.f32 0.5, %v3382_v29  ;;  %v5019_v16 = vld [vmem:[%s6135_s2 + $0x58] sm:$0xff] }
 0x689   :  { %v1409_v36 = vmul.f32 %v1403_v44, %v4872_v3  ;;  %v1408_v25 = vadd.f32 0.5, %v1407_v32 }
 0x68b   :  { %v4952_v35 = vadd.f32 %v1410_v4, %v1409_v36 }
 0x68d   :  { %3383 = vtanh.f32 %v4952_v35 }
 0x69a   :  { %v3384_v22 = vpop.eup %3383 }
 0x69b   :  { %v1413_v20 = vmul.f32 %v3384_v22, %v1408_v25 }
 0x69d   :  { %1491 = vmatmul.mubr.f32.vlgmr.msra.gmra.mxu0 %v1413_v20  ;;  %1562 = vmatmul.mubr.f32.vlgmr.msra.gmra.mxu1 %v1413_v20 }
 0x69e   :  { %1685 = vmatpush1.msra.mxu1 %v4404_v10  ;;  %1748 = vmatprep.mubr.f32.mxu1 %v6604_v26  ;;  %v4991_v10 = vld [vmem:[%s6135_s2 + $0x78] sm:$0xff] }
 0x69f   :  { %1686 = vmatprep.subr.mxu1 %v4416_v11  ;;  %3086 = vmatpush3.msra.mxu0 %v4991_v10  ;;  %v4998_v11 = vld [vmem:[%s6135_s2 + $0x70] sm:$0xff] }
 0x6a0   :  { %1687 = vmatpush1.msra.mxu1 %v4428_v13  ;;  %3087 = vmatprep.subr.mxu0 %v6604_v26  ;;  %v5005_v13 = vld [vmem:[%s6135_s2 + $0x68] sm:$0xff] }
 0x6a1   :  { %1688 = vmatprep.subr.mxu1 %v4440_v15  ;;  %3088 = vmatpush3.msra.mxu0 %v4998_v11  ;;  %v5012_v15 = vld [vmem:[%s6135_s2 + $0x60] sm:$0xff] }
 0x6a2   :  { %1689 = vmatpush1.msra.mxu1 %v4452_v17  ;;  %3089 = vmatprep.subr.mxu0 %v6604_v26  ;;  %v5026_v17 = vld [vmem:[%s6135_s2 + $0x50] sm:$0xff] }
 0x6a3   :  { %1690 = vmatprep.subr.mxu1 %v4464_v19  ;;  %3090 = vmatpush3.msra.mxu0 %v5005_v13  ;;  %v5040_v19 = vld [vmem:[%s6135_s2 + $0x40] sm:$0xff] }
 0x6a4   :  { %1691 = vmatpush1.msra.mxu1 %v4476_v21  ;;  %3091 = vmatprep.subr.mxu0 %v6604_v26  ;;  %v5047_v21 = vld [vmem:[%s6135_s2 + $0x38] sm:$0xff] }
 0x6a5   :  { %1692 = vmatprep.subr.mxu1 %v4488_v23  ;;  %3092 = vmatpush3.msra.mxu0 %v5012_v15  ;;  %6614 = vst [vmem:[#allocation22_spill] sm:$0xff] %v5047_v21  ;;  %v5052_v23 = vld [vmem:[%s6135_s2 + $0x30] sm:$0xff] }
 0x6a6   :  { %1693 = vmatpush1.msra.mxu1 %v4500_v28  ;;  %3093 = vmatprep.subr.mxu0 %v6604_v26  ;;  %6615 = vst [vmem:[#allocation24_spill] sm:$0xff] %v5052_v23  ;;  %v5061_v28 = vld [vmem:[%s6135_s2 + $0x28] sm:$0xff] }
 0x6a7   :  { %1694 = vmatprep.subr.mxu1 %v4512_v30  ;;  %3094 = vmatpush3.msra.mxu0 %v5019_v16  ;;  %6616 = vst [vmem:[#allocation26_spill] sm:$0xff] %v5061_v28  ;;  %v5068_v30 = vld [vmem:[%s6135_s2 + $0x20] sm:$0xff] }
 0x6a8   :  { %1695 = vmatpush1.msra.mxu1 %v4524_v34  ;;  %3095 = vmatprep.subr.mxu0 %v6604_v26  ;;  %6617 = vst [vmem:[#allocation36_spill] sm:$0xff] %v5068_v30  ;;  %v5075_v34 = vld [vmem:[%s6135_s2 + $0x18] sm:$0xff] }
 0x6a9   :  { %1696 = vmatprep.subr.mxu1 %v4536_v38  ;;  %3096 = vmatpush3.msra.mxu0 %v5026_v17  ;;  %6618 = vst [vmem:[#allocation38_spill] sm:$0xff] %v5075_v34  ;;  %v5082_v38 = vld [vmem:[%s6135_s2 + $0x10] sm:$0xff] }
 0x6aa   :  { %1697 = vmatpush1.msra.mxu1 %v4548_v41  ;;  %3097 = vmatprep.subr.mxu0 %v6604_v26  ;;  %6619 = vst [vmem:[#allocation40_spill] sm:$0xff] %v5082_v38  ;;  %v5089_v41 = vld [vmem:[%s6135_s2 + $0x8] sm:$0xff] }
 0x6ab   :  { %1698 = vmatprep.subr.mxu1 %v4560_v49  ;;  %3098 = vmatpush3.msra.mxu0 %v5033_v18  ;;  %v5096_v49 = vld [vmem:[%s6135_s2] sm:$0xff] }
 0x6ac   :  { %1699 = vmatpush1.msra.mxu1 %v4572_v53  ;;  %3099 = vmatprep.subr.mxu0 %v6604_v26  ;;  %v6620_v53 = vld [vmem:[#allocation4_spill] sm:$0xff] }
 0x6ad   :  { %1700 = vmatprep.subr.mxu1 %v4584_v51  ;;  %3100 = vmatpush3.msra.mxu0 %v5040_v19  ;;  %v1416_v51 = vpop.permute.xlu1 %1415 }
 0x6ae   :  { %1701 = vmatpush1.msra.mxu1 %v4596_v57  ;;  %3101 = vmatprep.subr.mxu0 %v6604_v26  ;;  %v1418_v57 = vmul.f32 %v1416_v51, %v6609_v8  ;;  %v1420_v39 = vmul.f32 %v1416_v51, %v6612_v7  ;;  %v1421_v36 = vmul.f32 %v1416_v51, %v4143_v55 }
 0x6af   :  { %1702 = vmatprep.subr.mxu1 %v4608_v45  ;;  %3102 = vmatpush3.msra.mxu0 %v5047_v21  ;;  %v1419_v45 = vmul.f32 %v1416_v51, %v6610_v43 }
 0x6b0   :  { %1703 = vmatpush1.msra.mxu1 %v4620_v61  ;;  %3117 = vmatprep.mubr.msk.f32.mxu0 %vm3599_vm0, %v6604_v26  ;;  %v1422_v3 = vadd.f32 %v1418_v57, %v6611_v60  ;;  %v1424_v62 = vadd.f32 %v1420_v39, %v4139_v48  ;;  %v1425_v29 = vadd.f32 %v1421_v36, %v4148_v50  ;;  %v6623_v36 = vld [vmem:[#allocation7_spill] sm:$0xff] }
 0x6b1   :  { %1704 = vmatprep.subr.mxu1 %v4632_v0  ;;  %3103 = vmatprep.subr.mxu0 %v6604_v26  ;;  %v1423_v31 = vadd.f32 %v1419_v45, %v6613_v56 }
 0x6b2   :  { %1705 = vmatpush1.msra.mxu1 %v6583_v5  ;;  %3104 = vmatpush3.msra.mxu0 %v5052_v23 }
 0x6b3   :  { %1706 = vmatprep.subr.mxu1 %v6585_v47  ;;  %3105 = vmatprep.subr.mxu0 %v6604_v26 }
 0x6b4   :  { %1707 = vmatpush1.msra.mxu1 %v6587_v37  ;;  %3106 = vmatpush3.msra.mxu0 %v5061_v28 }
 0x6b5   :  { %1708 = vmatprep.subr.mxu1 %v6589_v59  ;;  %3107 = vmatprep.subr.mxu0 %v6604_v26 }
 0x6b6   :  { %1709 = vmatpush1.msra.mxu1 %v6591_v24  ;;  %3108 = vmatpush3.msra.mxu0 %v5068_v30 }
 0x6b7   :  { %1710 = vmatprep.subr.mxu1 %v6593_v46  ;;  %3109 = vmatprep.subr.mxu0 %v6604_v26 }
 0x6b8   :  { %1711 = vmatpush1.msra.mxu1 %v6595_v9  ;;  %3110 = vmatpush3.msra.mxu0 %v5075_v34 }
 0x6b9   :  { %1712 = vmatprep.subr.mxu1 %v6597_v1  ;;  %3111 = vmatprep.subr.mxu0 %v6604_v26 }
 0x6ba   :  { %1713 = vmatpush1.msra.mxu1 %v6599_v6  ;;  %3112 = vmatpush3.msra.mxu0 %v5082_v38 }
 0x6bb   :  { %1714 = vmatprep.subr.mxu1 %v6601_v2  ;;  %3113 = vmatprep.subr.mxu0 %v6604_v26 }
 0x6bc   :  { %1715 = vmatpush1.msra.mxu1 %v6603_v54  ;;  %3114 = vmatpush3.msra.mxu0 %v5089_v41 }
 0x6bd   :  { %3120 = vmatprep.subr.mxu1 %v6604_v26  ;;  %3115 = vmatprep.subr.mxu0 %v6604_v26 }
 0x6be   :  { %3116 = vmatpush3.msra.mxu0 %v5096_v49 }
 0x6bf   :  { %1755 = vmatprep.subr.mxu0 %v6620_v53 }
 0x75d   :  { %v1492_v33 = vpop.f32.mrf.mxu0  ;;  %v1563_v44 = vpop.f32.mrf.mxu1 }
 0x75e   :  { %v1568_v27 = vadd.f32 %v1492_v33, %v1422_v3  ;;  %v1570_v4 = vadd.f32 %v1563_v44, %v1424_v62 }
 0x75f   :  { %v1494_v52 = vpop.f32.mrf.mxu0  ;;  %v1565_v32 = vpop.f32.mrf.mxu1 }
 0x760   :  { %v1572_v42 = vmul.f32 0.5, %v1568_v27  ;;  %v1569_v40 = vadd.f32 %v1494_v52, %v1423_v31  ;;  %v1571_v25 = vadd.f32 %v1565_v32, %v1425_v29  ;;  %v6628_v29 = vld [vmem:[#allocation12_spill] sm:$0xff]  ;;  %v6629_v32 = vld [vmem:[#allocation13_spill] sm:$0xff] }
 0x762   :  { %3385 = vtanh.f32 %v1572_v42  ;;  %v1576_v63 = vmul.f32 0.5, %v1569_v40  ;;  %v1581_v22 = vmul.f32 0.5, %v1571_v25  ;;  %v6630_v25 = vld [vmem:[#allocation14_spill] sm:$0xff] }
 0x764   :  { %3387 = vtanh.f32 %v1576_v63  ;;  %v6622_v63 = vld [vmem:[#allocation6_spill] sm:$0xff] }
 0x765   :  { %3389 = vtanh.f32 %v1570_v4  ;;  %v6627_v4 = vld [vmem:[#allocation11_spill] sm:$0xff] }
 0x766   :  { %3391 = vtanh.f32 %v1581_v22  ;;  %v6631_v22 = vld [vmem:[#allocation15_spill] sm:$0xff] }
 0x76f   :  { %v3386_v20 = vpop.eup %3385 }
 0x770   :  { %v1574_v53 = vmul.f32 0.5, %v3386_v20  ;;  %v6632_v20 = vld [vmem:[#allocation16_spill] sm:$0xff] }
 0x771   :  { %v3388_v57 = vpop.eup %3387 }
 0x772   :  { %v1575_v45 = vadd.f32 0.5, %v1574_v53  ;;  %v1578_v3 = vmul.f32 0.5, %v3388_v57  ;;  %v3390_v31 = vpop.eup %3389  ;;  %v6633_v53 = vld [vmem:[#allocation17_spill] sm:$0xff]  ;;  %v6634_v57 = vld [vmem:[#allocation18_spill] sm:$0xff] }
 0x773   :  { %v3392_v52 = vpop.eup %3391 }
 0x774   :  { %v1579_v39 = vadd.f32 0.5, %v1578_v3  ;;  %v1586_v27 = vmul.f32 %v3390_v31, %v1575_v45  ;;  %v1583_v42 = vmul.f32 0.5, %v3392_v52  ;;  %v6635_v45 = vld [vmem:[#allocation19_spill] sm:$0xff]  ;;  %v6636_v3 = vld [vmem:[#allocation20_spill] sm:$0xff]  ;;  %v6641_v52 = vld [vmem:[#allocation37_spill] sm:$0xff] }
 0x775   :  { %v6638_v31 = vld [vmem:[#allocation23_spill] sm:$0xff] }
 0x776   :  { %v1585_v33 = vmul.f32 %v1579_v39, %v4952_v35  ;;  %v1584_v62 = vadd.f32 0.5, %v1583_v42  ;;  %v6621_v35 = vld [vmem:[#allocation5_spill] sm:$0xff]  ;;  %v6642_v42 = vld [vmem:[#allocation39_spill] sm:$0xff] }
 0x777   :  { %v6637_v39 = vld [vmem:[#allocation21_spill] sm:$0xff] }
 0x778   :  { %v5111_v51 = vadd.f32 %v1586_v27, %v1585_v33  ;;  %v6639_v33 = vld [vmem:[#allocation25_spill] sm:$0xff]  ;;  %v6640_v27 = vld [vmem:[#allocation27_spill] sm:$0xff] }
 0x77a   :  { %3393 = vtanh.f32 %v5111_v51 }
 0x787   :  { %v3394_v40 = vpop.eup %3393 }
 0x788   :  { %v5114_v44 = vmul.f32 %v3394_v40, %v1584_v62  ;;  %v6643_v62 = vld [vmem:[#allocation41_spill] sm:$0xff]  ;;  %v6644_v40 = vld [vmem:[#allocation43_spill] sm:$0xff] }
 0x78a   :  { %3118 = vmatmul.mubr.f32.vlgmr.msra.gmra.mxu0 %v5114_v44  ;;  %1749 = vmatmul.mubr.f32.vlgmr.msra.gmra.mxu1 %v5114_v44 }
 0x78b   :  { %1756 = vmatpush1.msra.mxu0 %v4410_v58  ;;  %1819 = vmatprep.mubr.f32.mxu0 %v6604_v26  ;;  %v6624_v58 = vld [vmem:[#allocation8_spill] sm:$0xff] }
 0x78c   :  { %1757 = vmatprep.subr.mxu0 %v4422_v12  ;;  %3121 = vmatpush3.msra.mxu1 %v4991_v10  ;;  %v6625_v12 = vld [vmem:[#allocation9_spill] sm:$0xff] }
 0x78d   :  { %1758 = vmatpush1.msra.mxu0 %v4434_v14  ;;  %3122 = vmatprep.subr.mxu1 %v6604_v26  ;;  %v6626_v14 = vld [vmem:[#allocation10_spill] sm:$0xff] }
 0x78e   :  { %1759 = vmatprep.subr.mxu0 %v6621_v35  ;;  %3123 = vmatpush3.msra.mxu1 %v4998_v11  ;;  %v6645_v35 = vld [vmem:[#allocation45_spill] sm:$0xff] }
 0x78f   :  { %1760 = vmatpush1.msra.mxu0 %v6622_v63  ;;  %3124 = vmatprep.subr.mxu1 %v6604_v26  ;;  %v6646_v63 = vld [vmem:[#allocation47_spill] sm:$0xff] }
 0x790   :  { %1761 = vmatprep.subr.mxu0 %v6623_v36  ;;  %3125 = vmatpush3.msra.mxu1 %v5005_v13  ;;  %v6647_v36 = vld [vmem:[#allocation49_spill] sm:$0xff] }
 0x791   :  { %1762 = vmatpush1.msra.mxu0 %v6624_v58  ;;  %3126 = vmatprep.subr.mxu1 %v6604_v26  ;;  %v6648_v58 = vld [vmem:[#allocation51_spill] sm:$0xff] }
 0x792   :  { %1763 = vmatprep.subr.mxu0 %v6625_v12  ;;  %3127 = vmatpush3.msra.mxu1 %v5012_v15  ;;  %v5184_v12 = vld [vmem:[%s6132_s1 + $0x1e8] sm:$0xff] }
 0x793   :  { %1764 = vmatpush1.msra.mxu0 %v6626_v14  ;;  %3128 = vmatprep.subr.mxu1 %v6604_v26  ;;  %v5190_v14 = vld [vmem:[%s6132_s1 + $0x1e0] sm:$0xff] }
 0x794   :  { %1765 = vmatprep.subr.mxu0 %v6627_v4  ;;  %3129 = vmatpush3.msra.mxu1 %v5019_v16  ;;  %v5205_v4 = vld [vmem:[%s6132_s1 + $0x1c0] sm:$0xff] }
 0x795   :  { %1766 = vmatpush1.msra.mxu0 %v6628_v29  ;;  %3130 = vmatprep.subr.mxu1 %v6604_v26  ;;  %v5212_v29 = vld [vmem:[%s6132_s1 + $0x1a8] sm:$0xff] }
 0x796   :  { %1767 = vmatprep.subr.mxu0 %v6629_v32  ;;  %3131 = vmatpush3.msra.mxu1 %v5026_v17  ;;  %6649 = vst [vmem:[#allocation42_spill] sm:$0xff] %v5212_v29  ;;  %v5218_v32 = vld [vmem:[%s6132_s1 + $0x1f8] sm:$0xff] }
 0x797   :  { %1768 = vmatpush1.msra.mxu0 %v6630_v25  ;;  %3132 = vmatprep.subr.mxu1 %v6604_v26  ;;  %6650 = vst [vmem:[#allocation44_spill] sm:$0xff] %v5218_v32  ;;  %v5224_v25 = vld [vmem:[%s6132_s1 + $0x1a0] sm:$0xff] }
 0x798   :  { %1769 = vmatprep.subr.mxu0 %v6631_v22  ;;  %3133 = vmatpush3.msra.mxu1 %v5033_v18  ;;  %6651 = vst [vmem:[#allocation46_spill] sm:$0xff] %v5224_v25  ;;  %v5230_v22 = vld [vmem:[%s6132_s1 + $0x188] sm:$0xff] }
 0x799   :  { %1770 = vmatpush1.msra.mxu0 %v6632_v20  ;;  %3134 = vmatprep.subr.mxu1 %v6604_v26  ;;  %6652 = vst [vmem:[#allocation48_spill] sm:$0xff] %v5230_v22  ;;  %v5236_v20 = vld [vmem:[%s6132_s1 + $0x180] sm:$0xff] }
 0x79a   :  { %1771 = vmatprep.subr.mxu0 %v6633_v53  ;;  %3135 = vmatpush3.msra.mxu1 %v5040_v19  ;;  %6653 = vst [vmem:[#allocation50_spill] sm:$0xff] %v5236_v20  ;;  %v5242_v53 = vld [vmem:[%s6132_s1 + $0x168] sm:$0xff] }
 0x79b   :  { %1772 = vmatpush1.msra.mxu0 %v6634_v57  ;;  %3136 = vmatprep.subr.mxu1 %v6604_v26  ;;  %6654 = vst [vmem:[#allocation3_spill] sm:$0xff] %v5242_v53  ;;  %v5248_v57 = vld [vmem:[%s6132_s1 + $0x160] sm:$0xff] }
 0x79c   :  { %1773 = vmatprep.subr.mxu0 %v6635_v45  ;;  %3137 = vmatpush3.msra.mxu1 %v5047_v21  ;;  %6655 = vst [vmem:[#allocation52_spill] sm:$0xff] %v5248_v57  ;;  %v5254_v45 = vld [vmem:[%s6132_s1 + $0x148] sm:$0xff] }
 0x79d   :  { %1774 = vmatpush1.msra.mxu0 %v6636_v3  ;;  %3138 = vmatprep.subr.mxu1 %v6604_v26  ;;  %6656 = vst [vmem:[#allocation4_spill] sm:$0xff] %v5254_v45  ;;  %v5260_v3 = vld [vmem:[%s6132_s1 + $0x140] sm:$0xff] }
 0x79e   :  { %1775 = vmatprep.subr.mxu0 %v6637_v39  ;;  %3139 = vmatpush3.msra.mxu1 %v5052_v23  ;;  %6657 = vst [vmem:[#allocation5_spill] sm:$0xff] %v5260_v3  ;;  %v5266_v39 = vld [vmem:[%s6132_s1 + $0x128] sm:$0xff] }
 0x79f   :  { %1776 = vmatpush1.msra.mxu0 %v6638_v31  ;;  %3140 = vmatprep.subr.mxu1 %v6604_v26  ;;  %6658 = vst [vmem:[#allocation6_spill] sm:$0xff] %v5266_v39  ;;  %v5272_v31 = vld [vmem:[%s6132_s1 + $0x120] sm:$0xff] }
 0x7a0   :  { %1777 = vmatprep.subr.mxu0 %v6639_v33  ;;  %3141 = vmatpush3.msra.mxu1 %v5061_v28  ;;  %6659 = vst [vmem:[#allocation7_spill] sm:$0xff] %v5272_v31  ;;  %v5278_v33 = vld [vmem:[%s6132_s1 + $0x108] sm:$0xff] }
 0x7a1   :  { %1778 = vmatpush1.msra.mxu0 %v6640_v27  ;;  %3142 = vmatprep.subr.mxu1 %v6604_v26  ;;  %6660 = vst [vmem:[#allocation8_spill] sm:$0xff] %v5278_v33  ;;  %v5284_v27 = vld [vmem:[%s6132_s1 + $0x100] sm:$0xff] }
 0x7a2   :  { %1779 = vmatprep.subr.mxu0 %v6641_v52  ;;  %3143 = vmatpush3.msra.mxu1 %v5068_v30  ;;  %6661 = vst [vmem:[#allocation9_spill] sm:$0xff] %v5284_v27  ;;  %v5290_v52 = vld [vmem:[%s6132_s1 + $0xe8] sm:$0xff] }
 0x7a3   :  { %1780 = vmatpush1.msra.mxu0 %v6642_v42  ;;  %3144 = vmatprep.subr.mxu1 %v6604_v26  ;;  %6662 = vst [vmem:[#allocation10_spill] sm:$0xff] %v5290_v52  ;;  %v5296_v42 = vld [vmem:[%s6132_s1 + $0xe0] sm:$0xff] }
 0x7a4   :  { %1781 = vmatprep.subr.mxu0 %v6643_v62  ;;  %3145 = vmatpush3.msra.mxu1 %v5075_v34  ;;  %6663 = vst [vmem:[#allocation11_spill] sm:$0xff] %v5296_v42  ;;  %v5302_v62 = vld [vmem:[%s6132_s1 + $0xc8] sm:$0xff] }
 0x7a5   :  { %1782 = vmatpush1.msra.mxu0 %v6644_v40  ;;  %3146 = vmatprep.subr.mxu1 %v6604_v26  ;;  %6664 = vst [vmem:[#allocation12_spill] sm:$0xff] %v5302_v62 }
 0x7a6   :  { %1783 = vmatprep.subr.mxu0 %v6645_v35  ;;  %3147 = vmatpush3.msra.mxu1 %v5082_v38 }
 0x7a7   :  { %1784 = vmatpush1.msra.mxu0 %v6646_v63  ;;  %3148 = vmatprep.subr.mxu1 %v6604_v26 }
 0x7a8   :  { %1785 = vmatprep.subr.mxu0 %v6647_v36  ;;  %3149 = vmatpush3.msra.mxu1 %v5089_v41 }
 0x7a9   :  { %1786 = vmatpush1.msra.mxu0 %v6648_v58  ;;  %3150 = vmatprep.subr.mxu1 %v6604_v26 }
 0x7aa   :  { %1820 = vmatmul.mubr.f32.vlgmr.msra.gmra.mxu0 %v5114_v44  ;;  %1932 = vmatprep.subr.mxu0 %v5184_v12  ;;  %v5197_v44 = vld [vmem:[%s6132_s1 + $0x1c8] sm:$0xff] }
 0x7ab   :  { %1933 = vmatpush1.msra.mxu0 %v5190_v14  ;;  %3151 = vmatpush3.msra.mxu1 %v5096_v49 }
 0x7ac   :  { %1934 = vmatprep.subr.mxu0 %v5197_v44  ;;  %3152 = vmatprep.mubr.msk.f32.mxu1 %vm3599_vm0, %v6604_v26 }
 0x7ad   :  { %1935 = vmatpush1.msra.mxu0 %v5205_v4  ;;  %1996 = vmatprep.mubr.f32.mxu0 %v6604_v26 }
 0x7ae   :  { %1936 = vmatprep.subr.mxu0 %v5212_v29  ;;  %2003 = vmatprep.subr.mxu1 %v5218_v32 }
 0x7af   :  { %1937 = vmatpush1.msra.mxu0 %v5224_v25 }
 0x7b0   :  { %1938 = vmatprep.subr.mxu0 %v5230_v22 }
 0x7b1   :  { %1939 = vmatpush1.msra.mxu0 %v5236_v20 }
 0x7b2   :  { %1940 = vmatprep.subr.mxu0 %v5242_v53 }
 0x7b3   :  { %1941 = vmatpush1.msra.mxu0 %v5248_v57 }
 0x7b4   :  { %1942 = vmatprep.subr.mxu0 %v5254_v45 }
 0x7b5   :  { %1943 = vmatpush1.msra.mxu0 %v5260_v3 }
 0x7b6   :  { %1944 = vmatprep.subr.mxu0 %v5266_v39 }
 0x7b7   :  { %1945 = vmatpush1.msra.mxu0 %v5272_v31 }
 0x7b8   :  { %1946 = vmatprep.subr.mxu0 %v5278_v33 }
 0x7b9   :  { %1947 = vmatpush1.msra.mxu0 %v5284_v27 }
 0x7ba   :  { %1948 = vmatprep.subr.mxu0 %v5290_v52 }
 0x7bb   :  { %1949 = vmatpush1.msra.mxu0 %v5296_v42 }
 0x7bc   :  { %1950 = vmatprep.subr.mxu0 %v5302_v62 }
 0x7bd   :  { %1951 = vmatpush1.msra.mxu0 %v4620_v61  ;;  %v105_v61 = vld [vmem:[%s6136_s4] sm:$0x3] }
 0x7be   :  { %1952 = vmatprep.subr.mxu0 %v4632_v0  ;;  %v6665_v0 = vld [vmem:[#allocation29_spill] sm:$0xff] }
 0x7bf   :  { %1953 = vmatpush1.msra.mxu0 %v6583_v5  ;;  %v5323_v5 = vrot.slane %v105_v61, %v6665_v0 }
 0x7c0   :  { %1954 = vmatprep.subr.mxu0 %v6585_v47 }
 0x7c1   :  { %1955 = vmatpush1.msra.mxu0 %v6587_v37  ;;  %6666 = vst [vmem:[#allocation13_spill] sm:$0xff] %v5323_v5 }
 0x7c2   :  { %1956 = vmatprep.subr.mxu0 %v6589_v59  ;;  %v6667_v59 = vld [vmem:[#allocation30_spill] sm:$0xff] }
 0x7c3   :  { %1957 = vmatpush1.msra.mxu0 %v6591_v24  ;;  %v5327_v24 = vrot.slane %v105_v61, %v6667_v59 }
 0x7c4   :  { %1958 = vmatprep.subr.mxu0 %v6593_v46 }
 0x7c5   :  { %1959 = vmatpush1.msra.mxu0 %v6595_v9  ;;  %6668 = vst [vmem:[#allocation14_spill] sm:$0xff] %v5327_v24 }
 0x7c6   :  { %1960 = vmatprep.subr.mxu0 %v6597_v1 }
 0x7c7   :  { %1961 = vmatpush1.msra.mxu0 %v6599_v6  ;;  %v5334_v6 = vstv %s6137_s5 }
 0x7c8   :  { %1962 = vmatprep.subr.mxu0 %v6601_v2  ;;  %6669 = vst [vmem:[#allocation15_spill] sm:$0xff] %v5334_v6 }
 0x7c9   :  { %1963 = vmatpush1.msra.mxu0 %v6603_v54 }
 0x7ca   :  { %3155 = vmatprep.subr.mxu0 %v6604_v26 }
 0x84a   :  { %v1660_v47 = vpop.f32.mrf.mxu0  ;;  %v1750_v35 = vpop.f32.mrf.mxu1 }
 0x84b   :  { %v1661_v37 = vadd.f32 %v1660_v47, %v5323_v5 }
 0x84c   :  { %v3119_v46 = vpop.f32.mrf.mxu0  ;;  %v1752_v47 = vpop.f32.mrf.mxu1 }
 0x84d   :  { %v1664_v9 = vmax.f32 %v1661_v37, 0.0 }
 0x84f   :  { %v1669_v54 = vmul.f32 %v5327_v24, %v1664_v9 }
 0x851   :  { %v1671_v1 = vsel %vm1670_vm1, %v1669_v54, 0.0 }
 0x852   :  { %1672 = vadd.xlane.f32.xlu0 %v1671_v1 }
 0x86a   :  { %v1821_v1 = vpop.f32.mrf.mxu0 }
 0x8db   :  { %v1673_v2 = vpop.xlane.xlu0 %1672 }
 0x8dc   :  { %v5337_v40 = vadd.f32 %v5334_v6, %v1673_v2 }
 0x8de   :  { %6670 = vst [vmem:[#allocation16_spill] sm:$0xff] %v5337_v40  ;;  %v1676_v63 = vmul.f32 %v5337_v40, %v6609_v8  ;;  %v1677_v36 = vmul.f32 %v5337_v40, %v6610_v43  ;;  %v1678_v58 = vmul.f32 %v5337_v40, %v6612_v7  ;;  %v1679_v2 = vmul.f32 %v5337_v40, %v4143_v55  ;;  %v5488_v40 = vld [vmem:[%s6132_s1 + $0xd0] sm:$0xff] }
 0x8df   :  { %6672 = vst [vmem:[#allocation18_spill] sm:$0xff] %v5488_v40 }
 0x8e0   :  { %v1680_v61 = vadd.f32 %v1676_v63, %v6611_v60  ;;  %v1681_v0 = vadd.f32 %v1677_v36, %v6613_v56  ;;  %v1682_v37 = vadd.f32 %v1678_v58, %v4139_v48  ;;  %v1683_v7 = vadd.f32 %v1679_v2, %v4148_v50  ;;  %v1823_v63 = vpop.f32.mrf.mxu0  ;;  %v5390_v2 = vld [vmem:[%s6132_s1 + $0x1b0] sm:$0xff] }
 0x8e2   :  { %v1826_v59 = vadd.f32 %v1750_v35, %v1680_v61  ;;  %v1827_v46 = vadd.f32 %v1752_v47, %v1681_v0  ;;  %v1828_v8 = vadd.f32 %v1821_v1, %v1682_v37  ;;  %v1829_v60 = vadd.f32 %v1823_v63, %v1683_v7  ;;  %v5383_v1 = vld [vmem:[%s6132_s1 + $0x1b8] sm:$0xff] }
 0x8e3   :  { %v5397_v63 = vld [vmem:[%s6132_s1 + $0x198] sm:$0xff] }
 0x8e4   :  { %v1830_v9 = vmul.f32 0.5, %v1826_v59  ;;  %v1834_v54 = vmul.f32 0.5, %v1827_v46  ;;  %v1839_v36 = vmul.f32 0.5, %v1829_v60 }
 0x8e6   :  { %3395 = vtanh.f32 %v1830_v9 }
 0x8e7   :  { %3397 = vtanh.f32 %v1834_v54 }
 0x8e8   :  { %3399 = vtanh.f32 %v1828_v8 }
 0x8e9   :  { %3401 = vtanh.f32 %v1839_v36  ;;  %v5404_v36 = vld [vmem:[%s6132_s1 + $0x190] sm:$0xff] }
 0x8f3   :  { %v3396_v56 = vpop.eup %3395 }
 0x8f4   :  { %v3398_v43 = vpop.eup %3397  ;;  %v1832_v58 = vmul.f32 0.5, %v3396_v56  ;;  %v5362_v56 = vld [vmem:[%s6132_s1 + $0x1f0] sm:$0xff] }
 0x8f5   :  { %v1836_v35 = vmul.f32 0.5, %v3398_v43  ;;  %v3400_v0 = vpop.eup %3399  ;;  %v5369_v43 = vld [vmem:[%s6132_s1 + $0x1d8] sm:$0xff] }
 0x8f6   :  { %v1833_v61 = vadd.f32 0.5, %v1832_v58  ;;  %v3402_v9 = vpop.eup %3401  ;;  %v5411_v58 = vld [vmem:[%s6132_s1 + $0x178] sm:$0xff] }
 0x8f7   :  { %v1837_v47 = vadd.f32 0.5, %v1836_v35  ;;  %v1841_v8 = vmul.f32 0.5, %v3402_v9  ;;  %v5418_v35 = vld [vmem:[%s6132_s1 + $0x170] sm:$0xff] }
 0x8f8   :  { %v1844_v59 = vmul.f32 %v3400_v0, %v1833_v61  ;;  %v5425_v61 = vld [vmem:[%s6132_s1 + $0x158] sm:$0xff]  ;;  %v5432_v0 = vld [vmem:[%s6132_s1 + $0x150] sm:$0xff] }
 0x8f9   :  { %v1843_v46 = vmul.f32 %v1837_v47, %v5111_v51  ;;  %v1842_v54 = vadd.f32 0.5, %v1841_v8  ;;  %v5376_v51 = vld [vmem:[%s6132_s1 + $0x1d0] sm:$0xff]  ;;  %v5439_v47 = vld [vmem:[%s6132_s1 + $0x138] sm:$0xff] }
 0x8fa   :  { %v5460_v9 = vld [vmem:[%s6132_s1 + $0x110] sm:$0xff]  ;;  %v5467_v8 = vld [vmem:[%s6132_s1 + $0xf8] sm:$0xff] }
 0x8fb   :  { %v5352_v37 = vadd.f32 %v1844_v59, %v1843_v46  ;;  %v5446_v59 = vld [vmem:[%s6132_s1 + $0x130] sm:$0xff]  ;;  %v5453_v46 = vld [vmem:[%s6132_s1 + $0x118] sm:$0xff] }
 0x8fd   :  { %3403 = vtanh.f32 %v5352_v37 }
 0x90a   :  { %v3404_v7 = vpop.eup %3403 }
 0x90b   :  { %v5355_v60 = vmul.f32 %v3404_v7, %v1842_v54  ;;  %v5474_v54 = vld [vmem:[%s6132_s1 + $0xf0] sm:$0xff]  ;;  %v5481_v7 = vld [vmem:[%s6132_s1 + $0xd8] sm:$0xff] }
 0x90c   :  { %6671 = vst [vmem:[#allocation17_spill] sm:$0xff] %v5474_v54 }
 0x90d   :  { %3153 = vmatmul.mubr.f32.vlgmr.msra.gmra.mxu1 %v5355_v60  ;;  %1997 = vmatmul.mubr.f32.vlgmr.msra.gmra.mxu0 %v5355_v60 }
 0x90e   :  { %2004 = vmatpush1.msra.mxu1 %v5362_v56  ;;  %2067 = vmatprep.mubr.f32.mxu1 %v6604_v26 }
 0x90f   :  { %2005 = vmatprep.subr.mxu1 %v5369_v43  ;;  %3156 = vmatpush3.msra.mxu0 %v4991_v10 }
 0x910   :  { %2006 = vmatpush1.msra.mxu1 %v5376_v51  ;;  %3157 = vmatprep.subr.mxu0 %v6604_v26 }
 0x911   :  { %2007 = vmatprep.subr.mxu1 %v5383_v1  ;;  %3158 = vmatpush3.msra.mxu0 %v4998_v11 }
 0x912   :  { %2008 = vmatpush1.msra.mxu1 %v5390_v2  ;;  %3159 = vmatprep.subr.mxu0 %v6604_v26 }
 0x913   :  { %2009 = vmatprep.subr.mxu1 %v5397_v63  ;;  %3160 = vmatpush3.msra.mxu0 %v5005_v13 }
 0x914   :  { %2010 = vmatpush1.msra.mxu1 %v5404_v36  ;;  %3161 = vmatprep.subr.mxu0 %v6604_v26 }
 0x915   :  { %2011 = vmatprep.subr.mxu1 %v5411_v58  ;;  %3162 = vmatpush3.msra.mxu0 %v5012_v15 }
 0x916   :  { %2012 = vmatpush1.msra.mxu1 %v5418_v35  ;;  %3163 = vmatprep.subr.mxu0 %v6604_v26 }
 0x917   :  { %2013 = vmatprep.subr.mxu1 %v5425_v61  ;;  %3164 = vmatpush3.msra.mxu0 %v5019_v16 }
 0x918   :  { %2014 = vmatpush1.msra.mxu1 %v5432_v0  ;;  %3165 = vmatprep.subr.mxu0 %v6604_v26 }
 0x919   :  { %2015 = vmatprep.subr.mxu1 %v5439_v47  ;;  %3166 = vmatpush3.msra.mxu0 %v5026_v17 }
 0x91a   :  { %2016 = vmatpush1.msra.mxu1 %v5446_v59  ;;  %3167 = vmatprep.subr.mxu0 %v6604_v26 }
 0x91b   :  { %2017 = vmatprep.subr.mxu1 %v5453_v46  ;;  %3168 = vmatpush3.msra.mxu0 %v5033_v18 }
 0x91c   :  { %2018 = vmatpush1.msra.mxu1 %v5460_v9  ;;  %3169 = vmatprep.subr.mxu0 %v6604_v26 }
 0x91d   :  { %2019 = vmatprep.subr.mxu1 %v5467_v8  ;;  %3170 = vmatpush3.msra.mxu0 %v5040_v19 }
 0x91e   :  { %2020 = vmatpush1.msra.mxu1 %v5474_v54  ;;  %3171 = vmatprep.subr.mxu0 %v6604_v26  ;;  %v5495_v54 = vld [vmem:[%s6132_s1 + $0xb8] sm:$0xff] }
 0x91f   :  { %2021 = vmatprep.subr.mxu1 %v5481_v7  ;;  %3172 = vmatpush3.msra.mxu0 %v5047_v21  ;;  %v5502_v21 = vld [vmem:[%s6132_s1 + $0xb0] sm:$0xff] }
 0x920   :  { %2022 = vmatpush1.msra.mxu1 %v5488_v40  ;;  %3173 = vmatprep.subr.mxu0 %v6604_v26  ;;  %6673 = vst [vmem:[#allocation19_spill] sm:$0xff] %v5502_v21  ;;  %v5509_v40 = vld [vmem:[%s6132_s1 + $0x98] sm:$0xff] }
 0x921   :  { %2023 = vmatprep.subr.mxu1 %v5495_v54  ;;  %3174 = vmatpush3.msra.mxu0 %v5052_v23  ;;  %v5516_v23 = vld [vmem:[%s6132_s1 + $0x90] sm:$0xff] }
 0x922   :  { %2024 = vmatpush1.msra.mxu1 %v5502_v21  ;;  %3175 = vmatprep.subr.mxu0 %v6604_v26  ;;  %6674 = vst [vmem:[#allocation20_spill] sm:$0xff] %v5516_v23  ;;  %v5523_v21 = vld [vmem:[%s6132_s1 + $0x78] sm:$0xff] }
 0x923   :  { %2025 = vmatprep.subr.mxu1 %v5509_v40  ;;  %3176 = vmatpush3.msra.mxu0 %v5061_v28  ;;  %v5530_v28 = vld [vmem:[%s6132_s1 + $0x70] sm:$0xff] }
 0x924   :  { %2026 = vmatpush1.msra.mxu1 %v5516_v23  ;;  %3177 = vmatprep.subr.mxu0 %v6604_v26  ;;  %6675 = vst [vmem:[#allocation21_spill] sm:$0xff] %v5530_v28  ;;  %v5537_v23 = vld [vmem:[%s6132_s1 + $0x58] sm:$0xff] }
 0x925   :  { %2027 = vmatprep.subr.mxu1 %v5523_v21  ;;  %3178 = vmatpush3.msra.mxu0 %v5068_v30  ;;  %v5544_v30 = vld [vmem:[%s6132_s1 + $0x50] sm:$0xff] }
 0x926   :  { %2028 = vmatpush1.msra.mxu1 %v5530_v28  ;;  %3179 = vmatprep.subr.mxu0 %v6604_v26  ;;  %6676 = vst [vmem:[#allocation23_spill] sm:$0xff] %v5544_v30  ;;  %v5551_v28 = vld [vmem:[%s6132_s1 + $0x38] sm:$0xff] }
 0x927   :  { %2029 = vmatprep.subr.mxu1 %v5537_v23  ;;  %3180 = vmatpush3.msra.mxu0 %v5075_v34  ;;  %6677 = vst [vmem:[#allocation25_spill] sm:$0xff] %v5551_v28  ;;  %v5558_v34 = vld [vmem:[%s6132_s1 + $0x30] sm:$0xff] }
 0x928   :  { %2030 = vmatpush1.msra.mxu1 %v5544_v30  ;;  %3181 = vmatprep.subr.mxu0 %v6604_v26  ;;  %6678 = vst [vmem:[#allocation27_spill] sm:$0xff] %v5558_v34  ;;  %v5565_v30 = vld [vmem:[%s6132_s1 + $0x18] sm:$0xff] }
 0x929   :  { %2031 = vmatprep.subr.mxu1 %v5551_v28  ;;  %3182 = vmatpush3.msra.mxu0 %v5082_v38  ;;  %6679 = vst [vmem:[#allocation37_spill] sm:$0xff] %v5565_v30  ;;  %v5572_v38 = vld [vmem:[%s6132_s1 + $0x10] sm:$0xff] }
 0x92a   :  { %2032 = vmatpush1.msra.mxu1 %v5558_v34  ;;  %3183 = vmatprep.subr.mxu0 %v6604_v26  ;;  %6680 = vst [vmem:[#allocation39_spill] sm:$0xff] %v5572_v38 }
 0x92b   :  { %2033 = vmatprep.subr.mxu1 %v5565_v30  ;;  %3184 = vmatpush3.msra.mxu0 %v5089_v41 }
 0x92c   :  { %2034 = vmatpush1.msra.mxu1 %v5572_v38  ;;  %3185 = vmatprep.subr.mxu0 %v6604_v26 }
 0x92d   :  { %2068 = vmatmul.mubr.f32.vlgmr.msra.gmra.mxu1 %v5355_v60  ;;  %2180 = vmatprep.subr.mxu1 %v5184_v12  ;;  %v5604_v60 = vld [vmem:[%s6132_s1 + $0xc0] sm:$0xff] }
 0x92e   :  { %2181 = vmatpush1.msra.mxu1 %v5190_v14  ;;  %3186 = vmatpush3.msra.mxu0 %v5096_v49  ;;  %6681 = vst [vmem:[#allocation41_spill] sm:$0xff] %v5604_v60 }
 0x92f   :  { %2182 = vmatprep.subr.mxu1 %v5197_v44  ;;  %3187 = vmatprep.mubr.msk.f32.mxu0 %vm3599_vm0, %v6604_v26 }
 0x930   :  { %2183 = vmatpush1.msra.mxu1 %v5205_v4  ;;  %2244 = vmatprep.mubr.f32.mxu1 %v6604_v26 }
 0x931   :  { %2184 = vmatprep.subr.mxu1 %v5212_v29  ;;  %2251 = vmatprep.subr.mxu0 %v5218_v32 }
 0x932   :  { %2185 = vmatpush1.msra.mxu1 %v5224_v25 }
 0x933   :  { %2186 = vmatprep.subr.mxu1 %v5230_v22  ;;  %v6697_v22 = vld [vmem:[#allocation34_spill] sm:$0xff] }
 0x934   :  { %2187 = vmatpush1.msra.mxu1 %v5236_v20 }
 0x935   :  { %2188 = vmatprep.subr.mxu1 %v5242_v53  ;;  %v6696_v53 = vld [vmem:[#allocation32_spill] sm:$0xff] }
 0x936   :  { %2189 = vmatpush1.msra.mxu1 %v5248_v57  ;;  %v6695_v57 = vld [vmem:[#allocation31_spill] sm:$0xff] }
 0x937   :  { %2190 = vmatprep.subr.mxu1 %v5254_v45 }
 0x938   :  { %2191 = vmatpush1.msra.mxu1 %v5260_v3 }
 0x939   :  { %2192 = vmatprep.subr.mxu1 %v5266_v39 }
 0x93a   :  { %2193 = vmatpush1.msra.mxu1 %v5272_v31  ;;  %v5610_v31 = vld [vmem:[%s6132_s1 + $0xa8] sm:$0xff] }
 0x93b   :  { %2194 = vmatprep.subr.mxu1 %v5278_v33  ;;  %6682 = vst [vmem:[#allocation43_spill] sm:$0xff] %v5610_v31 }
 0x93c   :  { %2195 = vmatpush1.msra.mxu1 %v5284_v27 }
 0x93d   :  { %2196 = vmatprep.subr.mxu1 %v5290_v52 }
 0x93e   :  { %2197 = vmatpush1.msra.mxu1 %v5296_v42  ;;  %v5616_v42 = vld [vmem:[%s6132_s1 + $0xa0] sm:$0xff] }
 0x93f   :  { %2198 = vmatprep.subr.mxu1 %v5302_v62  ;;  %6683 = vst [vmem:[#allocation45_spill] sm:$0xff] %v5616_v42  ;;  %v5622_v62 = vld [vmem:[%s6132_s1 + $0x88] sm:$0xff] }
 0x940   :  { %2199 = vmatpush1.msra.mxu1 %v5604_v60  ;;  %6684 = vst [vmem:[#allocation47_spill] sm:$0xff] %v5622_v62  ;;  %v5628_v60 = vld [vmem:[%s6132_s1 + $0x80] sm:$0xff] }
 0x941   :  { %2200 = vmatprep.subr.mxu1 %v5610_v31  ;;  %6685 = vst [vmem:[#allocation49_spill] sm:$0xff] %v5628_v60  ;;  %v5634_v31 = vld [vmem:[%s6132_s1 + $0x68] sm:$0xff] }
 0x942   :  { %2201 = vmatpush1.msra.mxu1 %v5616_v42  ;;  %6686 = vst [vmem:[#allocation51_spill] sm:$0xff] %v5634_v31  ;;  %v5640_v42 = vld [vmem:[%s6132_s1 + $0x60] sm:$0xff] }
 0x943   :  { %2202 = vmatprep.subr.mxu1 %v5622_v62  ;;  %6687 = vst [vmem:[#allocation29_spill] sm:$0xff] %v5640_v42  ;;  %v5646_v62 = vld [vmem:[%s6132_s1 + $0x48] sm:$0xff] }
 0x944   :  { %2203 = vmatpush1.msra.mxu1 %v5628_v60  ;;  %6688 = vst [vmem:[#allocation30_spill] sm:$0xff] %v5646_v62  ;;  %v5652_v60 = vld [vmem:[%s6132_s1 + $0x40] sm:$0xff] }
 0x945   :  { %2204 = vmatprep.subr.mxu1 %v5634_v31  ;;  %6689 = vst [vmem:[#allocation53_spill] sm:$0xff] %v5652_v60  ;;  %v5658_v31 = vld [vmem:[%s6132_s1 + $0x28] sm:$0xff] }
 0x946   :  { %2205 = vmatpush1.msra.mxu1 %v5640_v42  ;;  %6690 = vst [vmem:[#allocation54_spill] sm:$0xff] %v5658_v31  ;;  %v5664_v42 = vld [vmem:[%s6132_s1 + $0x20] sm:$0xff] }
 0x947   :  { %2206 = vmatprep.subr.mxu1 %v5646_v62  ;;  %6691 = vst [vmem:[#allocation55_spill] sm:$0xff] %v5664_v42  ;;  %v5670_v62 = vld [vmem:[%s6132_s1 + $0x8] sm:$0xff] }
 0x948   :  { %2207 = vmatpush1.msra.mxu1 %v5652_v60  ;;  %6692 = vst [vmem:[#allocation56_spill] sm:$0xff] %v5670_v62  ;;  %v5676_v60 = vld [vmem:[%s6132_s1] sm:$0xff] }
 0x949   :  { %2208 = vmatprep.subr.mxu1 %v5658_v31  ;;  %6693 = vst [vmem:[#allocation57_spill] sm:$0xff] %v5676_v60 }
 0x94a   :  { %2209 = vmatpush1.msra.mxu1 %v5664_v42 }
 0x94b   :  { %2210 = vmatprep.subr.mxu1 %v5670_v62 }
 0x94c   :  { %2211 = vmatpush1.msra.mxu1 %v5676_v60 }
 0x94d   :  { %3190 = vmatprep.subr.mxu1 %v6604_v26 }
 0x9cd   :  { %v1914_v31 = vpop.f32.mrf.mxu1  ;;  %v1998_v45 = vpop.f32.mrf.mxu0 }
 0x9ce   :  { %v1915_v52 = vadd.f32 %v1914_v31, %v5323_v5 }
 0x9cf   :  { %v3154_v42 = vpop.f32.mrf.mxu1 }
 0x9d0   :  { %v1918_v27 = vmax.f32 %v1915_v52, 0.0  ;;  %v6698_v52 = vld [vmem:[#allocation33_spill] sm:$0xff] }
 0x9d2   :  { %v1919_v33 = vmul.f32 %v1918_v27, %v5327_v24  ;;  %v6699_v27 = vld [vmem:[#allocation35_spill] sm:$0xff] }
 0x9d4   :  { %v1920_v39 = vsel %vm1670_vm1, %v1919_v33, 0.0  ;;  %v2000_v33 = vpop.f32.mrf.mxu0 }
 0x9d5   :  { %1921 = vadd.xlane.f32.xlu1 %v1920_v39 }
 0x9ed   :  { %v2069_v32 = vpop.f32.mrf.mxu1 }
 0xa5e   :  { %v1922_v62 = vpop.xlane.xlu1 %1921 }
 0xa5f   :  { %v5684_v3 = vadd.f32 %v1922_v62, %v5334_v6 }
 0xa61   :  { %6694 = vst [vmem:[#allocation58_spill] sm:$0xff] %v5684_v3  ;;  %v1924_v60 = vmul.f32 %v5684_v3, %v6695_v57  ;;  %v1925_v20 = vmul.f32 %v5684_v3, %v6696_v53  ;;  %v1926_v31 = vmul.f32 %v5684_v3, %v6697_v22  ;;  %v1927_v57 = vmul.f32 %v5684_v3, %v4143_v55  ;;  %v6735_v3 = vld [vmem:[#allocation30_spill] sm:$0xff] }
 0xa63   :  { %v1928_v42 = vadd.f32 %v1924_v60, %v6698_v52  ;;  %v1929_v24 = vadd.f32 %v1925_v20, %v6699_v27  ;;  %v1930_v39 = vadd.f32 %v1926_v31, %v4139_v48  ;;  %v1931_v22 = vadd.f32 %v1927_v57, %v4148_v50  ;;  %v2071_v60 = vpop.f32.mrf.mxu1 }
 0xa65   :  { %v2074_v5 = vadd.f32 %v1998_v45, %v1928_v42  ;;  %v2075_v62 = vadd.f32 %v2000_v33, %v1929_v24  ;;  %v2076_v29 = vadd.f32 %v2069_v32, %v1930_v39  ;;  %v2077_v52 = vadd.f32 %v2071_v60, %v1931_v22  ;;  %v6713_v39 = vld [vmem:[#allocation44_spill] sm:$0xff]  ;;  %v6714_v60 = vld [vmem:[#allocation46_spill] sm:$0xff] }
 0xa67   :  { %v2078_v6 = vmul.f32 0.5, %v2074_v5  ;;  %v2082_v25 = vmul.f32 0.5, %v2075_v62  ;;  %v2087_v20 = vmul.f32 0.5, %v2077_v52  ;;  %v6710_v52 = vld [vmem:[#allocation23_spill] sm:$0xff] }
 0xa69   :  { %3405 = vtanh.f32 %v2078_v6 }
 0xa6a   :  { %3407 = vtanh.f32 %v2082_v25 }
 0xa6b   :  { %3409 = vtanh.f32 %v2076_v29 }
 0xa6c   :  { %3411 = vtanh.f32 %v2087_v20  ;;  %v6715_v20 = vld [vmem:[#allocation48_spill] sm:$0xff] }
 0xa76   :  { %v3406_v27 = vpop.eup %3405 }
 0xa77   :  { %v3408_v53 = vpop.eup %3407  ;;  %v2080_v31 = vmul.f32 0.5, %v3406_v27  ;;  %v6711_v27 = vld [vmem:[#allocation40_spill] sm:$0xff] }
 0xa78   :  { %v2084_v45 = vmul.f32 0.5, %v3408_v53  ;;  %v3410_v24 = vpop.eup %3409  ;;  %v6708_v53 = vld [vmem:[#allocation21_spill] sm:$0xff] }
 0xa79   :  { %v2081_v5 = vadd.f32 0.5, %v2080_v31  ;;  %v3412_v25 = vpop.eup %3411  ;;  %v6716_v31 = vld [vmem:[#allocation50_spill] sm:$0xff] }
 0xa7a   :  { %v2085_v42 = vadd.f32 0.5, %v2084_v45  ;;  %v2089_v29 = vmul.f32 0.5, %v3412_v25  ;;  %v6718_v45 = vld [vmem:[#allocation52_spill] sm:$0xff]  ;;  %v6724_v25 = vld [vmem:[#allocation9_spill] sm:$0xff] }
 0xa7b   :  { %v2092_v33 = vmul.f32 %v3410_v24, %v2081_v5  ;;  %v6719_v5 = vld [vmem:[#allocation4_spill] sm:$0xff]  ;;  %v6720_v24 = vld [vmem:[#allocation5_spill] sm:$0xff] }
 0xa7c   :  { %v2091_v62 = vmul.f32 %v2085_v42, %v5352_v37  ;;  %v2090_v57 = vadd.f32 0.5, %v2089_v29  ;;  %v6709_v37 = vld [vmem:[#allocation38_spill] sm:$0xff] }
 0xa7d   :  { %v6721_v42 = vld [vmem:[#allocation6_spill] sm:$0xff] }
 0xa7e   :  { %v5699_v32 = vadd.f32 %v2092_v33, %v2091_v62  ;;  %v6722_v33 = vld [vmem:[#allocation7_spill] sm:$0xff]  ;;  %v6723_v62 = vld [vmem:[#allocation8_spill] sm:$0xff]  ;;  %v6725_v29 = vld [vmem:[#allocation10_spill] sm:$0xff] }
 0xa80   :  { %3413 = vtanh.f32 %v5699_v32 }
 0xa8d   :  { %v3414_v22 = vpop.eup %3413 }
 0xa8e   :  { %v5702_v6 = vmul.f32 %v3414_v22, %v2090_v57  ;;  %v6726_v57 = vld [vmem:[#allocation11_spill] sm:$0xff]  ;;  %v6727_v22 = vld [vmem:[#allocation12_spill] sm:$0xff] }
 0xa90   :  { %3188 = vmatmul.mubr.f32.vlgmr.msra.gmra.mxu0 %v5702_v6  ;;  %2245 = vmatmul.mubr.f32.vlgmr.msra.gmra.mxu1 %v5702_v6 }
 0xa91   :  { %2252 = vmatpush1.msra.mxu0 %v5362_v56  ;;  %2315 = vmatprep.mubr.f32.mxu0 %v6604_v26 }
 0xa92   :  { %2253 = vmatprep.subr.mxu0 %v5369_v43  ;;  %3191 = vmatpush3.msra.mxu1 %v4991_v10  ;;  %v6700_v10 = vld [vmem:[#allocation17_spill] sm:$0xff] }
 0xa93   :  { %2254 = vmatpush1.msra.mxu0 %v5376_v51  ;;  %3192 = vmatprep.subr.mxu1 %v6604_v26 }
 0xa94   :  { %2255 = vmatprep.subr.mxu0 %v5383_v1  ;;  %3193 = vmatpush3.msra.mxu1 %v4998_v11  ;;  %v6701_v11 = vld [vmem:[#allocation22_spill] sm:$0xff] }
 0xa95   :  { %2256 = vmatpush1.msra.mxu0 %v5390_v2  ;;  %3194 = vmatprep.subr.mxu1 %v6604_v26 }
 0xa96   :  { %2257 = vmatprep.subr.mxu0 %v5397_v63  ;;  %3195 = vmatpush3.msra.mxu1 %v5005_v13  ;;  %v6702_v13 = vld [vmem:[#allocation18_spill] sm:$0xff] }
 0xa97   :  { %2258 = vmatpush1.msra.mxu0 %v5404_v36  ;;  %3196 = vmatprep.subr.mxu1 %v6604_v26 }
 0xa98   :  { %2259 = vmatprep.subr.mxu0 %v5411_v58  ;;  %3197 = vmatpush3.msra.mxu1 %v5012_v15  ;;  %v6703_v15 = vld [vmem:[#allocation24_spill] sm:$0xff] }
 0xa99   :  { %2260 = vmatpush1.msra.mxu0 %v5418_v35  ;;  %3198 = vmatprep.subr.mxu1 %v6604_v26 }
 0xa9a   :  { %2261 = vmatprep.subr.mxu0 %v5425_v61  ;;  %3199 = vmatpush3.msra.mxu1 %v5019_v16  ;;  %v6704_v16 = vld [vmem:[#allocation19_spill] sm:$0xff] }
 0xa9b   :  { %2262 = vmatpush1.msra.mxu0 %v5432_v0  ;;  %3200 = vmatprep.subr.mxu1 %v6604_v26 }
 0xa9c   :  { %2263 = vmatprep.subr.mxu0 %v5439_v47  ;;  %3201 = vmatpush3.msra.mxu1 %v5026_v17  ;;  %v6705_v17 = vld [vmem:[#allocation26_spill] sm:$0xff] }
 0xa9d   :  { %2264 = vmatpush1.msra.mxu0 %v5446_v59  ;;  %3202 = vmatprep.subr.mxu1 %v6604_v26 }
 0xa9e   :  { %2265 = vmatprep.subr.mxu0 %v5453_v46  ;;  %3203 = vmatpush3.msra.mxu1 %v5033_v18  ;;  %v6706_v18 = vld [vmem:[#allocation20_spill] sm:$0xff] }
 0xa9f   :  { %2266 = vmatpush1.msra.mxu0 %v5460_v9  ;;  %3204 = vmatprep.subr.mxu1 %v6604_v26 }
 0xaa0   :  { %2267 = vmatprep.subr.mxu0 %v5467_v8  ;;  %3205 = vmatpush3.msra.mxu1 %v5040_v19  ;;  %v6707_v19 = vld [vmem:[#allocation36_spill] sm:$0xff] }
 0xaa1   :  { %2268 = vmatpush1.msra.mxu0 %v6700_v10  ;;  %3206 = vmatprep.subr.mxu1 %v6604_v26 }
 0xaa2   :  { %2269 = vmatprep.subr.mxu0 %v5481_v7  ;;  %3207 = vmatpush3.msra.mxu1 %v6701_v11  ;;  %v6729_v11 = vld [vmem:[#allocation43_spill] sm:$0xff] }
 0xaa3   :  { %2270 = vmatpush1.msra.mxu0 %v6702_v13  ;;  %3208 = vmatprep.subr.mxu1 %v6604_v26 }
 0xaa4   :  { %2271 = vmatprep.subr.mxu0 %v5495_v54  ;;  %3209 = vmatpush3.msra.mxu1 %v6703_v15  ;;  %v6730_v15 = vld [vmem:[#allocation45_spill] sm:$0xff] }
 0xaa5   :  { %2272 = vmatpush1.msra.mxu0 %v6704_v16  ;;  %3210 = vmatprep.subr.mxu1 %v6604_v26 }
 0xaa6   :  { %2273 = vmatprep.subr.mxu0 %v5509_v40  ;;  %3211 = vmatpush3.msra.mxu1 %v6705_v17  ;;  %v6731_v17 = vld [vmem:[#allocation47_spill] sm:$0xff] }
 0xaa7   :  { %2274 = vmatpush1.msra.mxu0 %v6706_v18  ;;  %3212 = vmatprep.subr.mxu1 %v6604_v26 }
 0xaa8   :  { %2275 = vmatprep.subr.mxu0 %v5523_v21  ;;  %3213 = vmatpush3.msra.mxu1 %v6707_v19  ;;  %v6732_v19 = vld [vmem:[#allocation49_spill] sm:$0xff] }
 0xaa9   :  { %2276 = vmatpush1.msra.mxu0 %v6708_v53  ;;  %3214 = vmatprep.subr.mxu1 %v6604_v26 }
 0xaaa   :  { %2277 = vmatprep.subr.mxu0 %v5537_v23  ;;  %3215 = vmatpush3.msra.mxu1 %v6709_v37  ;;  %v6733_v37 = vld [vmem:[#allocation51_spill] sm:$0xff] }
 0xaab   :  { %2278 = vmatpush1.msra.mxu0 %v6710_v52  ;;  %3216 = vmatprep.subr.mxu1 %v6604_v26 }
 0xaac   :  { %2279 = vmatprep.subr.mxu0 %v5551_v28  ;;  %3217 = vmatpush3.msra.mxu1 %v6711_v27  ;;  %v6734_v27 = vld [vmem:[#allocation29_spill] sm:$0xff] }
 0xaad   :  { %2280 = vmatpush1.msra.mxu0 %v5558_v34  ;;  %3218 = vmatprep.subr.mxu1 %v6604_v26 }
 0xaae   :  { %2281 = vmatprep.subr.mxu0 %v5565_v30  ;;  %3219 = vmatpush3.msra.mxu1 %v5089_v41  ;;  %v6712_v41 = vld [vmem:[#allocation42_spill] sm:$0xff] }
 0xaaf   :  { %2282 = vmatpush1.msra.mxu0 %v5572_v38  ;;  %3220 = vmatprep.subr.mxu1 %v6604_v26 }
 0xab0   :  { %2316 = vmatmul.mubr.f32.vlgmr.msra.gmra.mxu0 %v5702_v6  ;;  %2428 = vmatprep.subr.mxu0 %v5184_v12  ;;  %v6728_v6 = vld [vmem:[#allocation41_spill] sm:$0xff] }
 0xab1   :  { %2429 = vmatpush1.msra.mxu0 %v5190_v14  ;;  %3221 = vmatpush3.msra.mxu1 %v5096_v49  ;;  %v6717_v49 = vld [vmem:[#allocation3_spill] sm:$0xff] }
 0xab2   :  { %2430 = vmatprep.subr.mxu0 %v5197_v44  ;;  %3222 = vmatprep.mubr.msk.f32.mxu1 %vm3599_vm0, %v6604_v26 }
 0xab3   :  { %2431 = vmatpush1.msra.mxu0 %v5205_v4  ;;  %2492 = vmatprep.mubr.f32.mxu0 %v6604_v26 }
 0xab4   :  { %2432 = vmatprep.subr.mxu0 %v6712_v41  ;;  %2499 = vmatprep.subr.mxu1 %v6713_v39 }
 0xab5   :  { %2433 = vmatpush1.msra.mxu0 %v6714_v60 }
 0xab6   :  { %2434 = vmatprep.subr.mxu0 %v6715_v20 }
 0xab7   :  { %2435 = vmatpush1.msra.mxu0 %v6716_v31 }
 0xab8   :  { %2436 = vmatprep.subr.mxu0 %v6717_v49 }
 0xab9   :  { %2437 = vmatpush1.msra.mxu0 %v6718_v45 }
 0xaba   :  { %2438 = vmatprep.subr.mxu0 %v6719_v5  ;;  %v6747_v5 = vld [vmem:[#allocation34_spill] sm:$0xff] }
 0xabb   :  { %2439 = vmatpush1.msra.mxu0 %v6720_v24 }
 0xabc   :  { %2440 = vmatprep.subr.mxu0 %v6721_v42  ;;  %v6746_v42 = vld [vmem:[#allocation32_spill] sm:$0xff] }
 0xabd   :  { %2441 = vmatpush1.msra.mxu0 %v6722_v33 }
 0xabe   :  { %2442 = vmatprep.subr.mxu0 %v6723_v62 }
 0xabf   :  { %2443 = vmatpush1.msra.mxu0 %v6724_v25 }
 0xac0   :  { %2444 = vmatprep.subr.mxu0 %v6725_v29  ;;  %v6736_v29 = vld [vmem:[#allocation53_spill] sm:$0xff] }
 0xac1   :  { %2445 = vmatpush1.msra.mxu0 %v6726_v57  ;;  %v6737_v57 = vld [vmem:[#allocation54_spill] sm:$0xff] }
 0xac2   :  { %2446 = vmatprep.subr.mxu0 %v6727_v22  ;;  %v6738_v22 = vld [vmem:[#allocation55_spill] sm:$0xff] }
 0xac3   :  { %2447 = vmatpush1.msra.mxu0 %v6728_v6  ;;  %v6739_v6 = vld [vmem:[#allocation56_spill] sm:$0xff] }
 0xac4   :  { %2448 = vmatprep.subr.mxu0 %v6729_v11  ;;  %v6740_v11 = vld [vmem:[#allocation57_spill] sm:$0xff] }
 0xac5   :  { %2449 = vmatpush1.msra.mxu0 %v6730_v15 }
 0xac6   :  { %2450 = vmatprep.subr.mxu0 %v6731_v17 }
 0xac7   :  { %2451 = vmatpush1.msra.mxu0 %v6732_v19  ;;  %v6741_v19 = vld [vmem:[#allocation13_spill] sm:$0xff] }
 0xac8   :  { %2452 = vmatprep.subr.mxu0 %v6733_v37 }
 0xac9   :  { %2453 = vmatpush1.msra.mxu0 %v6734_v27  ;;  %v6742_v27 = vld [vmem:[#allocation14_spill] sm:$0xff] }
 0xaca   :  { %2454 = vmatprep.subr.mxu0 %v6735_v3 }
 0xacb   :  { %2455 = vmatpush1.msra.mxu0 %v6736_v29 }
 0xacc   :  { %2456 = vmatprep.subr.mxu0 %v6737_v57  ;;  %v6743_v57 = vld [vmem:[#allocation15_spill] sm:$0xff] }
 0xacd   :  { %2457 = vmatpush1.msra.mxu0 %v6738_v22 }
 0xace   :  { %2458 = vmatprep.subr.mxu0 %v6739_v6  ;;  %v6745_v6 = vld [vmem:[#allocation31_spill] sm:$0xff] }
 0xacf   :  { %2459 = vmatpush1.msra.mxu0 %v6740_v11 }
 0xad0   :  { %3225 = vmatprep.subr.mxu0 %v6604_v26 }
 0xb50   :  { %v2162_v17 = vpop.f32.mrf.mxu0  ;;  %v2246_v22 = vpop.f32.mrf.mxu1 }
 0xb51   :  { %v2163_v15 = vadd.f32 %v2162_v17, %v6741_v19 }
 0xb52   :  { %v3189_v37 = vpop.f32.mrf.mxu0 }
 0xb53   :  { %v2166_v25 = vmax.f32 %v2163_v15, 0.0  ;;  %v6748_v15 = vld [vmem:[#allocation33_spill] sm:$0xff] }
 0xb55   :  { %v2167_v62 = vmul.f32 %v2166_v25, %v6742_v27  ;;  %v6749_v25 = vld [vmem:[#allocation35_spill] sm:$0xff] }
 0xb57   :  { %v2168_v3 = vsel %vm1670_vm1, %v2167_v62, 0.0  ;;  %v2248_v62 = vpop.f32.mrf.mxu1 }
 0xb58   :  { %2169 = vadd.xlane.f32.xlu0 %v2168_v3 }
 0xb70   :  { %v2317_v49 = vpop.f32.mrf.mxu0 }
 0xbe1   :  { %v2170_v29 = vpop.xlane.xlu0 %2169 }
 0xbe2   :  { %v5811_v33 = vadd.f32 %v2170_v29, %v6743_v57 }
 0xbe4   :  { %6744 = vst [vmem:[#allocation17_spill] sm:$0xff] %v5811_v33  ;;  %v2172_v11 = vmul.f32 %v5811_v33, %v6745_v6  ;;  %v2173_v24 = vmul.f32 %v5811_v33, %v6746_v42  ;;  %v2174_v17 = vmul.f32 %v5811_v33, %v6747_v5  ;;  %v2175_v6 = vmul.f32 %v5811_v33, %v4143_v55 }
 0xbe6   :  { %v2176_v37 = vadd.f32 %v2172_v11, %v6748_v15  ;;  %v2177_v27 = vadd.f32 %v2173_v24, %v6749_v25  ;;  %v2178_v3 = vadd.f32 %v2174_v17, %v4139_v48  ;;  %v2179_v5 = vadd.f32 %v2175_v6, %v4148_v50  ;;  %v2319_v11 = vpop.f32.mrf.mxu0 }
 0xbe8   :  { %v2322_v19 = vadd.f32 %v2246_v22, %v2176_v37  ;;  %v2323_v29 = vadd.f32 %v2248_v62, %v2177_v27  ;;  %v2324_v31 = vadd.f32 %v2317_v49, %v2178_v3  ;;  %v2325_v15 = vadd.f32 %v2319_v11, %v2179_v5  ;;  %v5875_v3 = vld [vmem:[%s6135_s2 + $0x58] sm:$0xff]  ;;  %v5884_v11 = vld [vmem:[%s6135_s2 + $0x50] sm:$0xff] }
 0xbea   :  { %v2326_v57 = vmul.f32 0.5, %v2322_v19  ;;  %v2330_v45 = vmul.f32 0.5, %v2323_v29  ;;  %v2335_v24 = vmul.f32 0.5, %v2325_v15  ;;  %v5857_v15 = vld [vmem:[%s6135_s2 + $0x68] sm:$0xff] }
 0xbec   :  { %3415 = vtanh.f32 %v2326_v57 }
 0xbed   :  { %3417 = vtanh.f32 %v2330_v45 }
 0xbee   :  { %3419 = vtanh.f32 %v2324_v31 }
 0xbef   :  { %3421 = vtanh.f32 %v2335_v24  ;;  %v5893_v24 = vld [vmem:[%s6135_s2 + $0x48] sm:$0xff] }
 0xbf9   :  { %v3416_v25 = vpop.eup %3415 }
 0xbfa   :  { %v3418_v42 = vpop.eup %3417  ;;  %v2328_v17 = vmul.f32 0.5, %v3416_v25  ;;  %v5866_v25 = vld [vmem:[%s6135_s2 + $0x60] sm:$0xff] }
 0xbfb   :  { %v2332_v22 = vmul.f32 0.5, %v3418_v42  ;;  %v3420_v27 = vpop.eup %3419  ;;  %v5848_v42 = vld [vmem:[%s6135_s2 + $0x70] sm:$0xff] }
 0xbfc   :  { %v2329_v19 = vadd.f32 0.5, %v2328_v17  ;;  %v3422_v45 = vpop.eup %3421  ;;  %v5902_v17 = vld [vmem:[%s6135_s2 + $0x40] sm:$0xff] }
 0xbfd   :  { %v2333_v37 = vadd.f32 0.5, %v2332_v22  ;;  %v2337_v31 = vmul.f32 0.5, %v3422_v45  ;;  %v5911_v22 = vld [vmem:[%s6135_s2 + $0x38] sm:$0xff]  ;;  %v5965_v45 = vld [vmem:[%s6135_s2 + $0x8] sm:$0xff] }
 0xbfe   :  { %v2340_v62 = vmul.f32 %v3420_v27, %v2329_v19  ;;  %v5920_v19 = vld [vmem:[%s6135_s2 + $0x30] sm:$0xff]  ;;  %v5929_v27 = vld [vmem:[%s6135_s2 + $0x28] sm:$0xff]  ;;  %6751 = vst [vmem:[#allocation18_spill] sm:$0xff] %v5965_v45 }
 0xbff   :  { %v2339_v29 = vmul.f32 %v2333_v37, %v5699_v32  ;;  %v2338_v57 = vadd.f32 0.5, %v2337_v31  ;;  %v5839_v32 = vld [vmem:[%s6135_s2 + $0x78] sm:$0xff]  ;;  %v5938_v37 = vld [vmem:[%s6135_s2 + $0x20] sm:$0xff] }
 0xc00   :  { %v5976_v31 = vld [vmem:[%s6135_s2] sm:$0xff] }
 0xc01   :  { %v5826_v49 = vadd.f32 %v2340_v62, %v2339_v29  ;;  %v5947_v62 = vld [vmem:[%s6135_s2 + $0x18] sm:$0xff]  ;;  %v5956_v29 = vld [vmem:[%s6135_s2 + $0x10] sm:$0xff]  ;;  %6752 = vst [vmem:[#allocation24_spill] sm:$0xff] %v5976_v31 }
 0xc02   :  { %6750 = vst [vmem:[#allocation22_spill] sm:$0xff] %v5956_v29 }
 0xc03   :  { %3423 = vtanh.f32 %v5826_v49 }
 0xc10   :  { %v3424_v5 = vpop.eup %3423 }
 0xc11   :  { %v5829_v6 = vmul.f32 %v3424_v5, %v2338_v57  ;;  %v6756_v57 = vld [vmem:[#allocation4_spill] sm:$0xff]  ;;  %v6757_v5 = vld [vmem:[#allocation5_spill] sm:$0xff] }
 0xc13   :  { %3223 = vmatmul.mubr.f32.vlgmr.msra.gmra.mxu1 %v5829_v6  ;;  %2493 = vmatmul.mubr.f32.vlgmr.msra.gmra.mxu0 %v5829_v6 }
 0xc14   :  { %2500 = vmatpush1.msra.mxu1 %v5362_v56  ;;  %2563 = vmatprep.mubr.f32.mxu1 %v6604_v26 }
 0xc15   :  { %2501 = vmatprep.subr.mxu1 %v5369_v43  ;;  %3226 = vmatpush3.msra.mxu0 %v5839_v32 }
 0xc16   :  { %2502 = vmatpush1.msra.mxu1 %v5376_v51  ;;  %3227 = vmatprep.subr.mxu0 %v6604_v26 }
 0xc17   :  { %2503 = vmatprep.subr.mxu1 %v5383_v1  ;;  %3228 = vmatpush3.msra.mxu0 %v5848_v42 }
 0xc18   :  { %2504 = vmatpush1.msra.mxu1 %v5390_v2  ;;  %3229 = vmatprep.subr.mxu0 %v6604_v26 }
 0xc19   :  { %2505 = vmatprep.subr.mxu1 %v5397_v63  ;;  %3230 = vmatpush3.msra.mxu0 %v5857_v15 }
 0xc1a   :  { %2506 = vmatpush1.msra.mxu1 %v5404_v36  ;;  %3231 = vmatprep.subr.mxu0 %v6604_v26 }
 0xc1b   :  { %2507 = vmatprep.subr.mxu1 %v5411_v58  ;;  %3232 = vmatpush3.msra.mxu0 %v5866_v25 }
 0xc1c   :  { %2508 = vmatpush1.msra.mxu1 %v5418_v35  ;;  %3233 = vmatprep.subr.mxu0 %v6604_v26 }
 0xc1d   :  { %2509 = vmatprep.subr.mxu1 %v5425_v61  ;;  %3234 = vmatpush3.msra.mxu0 %v5875_v3 }
 0xc1e   :  { %2510 = vmatpush1.msra.mxu1 %v5432_v0  ;;  %3235 = vmatprep.subr.mxu0 %v6604_v26 }
 0xc1f   :  { %2511 = vmatprep.subr.mxu1 %v5439_v47  ;;  %3236 = vmatpush3.msra.mxu0 %v5884_v11 }
 0xc20   :  { %2512 = vmatpush1.msra.mxu1 %v5446_v59  ;;  %3237 = vmatprep.subr.mxu0 %v6604_v26 }
 0xc21   :  { %2513 = vmatprep.subr.mxu1 %v5453_v46  ;;  %3238 = vmatpush3.msra.mxu0 %v5893_v24 }
 0xc22   :  { %2514 = vmatpush1.msra.mxu1 %v5460_v9  ;;  %3239 = vmatprep.subr.mxu0 %v6604_v26 }
 0xc23   :  { %2515 = vmatprep.subr.mxu1 %v5467_v8  ;;  %3240 = vmatpush3.msra.mxu0 %v5902_v17 }
 0xc24   :  { %2516 = vmatpush1.msra.mxu1 %v6700_v10  ;;  %3241 = vmatprep.subr.mxu0 %v6604_v26 }
 0xc25   :  { %2517 = vmatprep.subr.mxu1 %v5481_v7  ;;  %3242 = vmatpush3.msra.mxu0 %v5911_v22 }
 0xc26   :  { %2518 = vmatpush1.msra.mxu1 %v6702_v13  ;;  %3243 = vmatprep.subr.mxu0 %v6604_v26 }
 0xc27   :  { %2519 = vmatprep.subr.mxu1 %v5495_v54  ;;  %3244 = vmatpush3.msra.mxu0 %v5920_v19 }
 0xc28   :  { %2520 = vmatpush1.msra.mxu1 %v6704_v16  ;;  %3245 = vmatprep.subr.mxu0 %v6604_v26 }
 0xc29   :  { %2521 = vmatprep.subr.mxu1 %v5509_v40  ;;  %3246 = vmatpush3.msra.mxu0 %v5929_v27 }
 0xc2a   :  { %2522 = vmatpush1.msra.mxu1 %v6706_v18  ;;  %3247 = vmatprep.subr.mxu0 %v6604_v26 }
 0xc2b   :  { %2523 = vmatprep.subr.mxu1 %v5523_v21  ;;  %3248 = vmatpush3.msra.mxu0 %v5938_v37 }
 0xc2c   :  { %2524 = vmatpush1.msra.mxu1 %v6708_v53  ;;  %3249 = vmatprep.subr.mxu0 %v6604_v26 }
 0xc2d   :  { %2525 = vmatprep.subr.mxu1 %v5537_v23  ;;  %3250 = vmatpush3.msra.mxu0 %v5947_v62 }
 0xc2e   :  { %2526 = vmatpush1.msra.mxu1 %v6710_v52  ;;  %3251 = vmatprep.subr.mxu0 %v6604_v26 }
 0xc2f   :  { %2527 = vmatprep.subr.mxu1 %v5551_v28  ;;  %3252 = vmatpush3.msra.mxu0 %v5956_v29 }
 0xc30   :  { %2528 = vmatpush1.msra.mxu1 %v5558_v34  ;;  %3253 = vmatprep.subr.mxu0 %v6604_v26  ;;  %v6783_v34 = vld [vmem:[#allocation34_spill] sm:$0xff] }
 0xc31   :  { %2529 = vmatprep.subr.mxu1 %v5565_v30  ;;  %3254 = vmatpush3.msra.mxu0 %v5965_v45  ;;  %v6782_v45 = vld [vmem:[#allocation32_spill] sm:$0xff] }
 0xc32   :  { %2530 = vmatpush1.msra.mxu1 %v5572_v38  ;;  %3255 = vmatprep.subr.mxu0 %v6604_v26 }
 0xc33   :  { %2564 = vmatmul.mubr.f32.vlgmr.msra.gmra.mxu1 %v5829_v6  ;;  %2676 = vmatprep.subr.mxu1 %v5184_v12  ;;  %v6753_v12 = vld [vmem:[#allocation50_spill] sm:$0xff]  ;;  %v6759_v6 = vld [vmem:[#allocation7_spill] sm:$0xff] }
 0xc34   :  { %2677 = vmatpush1.msra.mxu1 %v5190_v14  ;;  %3256 = vmatpush3.msra.mxu0 %v5976_v31  ;;  %v6754_v14 = vld [vmem:[#allocation3_spill] sm:$0xff] }
 0xc35   :  { %2678 = vmatprep.subr.mxu1 %v5197_v44  ;;  %3257 = vmatprep.mubr.msk.f32.mxu0 %vm3599_vm0, %v6604_v26  ;;  %v6755_v44 = vld [vmem:[#allocation52_spill] sm:$0xff] }
 0xc36   :  { %2679 = vmatpush1.msra.mxu1 %v5205_v4  ;;  %2740 = vmatprep.mubr.f32.mxu1 %v6604_v26  ;;  %v6758_v4 = vld [vmem:[#allocation6_spill] sm:$0xff] }
 0xc37   :  { %2680 = vmatprep.subr.mxu1 %v6712_v41  ;;  %2747 = vmatprep.subr.mxu0 %v6713_v39  ;;  %v6760_v41 = vld [vmem:[#allocation8_spill] sm:$0xff]  ;;  %v6761_v39 = vld [vmem:[#allocation9_spill] sm:$0xff] }
 0xc38   :  { %2681 = vmatpush1.msra.mxu1 %v6714_v60  ;;  %v6762_v60 = vld [vmem:[#allocation10_spill] sm:$0xff] }
 0xc39   :  { %2682 = vmatprep.subr.mxu1 %v6715_v20  ;;  %v6763_v20 = vld [vmem:[#allocation11_spill] sm:$0xff] }
 0xc3a   :  { %2683 = vmatpush1.msra.mxu1 %v6753_v12  ;;  %v6764_v12 = vld [vmem:[#allocation12_spill] sm:$0xff] }
 0xc3b   :  { %2684 = vmatprep.subr.mxu1 %v6754_v14  ;;  %v6765_v14 = vld [vmem:[#allocation41_spill] sm:$0xff] }
 0xc3c   :  { %2685 = vmatpush1.msra.mxu1 %v6755_v44  ;;  %v6766_v44 = vld [vmem:[#allocation43_spill] sm:$0xff] }
 0xc3d   :  { %2686 = vmatprep.subr.mxu1 %v6756_v57  ;;  %v6767_v57 = vld [vmem:[#allocation45_spill] sm:$0xff] }
 0xc3e   :  { %2687 = vmatpush1.msra.mxu1 %v6757_v5  ;;  %v6768_v5 = vld [vmem:[#allocation47_spill] sm:$0xff] }
 0xc3f   :  { %2688 = vmatprep.subr.mxu1 %v6758_v4  ;;  %v6769_v4 = vld [vmem:[#allocation49_spill] sm:$0xff] }
 0xc40   :  { %2689 = vmatpush1.msra.mxu1 %v6759_v6  ;;  %v6770_v6 = vld [vmem:[#allocation51_spill] sm:$0xff] }
 0xc41   :  { %2690 = vmatprep.subr.mxu1 %v6760_v41  ;;  %v6771_v41 = vld [vmem:[#allocation29_spill] sm:$0xff] }
 0xc42   :  { %2691 = vmatpush1.msra.mxu1 %v6761_v39  ;;  %v6772_v39 = vld [vmem:[#allocation30_spill] sm:$0xff] }
 0xc43   :  { %2692 = vmatprep.subr.mxu1 %v6762_v60  ;;  %v6773_v60 = vld [vmem:[#allocation53_spill] sm:$0xff] }
 0xc44   :  { %2693 = vmatpush1.msra.mxu1 %v6763_v20  ;;  %v6774_v20 = vld [vmem:[#allocation54_spill] sm:$0xff] }
 0xc45   :  { %2694 = vmatprep.subr.mxu1 %v6764_v12  ;;  %v6775_v12 = vld [vmem:[#allocation55_spill] sm:$0xff] }
 0xc46   :  { %2695 = vmatpush1.msra.mxu1 %v6765_v14  ;;  %v6776_v14 = vld [vmem:[#allocation56_spill] sm:$0xff] }
 0xc47   :  { %2696 = vmatprep.subr.mxu1 %v6766_v44  ;;  %v6777_v44 = vld [vmem:[#allocation57_spill] sm:$0xff] }
 0xc48   :  { %2697 = vmatpush1.msra.mxu1 %v6767_v57 }
 0xc49   :  { %2698 = vmatprep.subr.mxu1 %v6768_v5  ;;  %v6778_v5 = vld [vmem:[#allocation13_spill] sm:$0xff] }
 0xc4a   :  { %2699 = vmatpush1.msra.mxu1 %v6769_v4 }
 0xc4b   :  { %2700 = vmatprep.subr.mxu1 %v6770_v6 }
 0xc4c   :  { %2701 = vmatpush1.msra.mxu1 %v6771_v41  ;;  %v6779_v41 = vld [vmem:[#allocation14_spill] sm:$0xff] }
 0xc4d   :  { %2702 = vmatprep.subr.mxu1 %v6772_v39 }
 0xc4e   :  { %2703 = vmatpush1.msra.mxu1 %v6773_v60 }
 0xc4f   :  { %2704 = vmatprep.subr.mxu1 %v6774_v20  ;;  %v6780_v20 = vld [vmem:[#allocation15_spill] sm:$0xff] }
 0xc50   :  { %2705 = vmatpush1.msra.mxu1 %v6775_v12 }
 0xc51   :  { %2706 = vmatprep.subr.mxu1 %v6776_v14  ;;  %v6781_v14 = vld [vmem:[#allocation31_spill] sm:$0xff] }
 0xc52   :  { %2707 = vmatpush1.msra.mxu1 %v6777_v44 }
 0xc53   :  { %3260 = vmatprep.subr.mxu1 %v6604_v26 }
 0xcd3   :  { %v2410_v57 = vpop.f32.mrf.mxu1  ;;  %v2494_v12 = vpop.f32.mrf.mxu0 }
 0xcd4   :  { %v2411_v4 = vadd.f32 %v2410_v57, %v6778_v5 }
 0xcd5   :  { %v3224_v6 = vpop.f32.mrf.mxu1 }
 0xcd6   :  { %v2414_v33 = vmax.f32 %v2411_v4, 0.0  ;;  %v6784_v4 = vld [vmem:[#allocation33_spill] sm:$0xff] }
 0xcd8   :  { %v2415_v31 = vmul.f32 %v2414_v33, %v6779_v41  ;;  %v6785_v33 = vld [vmem:[#allocation35_spill] sm:$0xff] }
 0xcda   :  { %v2416_v39 = vsel %vm1670_vm1, %v2415_v31, 0.0  ;;  %v2496_v31 = vpop.f32.mrf.mxu0 }
 0xcdb   :  { %2417 = vadd.xlane.f32.xlu0 %v2416_v39 }
 0xcf3   :  { %v2565_v28 = vpop.f32.mrf.mxu1 }
 0xd64   :  { %v2418_v60 = vpop.xlane.xlu0 %2417 }
 0xd65   :  { %v6018_v38 = vadd.f32 %v2418_v60, %v6780_v20 }
 0xd67   :  { %v2420_v44 = vmul.f32 %v6018_v38, %v6781_v14  ;;  %v2421_v30 = vmul.f32 %v6018_v38, %v6782_v45  ;;  %v2422_v57 = vmul.f32 %v6018_v38, %v6783_v34  ;;  %v2423_v14 = vmul.f32 %v6018_v38, %v4143_v55 }
 0xd69   :  { %v2424_v6 = vadd.f32 %v2420_v44, %v6784_v4  ;;  %v2425_v41 = vadd.f32 %v2421_v30, %v6785_v33  ;;  %v2426_v39 = vadd.f32 %v2422_v57, %v4139_v48  ;;  %v2427_v34 = vadd.f32 %v2423_v14, %v4148_v50  ;;  %v2567_v44 = vpop.f32.mrf.mxu1 }
 0xd6b   :  { %v2570_v5 = vadd.f32 %v2494_v12, %v2424_v6  ;;  %v2571_v60 = vadd.f32 %v2496_v31, %v2425_v41  ;;  %v2572_v52 = vadd.f32 %v2565_v28, %v2426_v39  ;;  %v2573_v4 = vadd.f32 %v2567_v44, %v2427_v34 }
 0xd6d   :  { %v2574_v20 = vmul.f32 0.5, %v2570_v5  ;;  %v2578_v29 = vmul.f32 0.5, %v2571_v60  ;;  %v2583_v30 = vmul.f32 0.5, %v2573_v4 }
 0xd6f   :  { %3425 = vtanh.f32 %v2574_v20 }
 0xd70   :  { %3427 = vtanh.f32 %v2578_v29 }
 0xd71   :  { %3429 = vtanh.f32 %v2572_v52 }
 0xd72   :  { %3431 = vtanh.f32 %v2583_v30 }
 0xd7c   :  { %v3426_v33 = vpop.eup %3425 }
 0xd7d   :  { %v3428_v45 = vpop.eup %3427  ;;  %v2576_v57 = vmul.f32 0.5, %v3426_v33 }
 0xd7e   :  { %v2580_v12 = vmul.f32 0.5, %v3428_v45  ;;  %v3430_v41 = vpop.eup %3429 }
 0xd7f   :  { %v2577_v5 = vadd.f32 0.5, %v2576_v57  ;;  %v3432_v29 = vpop.eup %3431 }
 0xd80   :  { %v2581_v6 = vadd.f32 0.5, %v2580_v12  ;;  %v2585_v52 = vmul.f32 0.5, %v3432_v29 }
 0xd81   :  { %v2588_v31 = vmul.f32 %v3430_v41, %v2577_v5 }
 0xd82   :  { %v2587_v60 = vmul.f32 %v2581_v6, %v5826_v49  ;;  %v2586_v20 = vadd.f32 0.5, %v2585_v52 }
 0xd84   :  { %v6033_v28 = vadd.f32 %v2588_v31, %v2587_v60 }
 0xd86   :  { %3433 = vtanh.f32 %v6033_v28 }
 0xd93   :  { %v3434_v34 = vpop.eup %3433 }
 0xd94   :  { %v6036_v14 = vmul.f32 %v3434_v34, %v2586_v20 }
 0xd96   :  { %3258 = vmatmul.mubr.f32.vlgmr.msra.gmra.mxu0 %v6036_v14  ;;  %2741 = vmatmul.mubr.f32.vlgmr.msra.gmra.mxu1 %v6036_v14 }
 0xd97   :  { %2748 = vmatpush1.msra.mxu0 %v5362_v56  ;;  %2811 = vmatprep.mubr.f32.mxu0 %v6604_v26  ;;  %v6786_v56 = vld [vmem:[#allocation23_spill] sm:$0xff] }
 0xd98   :  { %2749 = vmatprep.subr.mxu0 %v5369_v43  ;;  %3261 = vmatpush3.msra.mxu1 %v5839_v32  ;;  %v6788_v43 = vld [vmem:[#allocation22_spill] sm:$0xff]  ;;  %v6802_v32 = vld [vmem:[#allocation33_spill] sm:$0xff] }
 0xd99   :  { %2750 = vmatpush1.msra.mxu0 %v5376_v51  ;;  %3262 = vmatprep.subr.mxu1 %v6604_v26  ;;  %v6789_v51 = vld [vmem:[#allocation27_spill] sm:$0xff] }
 0xd9a   :  { %2751 = vmatprep.subr.mxu0 %v5383_v1  ;;  %3263 = vmatpush3.msra.mxu1 %v5848_v42  ;;  %v6791_v1 = vld [vmem:[#allocation18_spill] sm:$0xff] }
 0xd9b   :  { %2752 = vmatpush1.msra.mxu0 %v5390_v2  ;;  %3264 = vmatprep.subr.mxu1 %v6604_v26  ;;  %v6792_v2 = vld [vmem:[#allocation39_spill] sm:$0xff] }
 0xd9c   :  { %2753 = vmatprep.subr.mxu0 %v5397_v63  ;;  %3265 = vmatpush3.msra.mxu1 %v5857_v15  ;;  %v6803_v15 = vld [vmem:[#allocation35_spill] sm:$0xff] }
 0xd9d   :  { %2754 = vmatpush1.msra.mxu0 %v5404_v36  ;;  %3266 = vmatprep.subr.mxu1 %v6604_v26  ;;  %v6794_v36 = vld [vmem:[#allocation13_spill] sm:$0xff] }
 0xd9e   :  { %2755 = vmatprep.subr.mxu0 %v5411_v58  ;;  %3267 = vmatpush3.msra.mxu1 %v5866_v25 }
 0xd9f   :  { %2756 = vmatpush1.msra.mxu0 %v5418_v35  ;;  %3268 = vmatprep.subr.mxu1 %v6604_v26 }
 0xda0   :  { %2757 = vmatprep.subr.mxu0 %v5425_v61  ;;  %3269 = vmatpush3.msra.mxu1 %v5875_v3 }
 0xda1   :  { %2758 = vmatpush1.msra.mxu0 %v5432_v0  ;;  %3270 = vmatprep.subr.mxu1 %v6604_v26  ;;  %v6795_v0 = vld [vmem:[#allocation14_spill] sm:$0xff] }
 0xda2   :  { %2759 = vmatprep.subr.mxu0 %v5439_v47  ;;  %3271 = vmatpush3.msra.mxu1 %v5884_v11 }
 0xda3   :  { %2760 = vmatpush1.msra.mxu0 %v5446_v59  ;;  %3272 = vmatprep.subr.mxu1 %v6604_v26 }
 0xda4   :  { %2761 = vmatprep.subr.mxu0 %v5453_v46  ;;  %3273 = vmatpush3.msra.mxu1 %v5893_v24  ;;  %v6796_v46 = vld [vmem:[#allocation16_spill] sm:$0xff] }
 0xda5   :  { %2762 = vmatpush1.msra.mxu0 %v5460_v9  ;;  %3274 = vmatprep.subr.mxu1 %v6604_v26  ;;  %v6797_v9 = vld [vmem:[#allocation17_spill] sm:$0xff] }
 0xda6   :  { %2763 = vmatprep.subr.mxu0 %v5467_v8  ;;  %3275 = vmatpush3.msra.mxu1 %v5902_v17 }
 0xda7   :  { %2764 = vmatpush1.msra.mxu0 %v6700_v10  ;;  %3276 = vmatprep.subr.mxu1 %v6604_v26  ;;  %v6799_v10 = vld [vmem:[#allocation31_spill] sm:$0xff] }
 0xda8   :  { %2765 = vmatprep.subr.mxu0 %v5481_v7  ;;  %3277 = vmatpush3.msra.mxu1 %v5911_v22 }
 0xda9   :  { %2766 = vmatpush1.msra.mxu0 %v6702_v13  ;;  %3278 = vmatprep.subr.mxu1 %v6604_v26 }
 0xdaa   :  { %2767 = vmatprep.subr.mxu0 %v5495_v54  ;;  %3279 = vmatpush3.msra.mxu1 %v5920_v19  ;;  %v6798_v54 = vld [vmem:[#allocation15_spill] sm:$0xff] }
 0xdab   :  { %2768 = vmatpush1.msra.mxu0 %v6704_v16  ;;  %3280 = vmatprep.subr.mxu1 %v6604_v26  ;;  %v6800_v16 = vld [vmem:[#allocation32_spill] sm:$0xff] }
 0xdac   :  { %2769 = vmatprep.subr.mxu0 %v5509_v40  ;;  %3281 = vmatpush3.msra.mxu1 %v5929_v27  ;;  %v6787_v40 = vld [vmem:[#allocation25_spill] sm:$0xff] }
 0xdad   :  { %2770 = vmatpush1.msra.mxu0 %v6706_v18  ;;  %3282 = vmatprep.subr.mxu1 %v6604_v26 }
 0xdae   :  { %2771 = vmatprep.subr.mxu0 %v5523_v21  ;;  %3283 = vmatpush3.msra.mxu1 %v5938_v37  ;;  %v6790_v21 = vld [vmem:[#allocation37_spill] sm:$0xff] }
 0xdaf   :  { %2772 = vmatpush1.msra.mxu0 %v6708_v53  ;;  %3284 = vmatprep.subr.mxu1 %v6604_v26  ;;  %v6801_v53 = vld [vmem:[#allocation34_spill] sm:$0xff] }
 0xdb0   :  { %2773 = vmatprep.subr.mxu0 %v5537_v23  ;;  %3285 = vmatpush3.msra.mxu1 %v5947_v62  ;;  %v6793_v23 = vld [vmem:[#allocation24_spill] sm:$0xff] }
 0xdb1   :  { %2774 = vmatpush1.msra.mxu0 %v6786_v56  ;;  %3286 = vmatprep.subr.mxu1 %v6604_v26 }
 0xdb2   :  { %2775 = vmatprep.subr.mxu0 %v6787_v40  ;;  %3287 = vmatpush3.msra.mxu1 %v6788_v43 }
 0xdb3   :  { %2776 = vmatpush1.msra.mxu0 %v6789_v51  ;;  %3288 = vmatprep.subr.mxu1 %v6604_v26  ;;  %v6804_v51 = vld [vmem:[#allocation58_spill] sm:$0xff] }
 0xdb4   :  { %2777 = vmatprep.subr.mxu0 %v6790_v21  ;;  %3289 = vmatpush3.msra.mxu1 %v6791_v1 }
 0xdb5   :  { %2778 = vmatpush1.msra.mxu0 %v6792_v2  ;;  %3290 = vmatprep.subr.mxu1 %v6604_v26  ;;  %v6805_v2 = vlaneseq }
 0xdb6   :  { %2812 = vmatmul.mubr.f32.vlgmr.msra.gmra.mxu0 %v6036_v14  ;;  %3291 = vmatpush3.msra.mxu1 %v6793_v23 }
 0xdb7   :  { %3292 = vmatprep.mubr.msk.f32.mxu1 %vm3599_vm0, %v6604_v26  ;;  %v2941_v23 = vand.u32 127, %v6805_v2 }
 0xe56   :  { %v2658_v63 = vpop.f32.mrf.mxu0  ;;  %v2742_v26 = vpop.f32.mrf.mxu1 }
 0xe57   :  { %v2659_v58 = vadd.f32 %v2658_v63, %v6794_v36 }
 0xe58   :  { %v3259_v35 = vpop.f32.mrf.mxu0  ;;  %v2744_v3 = vpop.f32.mrf.mxu1 }
 0xe59   :  { %v2662_v61 = vmax.f32 %v2659_v58, 0.0  ;;  %v6806_v35 = vld [vmem:[#allocation28_spill] sm:$0xff] }
 0xe5b   :  { %v2663_v47 = vmul.f32 %v2662_v61, %v6795_v0 }
 0xe5d   :  { %v2664_v59 = vsel %vm1670_vm1, %v2663_v47, 0.0 }
 0xe5e   :  { %2665 = vadd.xlane.f32.xlu1 %v2664_v59 }
 0xe6f   :  { %2923 = vperm.xlu1 %3313, %v6796_v46  }
 0xe73   :  { %2929 = vperm.xlu1 %3313, %v6797_v9  }
 0xe76   :  { %v2813_v19 = vpop.f32.mrf.mxu0 }
 0xe77   :  { %2932 = vperm.xlu1 %3313, %v6018_v38  }
 0xe78   :  { %v2815_v45 = vpop.f32.mrf.mxu0 }
 0xee7   :  { %v2666_v8 = vpop.xlane.xlu1 %2665 }
 0xee8   :  { %v2667_v7 = vadd.f32 %v2666_v8, %v6798_v54 }
 0xeea   :  { %v2668_v13 = vmul.f32 %v2667_v7, %v6799_v10  ;;  %v2669_v18 = vmul.f32 %v2667_v7, %v6800_v16  ;;  %v2670_v49 = vmul.f32 %v2667_v7, %v6801_v53  ;;  %2935 = vperm.xlu1 %3313, %v2667_v7   ;;  %v2671_v27 = vmul.f32 %v2667_v7, %v4143_v55 }
 0xeeb   :  { %v2924_v1 = vpop.permute.xlu1 %2923 }
 0xeec   :  { %v2672_v42 = vadd.f32 %v2668_v13, %v6802_v32  ;;  %v2673_v25 = vadd.f32 %v2669_v18, %v6803_v15  ;;  %v2674_v11 = vadd.f32 %v2670_v49, %v4139_v48  ;;  %v2675_v62 = vadd.f32 %v2671_v27, %v4148_v50 }
 0xeee   :  { %v2818_v24 = vadd.f32 %v2742_v26, %v2672_v42  ;;  %v2819_v38 = vadd.f32 %v2744_v3, %v2673_v25  ;;  %v2820_v37 = vadd.f32 %v2813_v19, %v2674_v11  ;;  %v2821_v4 = vadd.f32 %v2815_v45, %v2675_v62 }
 0xeef   :  { %v2930_v63 = vpop.permute.xlu1 %2929 }
 0xef0   :  { %v2822_v17 = vmul.f32 0.5, %v2818_v24  ;;  %v2826_v22 = vmul.f32 0.5, %v2819_v38  ;;  %v2831_v33 = vmul.f32 0.5, %v2821_v4 }
 0xef2   :  { %3435 = vtanh.f32 %v2822_v17 }
 0xef3   :  { %3437 = vtanh.f32 %v2826_v22 }
 0xef4   :  { %3439 = vtanh.f32 %v2820_v37 }
 0xef5   :  { %3441 = vtanh.f32 %v2831_v33 }
 0xeff   :  { %v3436_v39 = vpop.eup %3435 }
 0xf00   :  { %v3438_v44 = vpop.eup %3437  ;;  %v2824_v30 = vmul.f32 0.5, %v3436_v39 }
 0xf01   :  { %v2828_v48 = vmul.f32 0.5, %v3438_v44  ;;  %v3440_v12 = vpop.eup %3439 }
 0xf02   :  { %v2825_v57 = vadd.f32 0.5, %v2824_v30  ;;  %v3442_v31 = vpop.eup %3441 }
 0xf03   :  { %v2829_v5 = vadd.f32 0.5, %v2828_v48  ;;  %v2833_v60 = vmul.f32 0.5, %v3442_v31 }
 0xf04   :  { %v2836_v41 = vmul.f32 %v3440_v12, %v2825_v57 }
 0xf05   :  { %v2835_v55 = vmul.f32 %v2829_v5, %v6033_v28  ;;  %v2834_v50 = vadd.f32 0.5, %v2833_v60 }
 0xf07   :  { %v2837_v6 = vadd.f32 %v2836_v41, %v2835_v55 }
 0xf09   :  { %3443 = vtanh.f32 %v2837_v6 }
 0xf16   :  { %v3444_v29 = vpop.eup %3443 }
 0xf17   :  { %v2839_v52 = vmul.f32 %v3444_v29, %v2834_v50 }
 0xf19   :  { %3293 = vmatmul.mubr.f32.vlgmr.msra.gmra.mxu1 %v2839_v52 }
 0xfd9   :  { %v2906_v20 = vpop.f32.mrf.mxu1 }
 0xfda   :  { %v2907_v34 = vadd.f32 %v2906_v20, %v6794_v36  ;;  %v2944_v36 = vsub.s32 %v2941_v23, %v6806_v35 }
 0xfdb   :  { %v3294_v14 = vpop.f32.mrf.mxu1 }
 0xfdc   :  { %v2910_v56 = vmax.f32 %v2907_v34, 0.0  ;;  %v2945_v47 = vrot.slane %v2924_v1, %v2944_v36  ;;  %v2953_v46 = vrot.slane %v2930_v63, %v2944_v36 }
 0xfde   :  { %v2911_v40 = vmul.f32 %v2910_v56, %v6795_v0  ;;  %v2933_v0 = vpop.permute.xlu1 %2932 }
 0xfdf   :  { %v2957_v7 = vrot.slane %v2933_v0, %v2944_v36 }
 0xfe0   :  { %v2912_v43 = vsel %vm1670_vm1, %v2911_v40, 0.0 }
 0xfe1   :  { %2913 = vadd.xlane.f32.xlu0 %v2912_v43 }
 0xfe2   :  { %v2936_v9 = vpop.permute.xlu1 %2935 }
 0xfe3   :  { %v2961_v26 = vrot.slane %v2936_v9, %v2944_v36 }
 0xff7   :  { %2926 = vperm.xlu0 %3314, %v6804_v51  }
0x106a   :  { %v2914_v28 = vpop.xlane.xlu0 %2913 }
0x106b   :  { %v2915_v21 = vadd.f32 %v2914_v28, %v6798_v54 }
0x106d   :  { %2938 = vperm.xlu1 %3313, %v2915_v21  }
0x1072   :  { %v2927_v58 = vpop.permute.xlu0 %2926 }
0x1073   :  { %v2949_v61 = vrot.slane %v2927_v58, %v2944_v36 }
0x1075   :  { %v2967_v59 = vsel %vm2966_vm2, %v2949_v61, %v2945_v47 }
0x1076   :  { %v2969_v8 = vsel %vm2968_vm3, %v2953_v46, %v2967_v59 }
0x1077   :  { %v2971_v54 = vsel %vm2970_vm4, %v2957_v7, %v2969_v8 }
0x1078   :  { %v2973_v16 = vsel %vm2972_vm5, %v2961_v26, %v2971_v54 }
0x10e8   :  { %v2939_v10 = vpop.permute.xlu1 %2938 }
0x10e9   :  { %v2965_v13 = vrot.slane %v2939_v10, %v2944_v36 }
0x10eb   :  { %v2975_v18 = vsel %vm2974_vm6, %v2965_v13, %v2973_v16 }
0x10ec   :  { %2978 = vst.msk [vmem:[%s6138_s6] sm:$0x3f] %vm2977_vm7, %v2975_v18 }

</bundles_post_ra>
